<compile_context>
chip_gen: v7x
topology: tpu7x:2x2x1
jax: 0.10.0
libtpu: 0.0.40
codegen_flags: <defaults>
</compile_context>

<pallas_src>
import functools
import math

import jax
import jax.numpy as jnp
from jax.experimental import pallas as pl
from jax.experimental.pallas import tpu as pltpu

SD_PAD = 128           # lane-padded action-head output width (dense stores)
_NEG_INF = -1e30       # additive score mask for padded source positions


# ----------------------------------------------------------------------------
# Fixed positional embedding (same synthetic backbone pos as before)
# ----------------------------------------------------------------------------

def sine_pos_2d(H, W, d):
    """DETR-like 2D sinusoidal position embedding, shape (1, d, H, W)."""
    dh = d // 2
    dim_t = 10000.0 ** (2 * (jnp.arange(dh) // 2) / dh)
    pos_y = jnp.arange(H, dtype=jnp.float32)[:, None] / dim_t    # (H, dh)
    pos_x = jnp.arange(W, dtype=jnp.float32)[:, None] / dim_t    # (W, dh)
    pos_y = jnp.stack([jnp.sin(pos_y[:, 0::2]), jnp.cos(pos_y[:, 1::2])],
                      axis=2).reshape(H, dh)
    pos_x = jnp.stack([jnp.sin(pos_x[:, 0::2]), jnp.cos(pos_x[:, 1::2])],
                      axis=2).reshape(W, dh)
    pos = jnp.concatenate(
        [jnp.broadcast_to(pos_y[:, None, :], (H, W, dh)),
         jnp.broadcast_to(pos_x[None, :, :], (H, W, dh))], axis=-1)   # (H, W, d)
    return pos.transpose(2, 0, 1)[None].astype(jnp.float32)


# ----------------------------------------------------------------------------
# Deterministic parameter init (PyTorch-layout weights, same as before)
# ----------------------------------------------------------------------------

def init_params(key, cfg):
    D = cfg["hidden_dim"]
    S = cfg["state_dim"]
    L = cfg["latent_dim"]
    Cbb = cfg["backbone_channels"]
    F = cfg["ffn_dim"]
    keys = iter(jax.random.split(key, 64))

    def w(shape, scale=0.02):
        return scale * jax.random.normal(next(keys), shape, jnp.float32)

    def attn_params():
        return dict(wq=w((D, D)), bq=jnp.zeros((D,), jnp.float32),
                    wk=w((D, D)), bk=jnp.zeros((D,), jnp.float32),
                    wv=w((D, D)), bv=jnp.zeros((D,), jnp.float32),
                    wo=w((D, D)), bo=jnp.zeros((D,), jnp.float32))

    def ln():
        return jnp.ones((D,), jnp.float32), jnp.zeros((D,), jnp.float32)

    enc = dict(self_attn=attn_params(),
               lin1_w=w((F, D)), lin1_b=jnp.zeros((F,), jnp.float32),
               lin2_w=w((D, F)), lin2_b=jnp.zeros((D,), jnp.float32))
    enc["norm1_g"], enc["norm1_b"] = ln()
    enc["norm2_g"], enc["norm2_b"] = ln()

    dec = dict(self_attn=attn_params(), cross_attn=attn_params(),
               lin1_w=w((F, D)), lin1_b=jnp.zeros((F,), jnp.float32),
               lin2_w=w((D, F)), lin2_b=jnp.zeros((D,), jnp.float32))
    dec["norm1_g"], dec["norm1_b"] = ln()
    dec["norm2_g"], dec["norm2_b"] = ln()
    dec["norm3_g"], dec["norm3_b"] = ln()

    dn_g, dn_b = ln()
    transformer = dict(enc=enc, dec=dec, dec_norm_g=dn_g, dec_norm_b=dn_b)

    params = dict(
        backbones=[dict(w=w((Cbb, 3)), b=jnp.zeros((Cbb,), jnp.float32))
                   for _ in range(cfg["num_cams"])],
        input_proj_w=w((D, Cbb)), input_proj_b=jnp.zeros((D,), jnp.float32),
        input_proj_robot_state_w=w((D, S)),
        input_proj_robot_state_b=jnp.zeros((D,), jnp.float32),
        latent_out_proj_w=w((D, L)), latent_out_proj_b=jnp.zeros((D,), jnp.float32),
        query_embed=w((cfg["num_queries"], D), scale=1.0),
        latent_pos=w((1, D), scale=1.0),
        robot_state_pos=w((1, D), scale=1.0),
        action_head_w=w((S, D)), action_head_b=jnp.zeros((S,), jnp.float32),
        pos_2d=sine_pos_2d(cfg["img_h"], cfg["img_w"], D),
        transformer=transformer,
    )
    return params


def _seq_dims(cfg):
    S_img = cfg["img_h"] * cfg["img_w"] * cfg["num_cams"]
    S_src = 2 + S_img                     # [latent, robot_state, image tokens]
    S_pad = ((S_src + 7) // 8) * 8        # sublane-aligned sequence length
    return S_img, S_src, S_pad


# ----------------------------------------------------------------------------
# One-time weight preparation (batch-size independent)
# ----------------------------------------------------------------------------

_PREP_ORDER = (
    "w_img", "latent_row", "w_rs", "b_rs",
    "enc_wqkv", "enc_bqkv", "enc_wo", "enc_bo",
    "enc_w1", "enc_b1", "enc_w2", "enc_b2",
    "x_dec0", "q0",
    "dec_ca_wkv", "dec_ca_bkv", "dec_ca_wo", "dec_ca_bo",
    "dec_w1", "dec_b1", "dec_w2", "dec_b2",
    "ln_g", "ln_b", "w_head", "b_head",
    "ones_bd", "mask_add",
)


def prepare_params(params, cfg):
    """Transpose to (K, N), fuse QKV + pos + scale, fuse backbone/input-proj convs,
    fold the input-independent decoder self-attention block, and build the
    block-diagonal attention constants.  No batch dependence."""
    D = cfg["hidden_dim"]
    H, W, nc = cfg["img_h"], cfg["img_w"], cfg["num_cams"]
    nh = cfg["nheads"]
    hd = D // nh
    Q = cfg["num_queries"]
    sd = cfg["state_dim"]
    scale = 1.0 / math.sqrt(hd)
    S_img, S_src, S_pad = _seq_dims(cfg)
    tp = params["transformer"]
    enc, dec = tp["enc"], tp["dec"]

    def pad_rows(x):
        return jnp.pad(x, ((0, S_pad - S_src), (0, 0)))

    def layer_norm(x, g, b):
        mean = jnp.mean(x, axis=-1, keepdims=True)
        c = x - mean
        var = jnp.mean(c * c, axis=-1, keepdims=True)
        return c * jax.lax.rsqrt(var + 1e-5) * g + b

    # positional sequence (S_src, D), matching the torch concat/flatten ordering
    pos_hw = params["pos_2d"][0].transpose(1, 2, 0)                        # (H, W, D)
    pos_img = jnp.broadcast_to(pos_hw[:, None, :, :], (H, nc, W, D)).reshape(S_img, D)
    pos_seq = jnp.concatenate([params["latent_pos"], params["robot_state_pos"],
                               pos_img], axis=0)                            # (S_src, D)
    query_pos = params["query_embed"]                                       # (Q, D)

    # --- encoder self-attention: fused q|k|v; pos + scale folded into weight/bias ---
    esa = enc["self_attn"]
    wq_t, wk_t, wv_t = esa["wq"].T * scale, esa["wk"].T, esa["wv"].T
    enc_wqkv = jnp.concatenate([wq_t, wk_t, wv_t], axis=1)                  # (D, 3D)
    enc_bqkv = pad_rows(jnp.concatenate(
        [pos_seq @ wq_t + esa["bq"] * scale,
         pos_seq @ wk_t + esa["bk"],
         jnp.broadcast_to(esa["bv"][None, :], (S_src, D))], axis=1))        # (S_pad, 3D)

    # --- decoder self-attention block: tgt == 0 -> entirely input-independent.
    #     Fold attn -> out-proj -> norm1 and the cross-attention Q projection. ---
    dsa = dec["self_attn"]
    qp = (query_pos @ dsa["wq"].T + dsa["bq"]) * scale
    kp = query_pos @ dsa["wk"].T + dsa["bk"]
    vp = jnp.broadcast_to(dsa["bv"][None, :], (Q, D))                       # 0 @ Wv + bv
    heads = []
    for h in range(nh):
        sl = slice(h * hd, (h + 1) * hd)
        p = jax.nn.softmax(qp[:, sl] @ kp[:, sl].T, axis=-1)
        heads.append(p @ vp[:, sl])
    sa_out = jnp.concatenate(heads, axis=1) @ dsa["wo"].T + dsa["bo"]
    x_dec0 = layer_norm(sa_out, dec["norm1_g"], dec["norm1_b"])             # (Q, D)

    ca = dec["cross_attn"]
    q0 = ((x_dec0 + query_pos) @ ca["wq"].T + ca["bq"]) * scale             # (Q, D)
    dec_ca_wkv = jnp.concatenate([ca["wk"].T, ca["wv"].T], axis=1)          # (D, 2D)
    dec_ca_bkv = pad_rows(jnp.concatenate(
        [pos_seq @ ca["wk"].T + ca["bk"],
         jnp.broadcast_to(ca["bv"][None, :], (S_src, D))], axis=1))         # (S_pad, 2D)

    # --- fused backbone(3->Cbb) + input_proj(Cbb->D) per camera (bias via ones slot) ---
    rows = []
    for c in range(nc):
        bb = params["backbones"][c]
        wc = (params["input_proj_w"] @ bb["w"]).T                           # (3, D)
        bc = bb["b"] @ params["input_proj_w"].T + params["input_proj_b"]    # (D,)
        rows.append(jnp.concatenate([wc, bc[None, :]], axis=0))             # (4, D)
    w_img = jnp.concatenate(rows, axis=0)                                   # (4*nc, D)

    # --- layer-norm tables: rows [enc1, enc2, dec_cross, dec_ffn, dec_final] + pad ---
    ln_g = jnp.stack([enc["norm1_g"], enc["norm2_g"], dec["norm2_g"],
                      dec["norm3_g"], tp["dec_norm_g"]] +
                     [jnp.ones((D,), jnp.float32)] * 3, axis=0)             # (8, D)
    ln_b = jnp.stack([enc["norm1_b"], enc["norm2_b"], dec["norm2_b"],
                      dec["norm3_b"], tp["dec_norm_b"]] +
                     [jnp.zeros((D,), jnp.float32)] * 3, axis=0)            # (8, D)

    # --- lane-padded action head (dense final store) ---
    w_head = jnp.zeros((D, SD_PAD), jnp.float32).at[:, :sd].set(
        params["action_head_w"].T)
    b_head = jnp.zeros((1, SD_PAD), jnp.float32).at[:, :sd].set(
        params["action_head_b"])

    # --- block-diagonal multi-head attention constants ---
    head_of_lane = jnp.arange(D) // hd                                      # (D,)
    blk_of_row = jnp.arange(nh * S_pad) // S_pad                            # (nh*S_pad,)
    ones_bd = (blk_of_row[:, None] == head_of_lane[None, :]).astype(jnp.float32)
    col_in_blk = jnp.arange(nh * S_pad) % S_pad
    mask_add = jnp.where(col_in_blk < S_src, 0.0,
                         _NEG_INF).astype(jnp.float32)[None, :]             # (1, nh*S_pad)

    return dict(
        w_img=w_img,
        latent_row=params["latent_out_proj_b"][None, :],   # zero-latent proj = bias
        w_rs=params["input_proj_robot_state_w"].T,
        b_rs=params["input_proj_robot_state_b"][None, :],
        enc_wqkv=enc_wqkv, enc_bqkv=enc_bqkv,
        enc_wo=esa["wo"].T, enc_bo=esa["bo"][None, :],
        enc_w1=enc["lin1_w"].T, enc_b1=enc["lin1_b"][None, :],
        enc_w2=enc["lin2_w"].T, enc_b2=enc["lin2_b"][None, :],
        x_dec0=x_dec0, q0=q0,
        dec_ca_wkv=dec_ca_wkv, dec_ca_bkv=dec_ca_bkv,
        dec_ca_wo=ca["wo"].T, dec_ca_bo=ca["bo"][None, :],
        dec_w1=dec["lin1_w"].T, dec_b1=dec["lin1_b"][None, :],
        dec_w2=dec["lin2_w"].T, dec_b2=dec["lin2_b"][None, :],
        ln_g=ln_g, ln_b=ln_b, w_head=w_head, b_head=b_head,
        ones_bd=ones_bd, mask_add=mask_add,
    )


# ----------------------------------------------------------------------------
# The fused Pallas kernel: whole DETRVAE forward for one batch element
# ----------------------------------------------------------------------------

def _detrvae_kernel(
        # runtime inputs (per-batch blocks)
        x_img_ref, rs_ref,
        # input projections
        w_img_ref, latent_ref, w_rs_ref, b_rs_ref,
        # encoder layer
        enc_wqkv_ref, enc_bqkv_ref, enc_wo_ref, enc_bo_ref,
        enc_w1_ref, enc_b1_ref, enc_w2_ref, enc_b2_ref,
        # decoder layer (self-attn block pre-folded into x_dec0 / q0)
        x_dec0_ref, q0_ref,
        dec_ca_wkv_ref, dec_ca_bkv_ref, dec_ca_wo_ref, dec_ca_bo_ref,
        dec_w1_ref, dec_b1_ref, dec_w2_ref, dec_b2_ref,
        # layer norms: rows [enc1, enc2, dec_cross, dec_ffn, dec_final]
        ln_g_ref, ln_b_ref,
        # action head (lane-padded to SD_PAD)
        w_head_ref, b_head_ref,
        # block-diagonal attention constants
        ones_bd_ref, mask_ref,
        # output
        a_hat_ref,
        *, S_src, S_pad, D, nheads):

    f32 = jnp.float32

    def mm(a, b):
        return jnp.dot(a, b, preferred_element_type=f32)

    ln_g = ln_g_ref[...]
    ln_b = ln_b_ref[...]

    def ln(x, idx):
        g = ln_g[idx:idx + 1, :]
        beta = ln_b[idx:idx + 1, :]
        mean = jnp.mean(x, axis=-1, keepdims=True)
        c = x - mean
        var = jnp.mean(c * c, axis=-1, keepdims=True)
        return c * jax.lax.rsqrt(var + 1e-5) * g + beta

    ones_bd = ones_bd_ref[...]     # (nheads*S_pad, D): 1 where lane belongs to row's head
    mask_add = mask_ref[...]       # (1, nheads*S_pad): 0 on valid keys, -1e30 on padding

    def mha(q, k, v):
        """All heads of one batch element in a single lane-dense pass.

        Block-diagonal trick: K/V are replicated per head along (8-aligned)
        sublane blocks and masked to that head's lane block, so head separation
        falls out of three ordinary MXU matmuls instead of per-head strided
        8-lane slices / masked strip stores.
        """
        k_bd = jnp.concatenate([k] * nheads, axis=0) * ones_bd       # (nh*S_pad, D)
        v_bd = jnp.concatenate([v] * nheads, axis=0) * ones_bd       # (nh*S_pad, D)
        s = jax.lax.dot_general(q, k_bd, (((1,), (1,)), ((), ())),
                                preferred_element_type=f32)          # (Sq, nh*S_pad)
        s = s + mask_add
        p = jnp.exp(s - jnp.max(s, axis=-1, keepdims=True))
        # exact per-head normalization (no approx reciprocal: f32 parity)
        return mm(p, v_bd) / mm(p, ones_bd)

    # ---- source sequence: [latent, robot_state, image tokens, zero pad] ----
    rs_row = mm(rs_ref[...], w_rs_ref[...]) + b_rs_ref[...]          # (1, D)
    img = mm(x_img_ref[...], w_img_ref[...])                         # (S_img, D)
    pieces = [latent_ref[...], rs_row, img]
    if S_pad > S_src:
        pieces.append(jnp.zeros((S_pad - S_src, D), f32))
    src = jnp.concatenate(pieces, axis=0)                            # (S_pad, D)

    # ---- transformer encoder layer (post-norm; pos folded into fused QKV bias) ----
    qkv = mm(src, enc_wqkv_ref[...]) + enc_bqkv_ref[...]             # (S_pad, 3D)
    attn = mha(qkv[:, :D], qkv[:, D:2 * D], qkv[:, 2 * D:])
    x = ln(src + mm(attn, enc_wo_ref[...]) + enc_bo_ref[...], 0)
    ff = jnp.maximum(mm(x, enc_w1_ref[...]) + enc_b1_ref[...], 0.0)
    memory = ln(x + mm(ff, enc_w2_ref[...]) + enc_b2_ref[...], 1)

    # ---- transformer decoder layer ----
    # self-attention block is input-independent (tgt == 0): folded at prepare time
    kv = mm(memory, dec_ca_wkv_ref[...]) + dec_ca_bkv_ref[...]       # (S_pad, 2D)
    ca = mha(q0_ref[...], kv[:, :D], kv[:, D:])                      # (Q, D)
    x = ln(x_dec0_ref[...] + mm(ca, dec_ca_wo_ref[...]) + dec_ca_bo_ref[...], 2)
    ff = jnp.maximum(mm(x, dec_w1_ref[...]) + dec_b1_ref[...], 0.0)
    x = ln(x + mm(ff, dec_w2_ref[...]) + dec_b2_ref[...], 3)
    hs = ln(x, 4)                                                    # decoder final norm

    # ---- action head (lane-padded output, dense store) ----
    a_hat_ref[...] = mm(hs, w_head_ref[...]) + b_head_ref[...]       # (Q, SD_PAD)


# ----------------------------------------------------------------------------
# Wrapper: per-batch grid pallas_call + tiny input prep
# ----------------------------------------------------------------------------

def build_forward(prep, cfg):
    D = cfg["hidden_dim"]
    nh = cfg["nheads"]
    H, W, nc = cfg["img_h"], cfg["img_w"], cfg["num_cams"]
    Q = cfg["num_queries"]
    sd = cfg["state_dim"]
    S_img, S_src, S_pad = _seq_dims(cfg)

    weights = tuple(prep[k] for k in _PREP_ORDER)
    kern = functools.partial(_detrvae_kernel, S_src=S_src, S_pad=S_pad,
                             D=D, nheads=nh)
    # weights are replicated across the batch grid (constant block index)
    weight_specs = [pl.BlockSpec(w.shape, lambda b, _n=w.ndim: (0,) * _n)
                    for w in weights]

    def forward(image, robot_state):
        B = image.shape[0]
        # Per-pixel augmented input: a pixel from camera c carries its 3 channels
        # + a 1.0 in slots [4c:4c+4], other camera slots zero, so a single
        # (S_img, 4*nc) @ (4*nc, D) matmul applies the per-camera fused
        # backbone+input_proj weights and biases (exact; no nonlinearity between).
        pieces = []
        for c in range(nc):
            xc = image[:, c].transpose(0, 2, 3, 1)                        # (B, H, W, 3)
            xc = jnp.concatenate(
                [xc, jnp.ones(xc.shape[:-1] + (1,), jnp.float32)], axis=-1)
            xc = jnp.pad(xc, ((0, 0), (0, 0), (0, 0),
                              (4 * c, 4 * (nc - 1 - c))))
            pieces.append(xc)
        x_aug = jnp.concatenate(pieces, axis=2)                           # (B, H, nc*W, 4nc)
        x_aug = x_aug.reshape(B, S_img, 4 * nc).astype(jnp.float32)
        rs = robot_state.astype(jnp.float32).reshape(B, 1, sd)

        fused = pl.pallas_call(
            kern,
            out_shape=jax.ShapeDtypeStruct((B * Q, SD_PAD), jnp.float32),
            grid=(B,),
            in_specs=[pl.BlockSpec((None, S_img, 4 * nc), lambda b: (b, 0, 0)),
                      pl.BlockSpec((None, 1, sd), lambda b: (b, 0, 0))]
                     + weight_specs,
            out_specs=pl.BlockSpec((Q, SD_PAD), lambda b: (b, 0)),
            compiler_params=pltpu.CompilerParams(
                dimension_semantics=("parallel",),        # 2nd TC on v7x
                vmem_limit_bytes=32 * 1024 * 1024),
        )
        a_full = fused(x_aug, rs, *weights)
        a_hat = a_full.reshape(B, Q, SD_PAD)[:, :, :sd]
        # inference path: mu = logvar = None (actions is None, latent = 0)
        return a_hat, [None, None]

    return forward


# ----------------------------------------------------------------------------
# Main
# ----------------------------------------------------------------------------

if __name__ == "__main__":
    cfg = dict(hidden_dim=32, state_dim=8, latent_dim=32, num_queries=8,
               nheads=4, ffn_dim=64, num_cams=2, backbone_channels=16,
               img_h=4, img_w=4, num_next_action=0, kl_weight=0)

    key = jax.random.PRNGKey(0)
    pkey, dkey1, dkey2 = jax.random.split(key, 3)
    params = init_params(pkey, cfg)

    B = 2
    image = jax.random.normal(
        dkey1, (B, cfg["num_cams"], 3, cfg["img_h"], cfg["img_w"]), jnp.float32)
    robot_state = jax.random.normal(dkey2, (B, cfg["state_dim"]), jnp.float32)

    prep = prepare_params(params, cfg)
    fwd = jax.jit(build_forward(prep, cfg))
    a_hat, (mu, logvar) = fwd(image, robot_state)
    jax.block_until_ready(a_hat)

    assert a_hat.shape == (B, cfg["num_queries"], cfg["state_dim"])
    assert a_hat.dtype == jnp.float32
    assert mu is None and logvar is None
    print("KERNEL_OK")
</pallas_src>

<mosaic_0001>
module attributes {stable_mosaic.version = 11 : i64} {
  func.func @_detrvae_kernel(%arg0: i32, %arg1: memref<1x32x8xf32, #tpu.memory_space<vmem>>, %arg2: memref<1x1x8xf32, #tpu.memory_space<vmem>>, %arg3: memref<8x32xf32, #tpu.memory_space<vmem>>, %arg4: memref<1x32xf32, #tpu.memory_space<vmem>>, %arg5: memref<8x32xf32, #tpu.memory_space<vmem>>, %arg6: memref<1x32xf32, #tpu.memory_space<vmem>>, %arg7: memref<32x96xf32, #tpu.memory_space<vmem>>, %arg8: memref<40x96xf32, #tpu.memory_space<vmem>>, %arg9: memref<32x32xf32, #tpu.memory_space<vmem>>, %arg10: memref<1x32xf32, #tpu.memory_space<vmem>>, %arg11: memref<32x64xf32, #tpu.memory_space<vmem>>, %arg12: memref<1x64xf32, #tpu.memory_space<vmem>>, %arg13: memref<64x32xf32, #tpu.memory_space<vmem>>, %arg14: memref<1x32xf32, #tpu.memory_space<vmem>>, %arg15: memref<8x32xf32, #tpu.memory_space<vmem>>, %arg16: memref<8x32xf32, #tpu.memory_space<vmem>>, %arg17: memref<32x64xf32, #tpu.memory_space<vmem>>, %arg18: memref<40x64xf32, #tpu.memory_space<vmem>>, %arg19: memref<32x32xf32, #tpu.memory_space<vmem>>, %arg20: memref<1x32xf32, #tpu.memory_space<vmem>>, %arg21: memref<32x64xf32, #tpu.memory_space<vmem>>, %arg22: memref<1x64xf32, #tpu.memory_space<vmem>>, %arg23: memref<64x32xf32, #tpu.memory_space<vmem>>, %arg24: memref<1x32xf32, #tpu.memory_space<vmem>>, %arg25: memref<8x32xf32, #tpu.memory_space<vmem>>, %arg26: memref<8x32xf32, #tpu.memory_space<vmem>>, %arg27: memref<32x128xf32, #tpu.memory_space<vmem>>, %arg28: memref<1x128xf32, #tpu.memory_space<vmem>>, %arg29: memref<160x32xf32, #tpu.memory_space<vmem>>, %arg30: memref<1x160xf32, #tpu.memory_space<vmem>>, %arg31: memref<8x128xf32, #tpu.memory_space<vmem>>) attributes {dimension_semantics = [#tpu.dimension_semantics<parallel>], iteration_bounds = array<i64: 2>, scalar_prefetch = 0 : i64, scratch_operands = 0 : i64, tpu.core_type = #tpu.core_type<tc>, window_params = [{transform_indices = @transform_0, window_bounds = array<i64: 1, 32, 8>}, {transform_indices = @transform_1, window_bounds = array<i64: 1, 1, 8>}, {pipeline_mode = #tpu.pipeline_mode<synchronous>, transform_indices = @transform_2, window_bounds = array<i64: 8, 32>}, {pipeline_mode = #tpu.pipeline_mode<synchronous>, transform_indices = @transform_3, window_bounds = array<i64: 1, 32>}, {pipeline_mode = #tpu.pipeline_mode<synchronous>, transform_indices = @transform_4, window_bounds = array<i64: 8, 32>}, {pipeline_mode = #tpu.pipeline_mode<synchronous>, transform_indices = @transform_5, window_bounds = array<i64: 1, 32>}, {pipeline_mode = #tpu.pipeline_mode<synchronous>, transform_indices = @transform_6, window_bounds = array<i64: 32, 96>}, {pipeline_mode = #tpu.pipeline_mode<synchronous>, transform_indices = @transform_7, window_bounds = array<i64: 40, 96>}, {pipeline_mode = #tpu.pipeline_mode<synchronous>, transform_indices = @transform_8, window_bounds = array<i64: 32, 32>}, {pipeline_mode = #tpu.pipeline_mode<synchronous>, transform_indices = @transform_9, window_bounds = array<i64: 1, 32>}, {pipeline_mode = #tpu.pipeline_mode<synchronous>, transform_indices = @transform_10, window_bounds = array<i64: 32, 64>}, {pipeline_mode = #tpu.pipeline_mode<synchronous>, transform_indices = @transform_11, window_bounds = array<i64: 1, 64>}, {pipeline_mode = #tpu.pipeline_mode<synchronous>, transform_indices = @transform_12, window_bounds = array<i64: 64, 32>}, {pipeline_mode = #tpu.pipeline_mode<synchronous>, transform_indices = @transform_13, window_bounds = array<i64: 1, 32>}, {pipeline_mode = #tpu.pipeline_mode<synchronous>, transform_indices = @transform_14, window_bounds = array<i64: 8, 32>}, {pipeline_mode = #tpu.pipeline_mode<synchronous>, transform_indices = @transform_15, window_bounds = array<i64: 8, 32>}, {pipeline_mode = #tpu.pipeline_mode<synchronous>, transform_indices = @transform_16, window_bounds = array<i64: 32, 64>}, {pipeline_mode = #tpu.pipeline_mode<synchronous>, transform_indices = @transform_17, window_bounds = array<i64: 40, 64>}, {pipeline_mode = #tpu.pipeline_mode<synchronous>, transform_indices = @transform_18, window_bounds = array<i64: 32, 32>}, {pipeline_mode = #tpu.pipeline_mode<synchronous>, transform_indices = @transform_19, window_bounds = array<i64: 1, 32>}, {pipeline_mode = #tpu.pipeline_mode<synchronous>, transform_indices = @transform_20, window_bounds = array<i64: 32, 64>}, {pipeline_mode = #tpu.pipeline_mode<synchronous>, transform_indices = @transform_21, window_bounds = array<i64: 1, 64>}, {pipeline_mode = #tpu.pipeline_mode<synchronous>, transform_indices = @transform_22, window_bounds = array<i64: 64, 32>}, {pipeline_mode = #tpu.pipeline_mode<synchronous>, transform_indices = @transform_23, window_bounds = array<i64: 1, 32>}, {pipeline_mode = #tpu.pipeline_mode<synchronous>, transform_indices = @transform_24, window_bounds = array<i64: 8, 32>}, {pipeline_mode = #tpu.pipeline_mode<synchronous>, transform_indices = @transform_25, window_bounds = array<i64: 8, 32>}, {pipeline_mode = #tpu.pipeline_mode<synchronous>, transform_indices = @transform_26, window_bounds = array<i64: 32, 128>}, {pipeline_mode = #tpu.pipeline_mode<synchronous>, transform_indices = @transform_27, window_bounds = array<i64: 1, 128>}, {pipeline_mode = #tpu.pipeline_mode<synchronous>, transform_indices = @transform_28, window_bounds = array<i64: 160, 32>}, {pipeline_mode = #tpu.pipeline_mode<synchronous>, transform_indices = @transform_29, window_bounds = array<i64: 1, 160>}, {transform_indices = @transform_30, window_bounds = array<i64: 8, 128>}]} {
    %c0 = arith.constant 0 : index
    %c0_0 = arith.constant 0 : index
    %0 = vector.load %arg25[%c0, %c0_0] : memref<8x32xf32, #tpu.memory_space<vmem>>, vector<8x32xf32>
    %c0_1 = arith.constant 0 : index
    %c0_2 = arith.constant 0 : index
    %1 = vector.load %arg26[%c0_1, %c0_2] : memref<8x32xf32, #tpu.memory_space<vmem>>, vector<8x32xf32>
    %c0_3 = arith.constant 0 : index
    %c0_4 = arith.constant 0 : index
    %2 = vector.load %arg29[%c0_3, %c0_4] : memref<160x32xf32, #tpu.memory_space<vmem>>, vector<160x32xf32>
    %c0_5 = arith.constant 0 : index
    %c0_6 = arith.constant 0 : index
    %3 = vector.load %arg30[%c0_5, %c0_6] : memref<1x160xf32, #tpu.memory_space<vmem>>, vector<1x160xf32>
    %c0_7 = arith.constant 0 : index
    %c0_8 = arith.constant 0 : index
    %c0_9 = arith.constant 0 : index
    %4 = vector.load %arg2[%c0_7, %c0_8, %c0_9] : memref<1x1x8xf32, #tpu.memory_space<vmem>>, vector<1x1x8xf32>
    %5 = vector.shape_cast %4 : vector<1x1x8xf32> to vector<1x8xf32>
    %c0_10 = arith.constant 0 : index
    %c0_11 = arith.constant 0 : index
    %6 = vector.load %arg5[%c0_10, %c0_11] : memref<8x32xf32, #tpu.memory_space<vmem>>, vector<8x32xf32>
    %cst = arith.constant dense<0.000000e+00> : vector<1x32xf32>
    %7 = tpu.matmul %5, %6, %cst {dimension_numbers = #tpu.dot_dimension_numbers<[1], [0], [0], [1], [0, 0, 1, 1], [], []>} : vector<1x8xf32>, vector<8x32xf32>, vector<1x32xf32> -> vector<1x32xf32>
    %c0_12 = arith.constant 0 : index
    %c0_13 = arith.constant 0 : index
    %8 = vector.load %arg6[%c0_12, %c0_13] : memref<1x32xf32, #tpu.memory_space<vmem>>, vector<1x32xf32>
    %9 = arith.addf %7, %8 : vector<1x32xf32>
    %c0_14 = arith.constant 0 : index
    %c0_15 = arith.constant 0 : index
    %c0_16 = arith.constant 0 : index
    %10 = vector.load %arg1[%c0_14, %c0_15, %c0_16] : memref<1x32x8xf32, #tpu.memory_space<vmem>>, vector<1x32x8xf32>
    %11 = vector.shape_cast %10 : vector<1x32x8xf32> to vector<32x8xf32>
    %c0_17 = arith.constant 0 : index
    %c0_18 = arith.constant 0 : index
    %12 = vector.load %arg3[%c0_17, %c0_18] : memref<8x32xf32, #tpu.memory_space<vmem>>, vector<8x32xf32>
    %cst_19 = arith.constant dense<0.000000e+00> : vector<32x32xf32>
    %13 = tpu.matmul %11, %12, %cst_19 {dimension_numbers = #tpu.dot_dimension_numbers<[1], [0], [0], [1], [0, 0, 1, 1], [], []>} : vector<32x8xf32>, vector<8x32xf32>, vector<32x32xf32> -> vector<32x32xf32>
    %c0_20 = arith.constant 0 : index
    %c0_21 = arith.constant 0 : index
    %14 = vector.load %arg4[%c0_20, %c0_21] : memref<1x32xf32, #tpu.memory_space<vmem>>, vector<1x32xf32>
    %cst_22 = arith.constant 0.000000e+00 : f32
    %15 = vector.broadcast %cst_22 : f32 to vector<6x32xf32>
    %16 = tpu.concatenate %14, %9, %13, %15 in 0 : vector<1x32xf32>, vector<1x32xf32>, vector<32x32xf32>, vector<6x32xf32> -> vector<40x32xf32>
    %c0_23 = arith.constant 0 : index
    %c0_24 = arith.constant 0 : index
    %17 = vector.load %arg7[%c0_23, %c0_24] : memref<32x96xf32, #tpu.memory_space<vmem>>, vector<32x96xf32>
    %cst_25 = arith.constant dense<0.000000e+00> : vector<40x96xf32>
    %18 = tpu.matmul %16, %17, %cst_25 {dimension_numbers = #tpu.dot_dimension_numbers<[1], [0], [0], [1], [0, 0, 1, 1], [], []>} : vector<40x32xf32>, vector<32x96xf32>, vector<40x96xf32> -> vector<40x96xf32>
    %c0_26 = arith.constant 0 : index
    %c0_27 = arith.constant 0 : index
    %19 = vector.load %arg8[%c0_26, %c0_27] : memref<40x96xf32, #tpu.memory_space<vmem>>, vector<40x96xf32>
    %20 = arith.addf %18, %19 : vector<40x96xf32>
    %21 = vector.extract_strided_slice %20 {offsets = [0, 0], sizes = [40, 32], strides = [1, 1]} : vector<40x96xf32> to vector<40x32xf32>
    %22 = vector.extract_strided_slice %20 {offsets = [0, 32], sizes = [40, 32], strides = [1, 1]} : vector<40x96xf32> to vector<40x32xf32>
    %23 = vector.extract_strided_slice %20 {offsets = [0, 64], sizes = [40, 32], strides = [1, 1]} : vector<40x96xf32> to vector<40x32xf32>
    %24 = tpu.concatenate %22, %22, %22, %22 in 0 : vector<40x32xf32>, vector<40x32xf32>, vector<40x32xf32>, vector<40x32xf32> -> vector<160x32xf32>
    %25 = arith.mulf %24, %2 : vector<160x32xf32>
    %26 = tpu.concatenate %23, %23, %23, %23 in 0 : vector<40x32xf32>, vector<40x32xf32>, vector<40x32xf32>, vector<40x32xf32> -> vector<160x32xf32>
    %27 = arith.mulf %26, %2 : vector<160x32xf32>
    %cst_28 = arith.constant dense<0.000000e+00> : vector<40x160xf32>
    %28 = tpu.matmul %21, %25, %cst_28 {dimension_numbers = #tpu.dot_dimension_numbers<[1], [1], [0], [0], [0, 0, 1, 0], [], []>} : vector<40x32xf32>, vector<160x32xf32>, vector<40x160xf32> -> vector<40x160xf32>
    %29 = vector.broadcast %3 : vector<1x160xf32> to vector<40x160xf32>
    %30 = arith.addf %28, %29 : vector<40x160xf32>
    %cst_29 = arith.constant dense<0xFF800000> : vector<40xf32>
    %31 = vector.multi_reduction <maximumf>, %30, %cst_29 [1] : vector<40x160xf32> to vector<40xf32>
    %32 = vector.shape_cast %31 : vector<40xf32> to vector<40x1xf32>
    %33 = vector.broadcast %32 : vector<40x1xf32> to vector<40x160xf32>
    %34 = arith.subf %30, %33 : vector<40x160xf32>
    %35 = math.exp %34 : vector<40x160xf32>
    %cst_30 = arith.constant dense<0.000000e+00> : vector<40x32xf32>
    %36 = tpu.matmul %35, %27, %cst_30 {dimension_numbers = #tpu.dot_dimension_numbers<[1], [0], [0], [1], [0, 0, 1, 1], [], []>} : vector<40x160xf32>, vector<160x32xf32>, vector<40x32xf32> -> vector<40x32xf32>
    %cst_31 = arith.constant dense<0.000000e+00> : vector<40x32xf32>
    %37 = tpu.matmul %35, %2, %cst_31 {dimension_numbers = #tpu.dot_dimension_numbers<[1], [0], [0], [1], [0, 0, 1, 1], [], []>} : vector<40x160xf32>, vector<160x32xf32>, vector<40x32xf32> -> vector<40x32xf32>
    %38 = arith.divf %36, %37 : vector<40x32xf32>
    %c0_32 = arith.constant 0 : index
    %c0_33 = arith.constant 0 : index
    %39 = vector.load %arg9[%c0_32, %c0_33] : memref<32x32xf32, #tpu.memory_space<vmem>>, vector<32x32xf32>
    %cst_34 = arith.constant dense<0.000000e+00> : vector<40x32xf32>
    %40 = tpu.matmul %38, %39, %cst_34 {dimension_numbers = #tpu.dot_dimension_numbers<[1], [0], [0], [1], [0, 0, 1, 1], [], []>} : vector<40x32xf32>, vector<32x32xf32>, vector<40x32xf32> -> vector<40x32xf32>
    %41 = arith.addf %16, %40 : vector<40x32xf32>
    %c0_35 = arith.constant 0 : index
    %c0_36 = arith.constant 0 : index
    %42 = vector.load %arg10[%c0_35, %c0_36] : memref<1x32xf32, #tpu.memory_space<vmem>>, vector<1x32xf32>
    %43 = vector.broadcast %42 : vector<1x32xf32> to vector<40x32xf32>
    %44 = arith.addf %41, %43 : vector<40x32xf32>
    %45 = vector.extract_strided_slice %0 {offsets = [0, 0], sizes = [1, 32], strides = [1, 1]} : vector<8x32xf32> to vector<1x32xf32>
    %46 = vector.extract_strided_slice %1 {offsets = [0, 0], sizes = [1, 32], strides = [1, 1]} : vector<8x32xf32> to vector<1x32xf32>
    %cst_37 = arith.constant dense<0.000000e+00> : vector<40xf32>
    %47 = vector.multi_reduction <add>, %44, %cst_37 [1] : vector<40x32xf32> to vector<40xf32>
    %48 = vector.shape_cast %47 : vector<40xf32> to vector<40x1xf32>
    %cst_38 = arith.constant 3.200000e+01 : f32
    %49 = vector.broadcast %cst_38 : f32 to vector<40x1xf32>
    %50 = arith.divf %48, %49 : vector<40x1xf32>
    %51 = vector.broadcast %50 : vector<40x1xf32> to vector<40x32xf32>
    %52 = arith.subf %44, %51 : vector<40x32xf32>
    %53 = arith.mulf %52, %52 : vector<40x32xf32>
    %cst_39 = arith.constant dense<0.000000e+00> : vector<40xf32>
    %54 = vector.multi_reduction <add>, %53, %cst_39 [1] : vector<40x32xf32> to vector<40xf32>
    %55 = vector.shape_cast %54 : vector<40xf32> to vector<40x1xf32>
    %cst_40 = arith.constant 3.200000e+01 : f32
    %56 = vector.broadcast %cst_40 : f32 to vector<40x1xf32>
    %57 = arith.divf %55, %56 : vector<40x1xf32>
    %cst_41 = arith.constant 9.99999974E-6 : f32
    %58 = vector.broadcast %cst_41 : f32 to vector<40x1xf32>
    %59 = arith.addf %57, %58 : vector<40x1xf32>
    %60 = math.rsqrt %59 : vector<40x1xf32>
    %61 = vector.broadcast %60 : vector<40x1xf32> to vector<40x32xf32>
    %62 = arith.mulf %52, %61 : vector<40x32xf32>
    %63 = vector.broadcast %45 : vector<1x32xf32> to vector<40x32xf32>
    %64 = arith.mulf %62, %63 : vector<40x32xf32>
    %65 = vector.broadcast %46 : vector<1x32xf32> to vector<40x32xf32>
    %66 = arith.addf %64, %65 : vector<40x32xf32>
    %c0_42 = arith.constant 0 : index
    %c0_43 = arith.constant 0 : index
    %67 = vector.load %arg11[%c0_42, %c0_43] : memref<32x64xf32, #tpu.memory_space<vmem>>, vector<32x64xf32>
    %cst_44 = arith.constant dense<0.000000e+00> : vector<40x64xf32>
    %68 = tpu.matmul %66, %67, %cst_44 {dimension_numbers = #tpu.dot_dimension_numbers<[1], [0], [0], [1], [0, 0, 1, 1], [], []>} : vector<40x32xf32>, vector<32x64xf32>, vector<40x64xf32> -> vector<40x64xf32>
    %c0_45 = arith.constant 0 : index
    %c0_46 = arith.constant 0 : index
    %69 = vector.load %arg12[%c0_45, %c0_46] : memref<1x64xf32, #tpu.memory_space<vmem>>, vector<1x64xf32>
    %70 = vector.broadcast %69 : vector<1x64xf32> to vector<40x64xf32>
    %71 = arith.addf %68, %70 : vector<40x64xf32>
    %cst_47 = arith.constant 0.000000e+00 : f32
    %72 = vector.broadcast %cst_47 : f32 to vector<40x64xf32>
    %73 = arith.maximumf %71, %72 : vector<40x64xf32>
    %c0_48 = arith.constant 0 : index
    %c0_49 = arith.constant 0 : index
    %74 = vector.load %arg13[%c0_48, %c0_49] : memref<64x32xf32, #tpu.memory_space<vmem>>, vector<64x32xf32>
    %cst_50 = arith.constant dense<0.000000e+00> : vector<40x32xf32>
    %75 = tpu.matmul %73, %74, %cst_50 {dimension_numbers = #tpu.dot_dimension_numbers<[1], [0], [0], [1], [0, 0, 1, 1], [], []>} : vector<40x64xf32>, vector<64x32xf32>, vector<40x32xf32> -> vector<40x32xf32>
    %76 = arith.addf %66, %75 : vector<40x32xf32>
    %c0_51 = arith.constant 0 : index
    %c0_52 = arith.constant 0 : index
    %77 = vector.load %arg14[%c0_51, %c0_52] : memref<1x32xf32, #tpu.memory_space<vmem>>, vector<1x32xf32>
    %78 = vector.broadcast %77 : vector<1x32xf32> to vector<40x32xf32>
    %79 = arith.addf %76, %78 : vector<40x32xf32>
    %80 = vector.extract_strided_slice %0 {offsets = [1, 0], sizes = [1, 32], strides = [1, 1]} : vector<8x32xf32> to vector<1x32xf32>
    %81 = vector.extract_strided_slice %1 {offsets = [1, 0], sizes = [1, 32], strides = [1, 1]} : vector<8x32xf32> to vector<1x32xf32>
    %cst_53 = arith.constant dense<0.000000e+00> : vector<40xf32>
    %82 = vector.multi_reduction <add>, %79, %cst_53 [1] : vector<40x32xf32> to vector<40xf32>
    %83 = vector.shape_cast %82 : vector<40xf32> to vector<40x1xf32>
    %cst_54 = arith.constant 3.200000e+01 : f32
    %84 = vector.broadcast %cst_54 : f32 to vector<40x1xf32>
    %85 = arith.divf %83, %84 : vector<40x1xf32>
    %86 = vector.broadcast %85 : vector<40x1xf32> to vector<40x32xf32>
    %87 = arith.subf %79, %86 : vector<40x32xf32>
    %88 = arith.mulf %87, %87 : vector<40x32xf32>
    %cst_55 = arith.constant dense<0.000000e+00> : vector<40xf32>
    %89 = vector.multi_reduction <add>, %88, %cst_55 [1] : vector<40x32xf32> to vector<40xf32>
    %90 = vector.shape_cast %89 : vector<40xf32> to vector<40x1xf32>
    %cst_56 = arith.constant 3.200000e+01 : f32
    %91 = vector.broadcast %cst_56 : f32 to vector<40x1xf32>
    %92 = arith.divf %90, %91 : vector<40x1xf32>
    %cst_57 = arith.constant 9.99999974E-6 : f32
    %93 = vector.broadcast %cst_57 : f32 to vector<40x1xf32>
    %94 = arith.addf %92, %93 : vector<40x1xf32>
    %95 = math.rsqrt %94 : vector<40x1xf32>
    %96 = vector.broadcast %95 : vector<40x1xf32> to vector<40x32xf32>
    %97 = arith.mulf %87, %96 : vector<40x32xf32>
    %98 = vector.broadcast %80 : vector<1x32xf32> to vector<40x32xf32>
    %99 = arith.mulf %97, %98 : vector<40x32xf32>
    %100 = vector.broadcast %81 : vector<1x32xf32> to vector<40x32xf32>
    %101 = arith.addf %99, %100 : vector<40x32xf32>
    %c0_58 = arith.constant 0 : index
    %c0_59 = arith.constant 0 : index
    %102 = vector.load %arg17[%c0_58, %c0_59] : memref<32x64xf32, #tpu.memory_space<vmem>>, vector<32x64xf32>
    %cst_60 = arith.constant dense<0.000000e+00> : vector<40x64xf32>
    %103 = tpu.matmul %101, %102, %cst_60 {dimension_numbers = #tpu.dot_dimension_numbers<[1], [0], [0], [1], [0, 0, 1, 1], [], []>} : vector<40x32xf32>, vector<32x64xf32>, vector<40x64xf32> -> vector<40x64xf32>
    %c0_61 = arith.constant 0 : index
    %c0_62 = arith.constant 0 : index
    %104 = vector.load %arg18[%c0_61, %c0_62] : memref<40x64xf32, #tpu.memory_space<vmem>>, vector<40x64xf32>
    %105 = arith.addf %103, %104 : vector<40x64xf32>
    %c0_63 = arith.constant 0 : index
    %c0_64 = arith.constant 0 : index
    %106 = vector.load %arg16[%c0_63, %c0_64] : memref<8x32xf32, #tpu.memory_space<vmem>>, vector<8x32xf32>
    %107 = vector.extract_strided_slice %105 {offsets = [0, 0], sizes = [40, 32], strides = [1, 1]} : vector<40x64xf32> to vector<40x32xf32>
    %108 = vector.extract_strided_slice %105 {offsets = [0, 32], sizes = [40, 32], strides = [1, 1]} : vector<40x64xf32> to vector<40x32xf32>
    %109 = tpu.concatenate %107, %107, %107, %107 in 0 : vector<40x32xf32>, vector<40x32xf32>, vector<40x32xf32>, vector<40x32xf32> -> vector<160x32xf32>
    %110 = arith.mulf %109, %2 : vector<160x32xf32>
    %111 = tpu.concatenate %108, %108, %108, %108 in 0 : vector<40x32xf32>, vector<40x32xf32>, vector<40x32xf32>, vector<40x32xf32> -> vector<160x32xf32>
    %112 = arith.mulf %111, %2 : vector<160x32xf32>
    %cst_65 = arith.constant dense<0.000000e+00> : vector<8x160xf32>
    %113 = tpu.matmul %106, %110, %cst_65 {dimension_numbers = #tpu.dot_dimension_numbers<[1], [1], [0], [0], [0, 0, 1, 0], [], []>} : vector<8x32xf32>, vector<160x32xf32>, vector<8x160xf32> -> vector<8x160xf32>
    %114 = vector.broadcast %3 : vector<1x160xf32> to vector<8x160xf32>
    %115 = arith.addf %113, %114 : vector<8x160xf32>
    %cst_66 = arith.constant dense<0xFF800000> : vector<8xf32>
    %116 = vector.multi_reduction <maximumf>, %115, %cst_66 [1] : vector<8x160xf32> to vector<8xf32>
    %117 = vector.shape_cast %116 : vector<8xf32> to vector<8x1xf32>
    %118 = vector.broadcast %117 : vector<8x1xf32> to vector<8x160xf32>
    %119 = arith.subf %115, %118 : vector<8x160xf32>
    %120 = math.exp %119 : vector<8x160xf32>
    %cst_67 = arith.constant dense<0.000000e+00> : vector<8x32xf32>
    %121 = tpu.matmul %120, %112, %cst_67 {dimension_numbers = #tpu.dot_dimension_numbers<[1], [0], [0], [1], [0, 0, 1, 1], [], []>} : vector<8x160xf32>, vector<160x32xf32>, vector<8x32xf32> -> vector<8x32xf32>
    %cst_68 = arith.constant dense<0.000000e+00> : vector<8x32xf32>
    %122 = tpu.matmul %120, %2, %cst_68 {dimension_numbers = #tpu.dot_dimension_numbers<[1], [0], [0], [1], [0, 0, 1, 1], [], []>} : vector<8x160xf32>, vector<160x32xf32>, vector<8x32xf32> -> vector<8x32xf32>
    %123 = arith.divf %121, %122 : vector<8x32xf32>
    %c0_69 = arith.constant 0 : index
    %c0_70 = arith.constant 0 : index
    %124 = vector.load %arg15[%c0_69, %c0_70] : memref<8x32xf32, #tpu.memory_space<vmem>>, vector<8x32xf32>
    %c0_71 = arith.constant 0 : index
    %c0_72 = arith.constant 0 : index
    %125 = vector.load %arg19[%c0_71, %c0_72] : memref<32x32xf32, #tpu.memory_space<vmem>>, vector<32x32xf32>
    %cst_73 = arith.constant dense<0.000000e+00> : vector<8x32xf32>
    %126 = tpu.matmul %123, %125, %cst_73 {dimension_numbers = #tpu.dot_dimension_numbers<[1], [0], [0], [1], [0, 0, 1, 1], [], []>} : vector<8x32xf32>, vector<32x32xf32>, vector<8x32xf32> -> vector<8x32xf32>
    %127 = arith.addf %124, %126 : vector<8x32xf32>
    %c0_74 = arith.constant 0 : index
    %c0_75 = arith.constant 0 : index
    %128 = vector.load %arg20[%c0_74, %c0_75] : memref<1x32xf32, #tpu.memory_space<vmem>>, vector<1x32xf32>
    %129 = vector.broadcast %128 : vector<1x32xf32> to vector<8x32xf32>
    %130 = arith.addf %127, %129 : vector<8x32xf32>
    %131 = vector.extract_strided_slice %0 {offsets = [2, 0], sizes = [1, 32], strides = [1, 1]} : vector<8x32xf32> to vector<1x32xf32>
    %132 = vector.extract_strided_slice %1 {offsets = [2, 0], sizes = [1, 32], strides = [1, 1]} : vector<8x32xf32> to vector<1x32xf32>
    %cst_76 = arith.constant dense<0.000000e+00> : vector<8xf32>
    %133 = vector.multi_reduction <add>, %130, %cst_76 [1] : vector<8x32xf32> to vector<8xf32>
    %134 = vector.shape_cast %133 : vector<8xf32> to vector<8x1xf32>
    %cst_77 = arith.constant 3.200000e+01 : f32
    %135 = vector.broadcast %cst_77 : f32 to vector<8x1xf32>
    %136 = arith.divf %134, %135 : vector<8x1xf32>
    %137 = vector.broadcast %136 : vector<8x1xf32> to vector<8x32xf32>
    %138 = arith.subf %130, %137 : vector<8x32xf32>
    %139 = arith.mulf %138, %138 : vector<8x32xf32>
    %cst_78 = arith.constant dense<0.000000e+00> : vector<8xf32>
    %140 = vector.multi_reduction <add>, %139, %cst_78 [1] : vector<8x32xf32> to vector<8xf32>
    %141 = vector.shape_cast %140 : vector<8xf32> to vector<8x1xf32>
    %cst_79 = arith.constant 3.200000e+01 : f32
    %142 = vector.broadcast %cst_79 : f32 to vector<8x1xf32>
    %143 = arith.divf %141, %142 : vector<8x1xf32>
    %cst_80 = arith.constant 9.99999974E-6 : f32
    %144 = vector.broadcast %cst_80 : f32 to vector<8x1xf32>
    %145 = arith.addf %143, %144 : vector<8x1xf32>
    %146 = math.rsqrt %145 : vector<8x1xf32>
    %147 = vector.broadcast %146 : vector<8x1xf32> to vector<8x32xf32>
    %148 = arith.mulf %138, %147 : vector<8x32xf32>
    %149 = vector.broadcast %131 : vector<1x32xf32> to vector<8x32xf32>
    %150 = arith.mulf %148, %149 : vector<8x32xf32>
    %151 = vector.broadcast %132 : vector<1x32xf32> to vector<8x32xf32>
    %152 = arith.addf %150, %151 : vector<8x32xf32>
    %c0_81 = arith.constant 0 : index
    %c0_82 = arith.constant 0 : index
    %153 = vector.load %arg21[%c0_81, %c0_82] : memref<32x64xf32, #tpu.memory_space<vmem>>, vector<32x64xf32>
    %cst_83 = arith.constant dense<0.000000e+00> : vector<8x64xf32>
    %154 = tpu.matmul %152, %153, %cst_83 {dimension_numbers = #tpu.dot_dimension_numbers<[1], [0], [0], [1], [0, 0, 1, 1], [], []>} : vector<8x32xf32>, vector<32x64xf32>, vector<8x64xf32> -> vector<8x64xf32>
    %c0_84 = arith.constant 0 : index
    %c0_85 = arith.constant 0 : index
    %155 = vector.load %arg22[%c0_84, %c0_85] : memref<1x64xf32, #tpu.memory_space<vmem>>, vector<1x64xf32>
    %156 = vector.broadcast %155 : vector<1x64xf32> to vector<8x64xf32>
    %157 = arith.addf %154, %156 : vector<8x64xf32>
    %cst_86 = arith.constant 0.000000e+00 : f32
    %158 = vector.broadcast %cst_86 : f32 to vector<8x64xf32>
    %159 = arith.maximumf %157, %158 : vector<8x64xf32>
    %c0_87 = arith.constant 0 : index
    %c0_88 = arith.constant 0 : index
    %160 = vector.load %arg23[%c0_87, %c0_88] : memref<64x32xf32, #tpu.memory_space<vmem>>, vector<64x32xf32>
    %cst_89 = arith.constant dense<0.000000e+00> : vector<8x32xf32>
    %161 = tpu.matmul %159, %160, %cst_89 {dimension_numbers = #tpu.dot_dimension_numbers<[1], [0], [0], [1], [0, 0, 1, 1], [], []>} : vector<8x64xf32>, vector<64x32xf32>, vector<8x32xf32> -> vector<8x32xf32>
    %162 = arith.addf %152, %161 : vector<8x32xf32>
    %c0_90 = arith.constant 0 : index
    %c0_91 = arith.constant 0 : index
    %163 = vector.load %arg24[%c0_90, %c0_91] : memref<1x32xf32, #tpu.memory_space<vmem>>, vector<1x32xf32>
    %164 = vector.broadcast %163 : vector<1x32xf32> to vector<8x32xf32>
    %165 = arith.addf %162, %164 : vector<8x32xf32>
    %166 = vector.extract_strided_slice %0 {offsets = [3, 0], sizes = [1, 32], strides = [1, 1]} : vector<8x32xf32> to vector<1x32xf32>
    %167 = vector.extract_strided_slice %1 {offsets = [3, 0], sizes = [1, 32], strides = [1, 1]} : vector<8x32xf32> to vector<1x32xf32>
    %cst_92 = arith.constant dense<0.000000e+00> : vector<8xf32>
    %168 = vector.multi_reduction <add>, %165, %cst_92 [1] : vector<8x32xf32> to vector<8xf32>
    %169 = vector.shape_cast %168 : vector<8xf32> to vector<8x1xf32>
    %cst_93 = arith.constant 3.200000e+01 : f32
    %170 = vector.broadcast %cst_93 : f32 to vector<8x1xf32>
    %171 = arith.divf %169, %170 : vector<8x1xf32>
    %172 = vector.broadcast %171 : vector<8x1xf32> to vector<8x32xf32>
    %173 = arith.subf %165, %172 : vector<8x32xf32>
    %174 = arith.mulf %173, %173 : vector<8x32xf32>
    %cst_94 = arith.constant dense<0.000000e+00> : vector<8xf32>
    %175 = vector.multi_reduction <add>, %174, %cst_94 [1] : vector<8x32xf32> to vector<8xf32>
    %176 = vector.shape_cast %175 : vector<8xf32> to vector<8x1xf32>
    %cst_95 = arith.constant 3.200000e+01 : f32
    %177 = vector.broadcast %cst_95 : f32 to vector<8x1xf32>
    %178 = arith.divf %176, %177 : vector<8x1xf32>
    %cst_96 = arith.constant 9.99999974E-6 : f32
    %179 = vector.broadcast %cst_96 : f32 to vector<8x1xf32>
    %180 = arith.addf %178, %179 : vector<8x1xf32>
    %181 = math.rsqrt %180 : vector<8x1xf32>
    %182 = vector.broadcast %181 : vector<8x1xf32> to vector<8x32xf32>
    %183 = arith.mulf %173, %182 : vector<8x32xf32>
    %184 = vector.broadcast %166 : vector<1x32xf32> to vector<8x32xf32>
    %185 = arith.mulf %183, %184 : vector<8x32xf32>
    %186 = vector.broadcast %167 : vector<1x32xf32> to vector<8x32xf32>
    %187 = arith.addf %185, %186 : vector<8x32xf32>
    %188 = vector.extract_strided_slice %0 {offsets = [4, 0], sizes = [1, 32], strides = [1, 1]} : vector<8x32xf32> to vector<1x32xf32>
    %189 = vector.extract_strided_slice %1 {offsets = [4, 0], sizes = [1, 32], strides = [1, 1]} : vector<8x32xf32> to vector<1x32xf32>
    %cst_97 = arith.constant dense<0.000000e+00> : vector<8xf32>
    %190 = vector.multi_reduction <add>, %187, %cst_97 [1] : vector<8x32xf32> to vector<8xf32>
    %191 = vector.shape_cast %190 : vector<8xf32> to vector<8x1xf32>
    %cst_98 = arith.constant 3.200000e+01 : f32
    %192 = vector.broadcast %cst_98 : f32 to vector<8x1xf32>
    %193 = arith.divf %191, %192 : vector<8x1xf32>
    %194 = vector.broadcast %193 : vector<8x1xf32> to vector<8x32xf32>
    %195 = arith.subf %187, %194 : vector<8x32xf32>
    %196 = arith.mulf %195, %195 : vector<8x32xf32>
    %cst_99 = arith.constant dense<0.000000e+00> : vector<8xf32>
    %197 = vector.multi_reduction <add>, %196, %cst_99 [1] : vector<8x32xf32> to vector<8xf32>
    %198 = vector.shape_cast %197 : vector<8xf32> to vector<8x1xf32>
    %cst_100 = arith.constant 3.200000e+01 : f32
    %199 = vector.broadcast %cst_100 : f32 to vector<8x1xf32>
    %200 = arith.divf %198, %199 : vector<8x1xf32>
    %cst_101 = arith.constant 9.99999974E-6 : f32
    %201 = vector.broadcast %cst_101 : f32 to vector<8x1xf32>
    %202 = arith.addf %200, %201 : vector<8x1xf32>
    %203 = math.rsqrt %202 : vector<8x1xf32>
    %204 = vector.broadcast %203 : vector<8x1xf32> to vector<8x32xf32>
    %205 = arith.mulf %195, %204 : vector<8x32xf32>
    %206 = vector.broadcast %188 : vector<1x32xf32> to vector<8x32xf32>
    %207 = arith.mulf %205, %206 : vector<8x32xf32>
    %208 = vector.broadcast %189 : vector<1x32xf32> to vector<8x32xf32>
    %209 = arith.addf %207, %208 : vector<8x32xf32>
    %c0_102 = arith.constant 0 : index
    %c0_103 = arith.constant 0 : index
    %210 = vector.load %arg27[%c0_102, %c0_103] : memref<32x128xf32, #tpu.memory_space<vmem>>, vector<32x128xf32>
    %cst_104 = arith.constant dense<0.000000e+00> : vector<8x128xf32>
    %211 = tpu.matmul %209, %210, %cst_104 {dimension_numbers = #tpu.dot_dimension_numbers<[1], [0], [0], [1], [0, 0, 1, 1], [], []>} : vector<8x32xf32>, vector<32x128xf32>, vector<8x128xf32> -> vector<8x128xf32>
    %c0_105 = arith.constant 0 : index
    %c0_106 = arith.constant 0 : index
    %212 = vector.load %arg28[%c0_105, %c0_106] : memref<1x128xf32, #tpu.memory_space<vmem>>, vector<1x128xf32>
    %213 = vector.broadcast %212 : vector<1x128xf32> to vector<8x128xf32>
    %214 = arith.addf %211, %213 : vector<8x128xf32>
    %c0_107 = arith.constant 0 : index
    %c0_108 = arith.constant 0 : index
    %215 = vector.load %arg31[%c0_107, %c0_108] : memref<8x128xf32, #tpu.memory_space<vmem>>, vector<8x128xf32>
    tpu.vector_store %arg31[%c0_107, %c0_108], %214 {strides = array<i32>} : memref<8x128xf32, #tpu.memory_space<vmem>>, vector<8x128xf32>,
    return
  }
  func.func @transform_0(%arg0: i32) -> (i32, i32, i32) {
    %c0_i32 = arith.constant 0 : i32
    %c0_i32_0 = arith.constant 0 : i32
    %c0_i32_1 = arith.constant 0 : i32
    return %arg0, %c0_i32, %c0_i32_0 : i32, i32, i32
  }
  func.func @transform_1(%arg0: i32) -> (i32, i32, i32) {
    %c0_i32 = arith.constant 0 : i32
    %c0_i32_0 = arith.constant 0 : i32
    %c0_i32_1 = arith.constant 0 : i32
    return %arg0, %c0_i32, %c0_i32_0 : i32, i32, i32
  }
  func.func @transform_2(%arg0: i32) -> (i32, i32) {
    %c0_i32 = arith.constant 0 : i32
    %c0_i32_0 = arith.constant 0 : i32
    %c0_i32_1 = arith.constant 0 : i32
    return %c0_i32, %c0_i32_0 : i32, i32
  }
  func.func @transform_3(%arg0: i32) -> (i32, i32) {
    %c0_i32 = arith.constant 0 : i32
    %c0_i32_0 = arith.constant 0 : i32
    %c0_i32_1 = arith.constant 0 : i32
    return %c0_i32, %c0_i32_0 : i32, i32
  }
  func.func @transform_4(%arg0: i32) -> (i32, i32) {
    %c0_i32 = arith.constant 0 : i32
    %c0_i32_0 = arith.constant 0 : i32
    %c0_i32_1 = arith.constant 0 : i32
    return %c0_i32, %c0_i32_0 : i32, i32
  }
  func.func @transform_5(%arg0: i32) -> (i32, i32) {
    %c0_i32 = arith.constant 0 : i32
    %c0_i32_0 = arith.constant 0 : i32
    %c0_i32_1 = arith.constant 0 : i32
    return %c0_i32, %c0_i32_0 : i32, i32
  }
  func.func @transform_6(%arg0: i32) -> (i32, i32) {
    %c0_i32 = arith.constant 0 : i32
    %c0_i32_0 = arith.constant 0 : i32
    %c0_i32_1 = arith.constant 0 : i32
    return %c0_i32, %c0_i32_0 : i32, i32
  }
  func.func @transform_7(%arg0: i32) -> (i32, i32) {
    %c0_i32 = arith.constant 0 : i32
    %c0_i32_0 = arith.constant 0 : i32
    %c0_i32_1 = arith.constant 0 : i32
    return %c0_i32, %c0_i32_0 : i32, i32
  }
  func.func @transform_8(%arg0: i32) -> (i32, i32) {
    %c0_i32 = arith.constant 0 : i32
    %c0_i32_0 = arith.constant 0 : i32
    %c0_i32_1 = arith.constant 0 : i32
    return %c0_i32, %c0_i32_0 : i32, i32
  }
  func.func @transform_9(%arg0: i32) -> (i32, i32) {
    %c0_i32 = arith.constant 0 : i32
    %c0_i32_0 = arith.constant 0 : i32
    %c0_i32_1 = arith.constant 0 : i32
    return %c0_i32, %c0_i32_0 : i32, i32
  }
  func.func @transform_10(%arg0: i32) -> (i32, i32) {
    %c0_i32 = arith.constant 0 : i32
    %c0_i32_0 = arith.constant 0 : i32
    %c0_i32_1 = arith.constant 0 : i32
    return %c0_i32, %c0_i32_0 : i32, i32
  }
  func.func @transform_11(%arg0: i32) -> (i32, i32) {
    %c0_i32 = arith.constant 0 : i32
    %c0_i32_0 = arith.constant 0 : i32
    %c0_i32_1 = arith.constant 0 : i32
    return %c0_i32, %c0_i32_0 : i32, i32
  }
  func.func @transform_12(%arg0: i32) -> (i32, i32) {
    %c0_i32 = arith.constant 0 : i32
    %c0_i32_0 = arith.constant 0 : i32
    %c0_i32_1 = arith.constant 0 : i32
    return %c0_i32, %c0_i32_0 : i32, i32
  }
  func.func @transform_13(%arg0: i32) -> (i32, i32) {
    %c0_i32 = arith.constant 0 : i32
    %c0_i32_0 = arith.constant 0 : i32
    %c0_i32_1 = arith.constant 0 : i32
    return %c0_i32, %c0_i32_0 : i32, i32
  }
  func.func @transform_14(%arg0: i32) -> (i32, i32) {
    %c0_i32 = arith.constant 0 : i32
    %c0_i32_0 = arith.constant 0 : i32
    %c0_i32_1 = arith.constant 0 : i32
    return %c0_i32, %c0_i32_0 : i32, i32
  }
  func.func @transform_15(%arg0: i32) -> (i32, i32) {
    %c0_i32 = arith.constant 0 : i32
    %c0_i32_0 = arith.constant 0 : i32
    %c0_i32_1 = arith.constant 0 : i32
    return %c0_i32, %c0_i32_0 : i32, i32
  }
  func.func @transform_16(%arg0: i32) -> (i32, i32) {
    %c0_i32 = arith.constant 0 : i32
    %c0_i32_0 = arith.constant 0 : i32
    %c0_i32_1 = arith.constant 0 : i32
    return %c0_i32, %c0_i32_0 : i32, i32
  }
  func.func @transform_17(%arg0: i32) -> (i32, i32) {
    %c0_i32 = arith.constant 0 : i32
    %c0_i32_0 = arith.constant 0 : i32
    %c0_i32_1 = arith.constant 0 : i32
    return %c0_i32, %c0_i32_0 : i32, i32
  }
  func.func @transform_18(%arg0: i32) -> (i32, i32) {
    %c0_i32 = arith.constant 0 : i32
    %c0_i32_0 = arith.constant 0 : i32
    %c0_i32_1 = arith.constant 0 : i32
    return %c0_i32, %c0_i32_0 : i32, i32
  }
  func.func @transform_19(%arg0: i32) -> (i32, i32) {
    %c0_i32 = arith.constant 0 : i32
    %c0_i32_0 = arith.constant 0 : i32
    %c0_i32_1 = arith.constant 0 : i32
    return %c0_i32, %c0_i32_0 : i32, i32
  }
  func.func @transform_20(%arg0: i32) -> (i32, i32) {
    %c0_i32 = arith.constant 0 : i32
    %c0_i32_0 = arith.constant 0 : i32
    %c0_i32_1 = arith.constant 0 : i32
    return %c0_i32, %c0_i32_0 : i32, i32
  }
  func.func @transform_21(%arg0: i32) -> (i32, i32) {
    %c0_i32 = arith.constant 0 : i32
    %c0_i32_0 = arith.constant 0 : i32
    %c0_i32_1 = arith.constant 0 : i32
    return %c0_i32, %c0_i32_0 : i32, i32
  }
  func.func @transform_22(%arg0: i32) -> (i32, i32) {
    %c0_i32 = arith.constant 0 : i32
    %c0_i32_0 = arith.constant 0 : i32
    %c0_i32_1 = arith.constant 0 : i32
    return %c0_i32, %c0_i32_0 : i32, i32
  }
  func.func @transform_23(%arg0: i32) -> (i32, i32) {
    %c0_i32 = arith.constant 0 : i32
    %c0_i32_0 = arith.constant 0 : i32
    %c0_i32_1 = arith.constant 0 : i32
    return %c0_i32, %c0_i32_0 : i32, i32
  }
  func.func @transform_24(%arg0: i32) -> (i32, i32) {
    %c0_i32 = arith.constant 0 : i32
    %c0_i32_0 = arith.constant 0 : i32
    %c0_i32_1 = arith.constant 0 : i32
    return %c0_i32, %c0_i32_0 : i32, i32
  }
  func.func @transform_25(%arg0: i32) -> (i32, i32) {
    %c0_i32 = arith.constant 0 : i32
    %c0_i32_0 = arith.constant 0 : i32
    %c0_i32_1 = arith.constant 0 : i32
    return %c0_i32, %c0_i32_0 : i32, i32
  }
  func.func @transform_26(%arg0: i32) -> (i32, i32) {
    %c0_i32 = arith.constant 0 : i32
    %c0_i32_0 = arith.constant 0 : i32
    %c0_i32_1 = arith.constant 0 : i32
    return %c0_i32, %c0_i32_0 : i32, i32
  }
  func.func @transform_27(%arg0: i32) -> (i32, i32) {
    %c0_i32 = arith.constant 0 : i32
    %c0_i32_0 = arith.constant 0 : i32
    %c0_i32_1 = arith.constant 0 : i32
    return %c0_i32, %c0_i32_0 : i32, i32
  }
  func.func @transform_28(%arg0: i32) -> (i32, i32) {
    %c0_i32 = arith.constant 0 : i32
    %c0_i32_0 = arith.constant 0 : i32
    %c0_i32_1 = arith.constant 0 : i32
    return %c0_i32, %c0_i32_0 : i32, i32
  }
  func.func @transform_29(%arg0: i32) -> (i32, i32) {
    %c0_i32 = arith.constant 0 : i32
    %c0_i32_0 = arith.constant 0 : i32
    %c0_i32_1 = arith.constant 0 : i32
    return %c0_i32, %c0_i32_0 : i32, i32
  }
  func.func @transform_30(%arg0: i32) -> (i32, i32) {
    %c0_i32 = arith.constant 0 : i32
    %c0_i32_0 = arith.constant 0 : i32
    return %arg0, %c0_i32 : i32, i32
  }
}

</mosaic_0001>

<bundles_post_ra>
// kernel: forward.1
= control target key start
LH: loop header
LB: loop body
LE: loop exit
PB: predicated region body
PF: predicated region fallthrough
CT: control target
= control target key end

     0   :  { %s4633_s6 = smov 1   ;;  %s4634_s10 = smov 2   ;;  %s5872_s0 = inlined_call_operand.smem [shape: u32[31], index: -1, kind: input, shape index: {}] }
   0x1   :  { %s4678_s5 = sld [smem:[%s5872_s0]]   ;;  %s4635_s14 = smov 3  }
   0x2   :  { %s4683_s9 = sld [smem:[%s5872_s0 + %s4633_s6]]   ;;  %s4636_s18 = smov 4  }
   0x3   :  { %s4688_s13 = sld [smem:[%s5872_s0 + %s4634_s10]]   ;;  %s4637_s22 = smov 5  }
   0x4   :  { %s4693_s17 = sld [smem:[%s5872_s0 + %s4635_s14]]   ;;  %s4638_s26 = smov 6  }
   0x5   :  { %s4698_s21 = sld [smem:[%s5872_s0 + %s4636_s18]]   ;;  %s4639_s30 = smov 7  }
   0x6   :  { %s4703_s25 = sld [smem:[%s5872_s0 + %s4637_s22]]   ;;  %s4640_s4 = smov 8  }
   0x7   :  { %5907 = sst [smem:[#allocation5_spill]] %s4678_s5  ;;  %s4641_s10 = smov 9  }
   0x8   :  { %5908 = sst [smem:[#allocation6_spill]] %s4683_s9  ;;  %s4642_s15 = smov 10  }
   0x9   :  { %5909 = sst [smem:[#allocation7_spill]] %s4688_s13  ;;  %s4643_s20 = smov 11  }
   0xa   :  { %s4708_s29 = sld [smem:[%s5872_s0 + %s4638_s26]]   ;;  %s4644_s26 = smov 12  }
   0xb   :  { %s4713_s3 = sld [smem:[%s5872_s0 + %s4639_s30]]   ;;  %s4645_s1 = smov 13  }
   0xc   :  { %s4718_s8 = sld [smem:[%s5872_s0 + %s4640_s4]]   ;;  %s4646_s7 = smov 14  }
   0xd   :  { %s4723_s14 = sld [smem:[%s5872_s0 + %s4641_s10]]   ;;  %s4648_s22 = smov 16  }
   0xe   :  { %s4728_s19 = sld [smem:[%s5872_s0 + %s4642_s15]]   ;;  %s4647_s15 = smov 15  }
   0xf   :  { %s4733_s24 = sld [smem:[%s5872_s0 + %s4643_s20]]   ;;  %s4649_s28 = smov 17  }
  0x10   :  { %s4738_s30 = sld [smem:[%s5872_s0 + %s4644_s26]]  }
  0x11   :  { %5910 = sst [smem:[#allocation8_spill]] %s4713_s3 }
  0x12   :  { %5911 = sst [smem:[#allocation9_spill]] %s4718_s8 }
  0x13   :  { %s4743_s6 = sld [smem:[%s5872_s0 + %s4645_s1]]  }
  0x14   :  { %s4748_s12 = sld [smem:[%s5872_s0 + %s4646_s7]]   ;;  %s4650_s7 = smov 18  }
  0x15   :  { %5912 = sst [smem:[#allocation10_spill]] %s4733_s24 }
  0x16   :  { %s4753_s20 = sld [smem:[%s5872_s0 + %s4647_s15]]   ;;  %s4651_s15 = smov 19  }
  0x17   :  { %s4758_s27 = sld [smem:[%s5872_s0 + %s4648_s22]]   ;;  %s4652_s22 = smov 20  }
  0x18   :  { %s4763_s4 = sld [smem:[%s5872_s0 + %s4649_s28]]   ;;  %s4653_s28 = smov 21  }
  0x19   :  { %5913 = sst [smem:[#allocation11_spill]] %s4743_s6 }
  0x1a   :  { %5914 = sst [smem:[#allocation12_spill]] %s4748_s12 }
  0x1b   :  { %s4768_s12 = sld [smem:[%s5872_s0 + %s4650_s7]]   ;;  %s4654_s7 = smov 22  }
  0x1c   :  { %5915 = sst [smem:[#allocation13_spill]] %s4753_s20 }
  0x1d   :  { %5916 = sst [smem:[#allocation14_spill]] %s4758_s27 }
  0x1e   :  { %5917 = sst [smem:[#allocation15_spill]] %s4763_s4 }
  0x1f   :  { %s4773_s20 = sld [smem:[%s5872_s0 + %s4651_s15]]   ;;  %s4655_s15 = smov 23  }
  0x20   :  { %s4778_s27 = sld [smem:[%s5872_s0 + %s4652_s22]]   ;;  %s4656_s22 = smov 24  }
  0x21   :  { %5918 = sst [smem:[#allocation16_spill]] %s4768_s12 }
  0x22   :  { %s4783_s4 = sld [smem:[%s5872_s0 + %s4653_s28]]   ;;  %s4657_s28 = smov 25  }
  0x23   :  { %s4788_s12 = sld [smem:[%s5872_s0 + %s4654_s7]]   ;;  %s4658_s7 = smov 26  }
  0x25   :  { %5919 = sst [smem:[#allocation17_spill]] %s4773_s20 }
  0x26   :  { %5920 = sst [smem:[#allocation18_spill]] %s4778_s27 }
  0x27   :  { %s4793_s20 = sld [smem:[%s5872_s0 + %s4655_s15]]   ;;  %s4659_s15 = smov 27  }
  0x28   :  { %5921 = sst [smem:[#allocation19_spill]] %s4783_s4 }
  0x29   :  { %5922 = sst [smem:[#allocation20_spill]] %s4788_s12 }
  0x2a   :  { %s4798_s27 = sld [smem:[%s5872_s0 + %s4656_s22]]   ;;  %s4660_s22 = smov 28  }
  0x2b   :  { %s4803_s4 = sld [smem:[%s5872_s0 + %s4657_s28]]   ;;  %s4661_s28 = smov 29  }
  0x2c   :  { %s4808_s12 = sld [smem:[%s5872_s0 + %s4658_s7]]   ;;  %s4662_s7 = smov 30  }
  0x2d   :  { %5923 = sst [smem:[#allocation21_spill]] %s4793_s20 }
  0x2e   :  { %s4813_s20 = sld [smem:[%s5872_s0 + %s4659_s15]]  }
  0x2f   :  { %s4818_s6 = sld [smem:[%s5872_s0 + %s4660_s22]]  }
  0x30   :  { %s4823_s24 = sld [smem:[%s5872_s0 + %s4661_s28]]  }
  0x31   :  { %5924 = sst [smem:[#allocation22_spill]] %s4803_s4 }
  0x32   :  { %5925 = sst [smem:[#allocation23_spill]] %s4808_s12 }
  0x33   :  { %s4828_s12 = sld [smem:[%s5872_s0 + %s4662_s7]]  }
  0x35   :  { %5926 = sst [smem:[#allocation24_spill]] %s4818_s6 }
  0x36   :  { %66 = vsyncpa [#allocation3], 0 }
  0x37   :  { %68 = vsyncpa [#allocation3 + $0x1], 0  ;;  %s4830_s15 = smov 0   ;;  %s4832_s16 = smov 0  }
  0x38   :  { %s4834_s18 = smov 0   ;;  %s4836_s22 = smov 0  }
  0x39 LB: > { %s5927_s8 = sld [smem:[#allocation9_spill]]  ;;  %s5928_s6 = sld [smem:[#allocation24_spill]]  ;;  %s4631_s22 = sphi %s4836_s22, %s5986_s22   ;;  %s4627_s18 = sphi %s4834_s18, %s5985_s18   ;;  %s4623_s16 = sphi %s4832_s16, %s5984_s16   ;;  %s4619_s15 = sphi %s4830_s15, %s5983_s15  }
  0x3a   : > { %s5929_s4 = sld [smem:[#allocation22_spill]]  ;;  %s5930_s3 = sld [smem:[#allocation8_spill]] }
  0x3b   : > { %s4851_s0 = sadd.s32 4294967295, %s4631_s22   ;;  %s3615_s23 = sadd.s32 4294967294, %s4631_s22  }
  0x3c   : > { %s4855_s26 = sadd.s32 1, %s4631_s22   ;;  %s721_s28 = sadd.s32 1, %s4627_s18 }
  0x3d   : > { %s718_s1 = ssub.s32 %s4631_s22, %s4855_s26  ;;  %p731_p0 = scmp.ne.s32.totalorder %s4627_s18, %s4623_s16 }
  0x3e   : > { %p719_p1 = scmp.eq.s32.totalorder %s718_s1, 0  ;;  %p732_p2 = scmp.eq.s32.totalorder %s4851_s0, 1 }
  0x3f   : > { %p737_p3 = scmp.ne.s32.totalorder %s4623_s16, %s4619_s15  ;;  %p738_p4 = scmp.eq.s32.totalorder %s3615_s23, 1 }
  0x40   : > { %s4866_s2 = scalar_select %p719_p1, %s4627_s18, %s721_s28  }
  0x41   : > { %p4868_p5 = por %p732_p2, %p731_p0  ;;  %p4872_p6 = por %p738_p4, %p737_p3 }
  0x42   : > { %p3618_p7 = scmp.ge.s32.totalorder %s4631_s22, 1  ;;  %p854_p8 = scmp.lt.s32.totalorder %s4631_s22, 3 }
  0x44   : > { %p855_p9 = pnand %p3618_p7, %p854_p8 }
  0x46   : > { %858 = sbr.rel (%p855_p9) target bundleno = 5481 (0x1569), region = 140 }
  0x4d   : > { %s5933_s13 = sld [smem:[#allocation7_spill]]  ;;  %s5934_s9 = sld [smem:[#allocation6_spill]]  ;;  %v967_v0 = vld [vmem:[%s4698_s21] sm:$0xff]  ;;  %v5879_v2 = vmov 0.0   ;;  %vm4664_vm0 = vmmov 0   ;;  %vm969_vm1 = vcmask 64512  }
  0x4e   : > { %p935_p10 = scmp.lt.s32.totalorder %s4851_s0, 1  ;;  %s5935_s5 = sld [smem:[#allocation5_spill]]  ;;  %3806 = vmatprep.subr.mxu0 %v5879_v2  ;;  %3808 = vmatprep.mubr.msk.f32.mxu0 %vm4664_vm0, %v5879_v2  ;;  %v5884_v3 = vmov 0.0|0.0   ;;  %v1170_v9 = vld [vmem:[%s4708_s29] sm:$0xff]  ;;  %v1171_v10 = vld [vmem:[%s4708_s29 + $0x8] sm:$0xff]  ;;  %v1172_v12 = vld [vmem:[%s4708_s29 + $0x10] sm:$0xff] }
  0x4f   : > { %3807 = vmatpush3.msra.mxu0 %v967_v0  ;;  %v3995_v11 = vpack.c.bf16 %v1171_v10, %v1170_v9  ;;  %v1173_v13 = vld [vmem:[%s4708_s29 + $0x18] sm:$0xff]  ;;  %v4904_v15 = vld [vmem:[%s5928_s6 + $0x10] sm:$0xff]  ;;  %v4909_v16 = vld [vmem:[%s5928_s6] sm:$0xff]  ;;  %vm1166_vm2 = vcmask 1040384   ;;  %vm1153_vm3 = vcmask 1041408   ;;  %vm1179_vm4 = vcmask 261120  }
  0x50   : > { %s936_s11 = scalar_select %p935_p10, %s4851_s0, 1  ;;  %3994 = vmatprep.subr.bf16.mxu0 %v5884_v3  ;;  %v3998_v14 = vpack.c.bf16 %v1173_v13, %v1172_v12  ;;  %v4912_v17 = vld [vmem:[%s5928_s6 + $0x18] sm:$0xff]  ;;  %v4917_v18 = vld [vmem:[%s5928_s6 + $0x8] sm:$0xff]  ;;  %v4927_v20 = vld [vmem:[%s5928_s6 + $0x20] sm:$0xff]  ;;  %vm2357_vm6 = vcmask 523264  }
  0x51   : > { %v4922_v19 = vld [vmem:[%s5928_s6 + $0x28] sm:$0xff]  ;;  %v4932_v21 = vld [vmem:[%s5928_s6 + $0x38] sm:$0xff]  ;;  %v4937_v22 = vld [vmem:[%s5928_s6 + $0x30] sm:$0xff] }
  0x52   : > { %s3725_s28 = sshll.u32 %s936_s11, 5  ;;  %v4942_v23 = vld [vmem:[%s5928_s6 + $0x48] sm:$0xff]  ;;  %v4947_v24 = vld [vmem:[%s5928_s6 + $0x40] sm:$0xff]  ;;  %v4952_v25 = vld [vmem:[%s5928_s6 + $0x58] sm:$0xff] }
  0x53   : > { %v1047_v1 = vld [vmem:[%s5933_s13] sm:$0xff]  ;;  %s942_s23 = scalar_lea.vmem %s5934_s9, %s936_s11  ;;  %s4666_s11 = smov 32   ;;  %v4957_v26 = vld [vmem:[%s5928_s6 + $0x50] sm:$0xff]  ;;  %v4962_v27 = vld [vmem:[%s5928_s6 + $0x68] sm:$0xff] }
  0x54   : > { %3811 = vmatprep.subr.mxu1 %v1047_v1  ;;  %v966_v4 = vld [vmem:[%s942_s23] sm:$0x1]  ;;  %s939_s1 = scalar_lea.vmem %s5935_s5, %s3725_s28  ;;  %1306 = vrot.lane.b32.xlu1 %v4904_v15, %s4666_s11  ;;  %v4972_v29 = vld [vmem:[%s5928_s6 + $0x78] sm:$0xff]  ;;  %v4977_v30 = vld [vmem:[%s5928_s6 + $0x70] sm:$0xff]  ;;  %s4667_s23 = smov 96  }
  0x55   : > { %3812 = vmatpush3.msra.mxu1 %v1047_v1  ;;  %3809 = vmatmul.mubr.msk.f32.vlgmr.msra.gmra.mrb[0].mxu0 %vm969_vm1, %v966_v4  ;;  %v1043_v5 = vld [vmem:[%s939_s1] sm:$0xff]  ;;  %v1044_v6 = vld [vmem:[%s939_s1 + $0x8] sm:$0xff]  ;;  %v1045_v7 = vld [vmem:[%s939_s1 + $0x10] sm:$0xff]  ;;  %s4668_s28 = smov 64   ;;  %s5978_s5 = sld [smem:[#allocation20_spill]] }
  0x56   : > { %4000 = vmatprep.subr.bf16.mxu1 %v5884_v3  ;;  %3813 = vmatprep.mubr.msk.f32.mxu1 %vm969_vm1, %v1043_v5  ;;  %v1046_v8 = vld [vmem:[%s939_s1 + $0x18] sm:$0xff]  ;;  %v4967_v28 = vld [vmem:[%s5928_s6 + $0x60] sm:$0xff]  ;;  %v1175_v61 = vld [vmem:[%s5930_s3 + $0x8] sm:$0xff]  ;;  %s5955_s1 = sld [smem:[#allocation10_spill]] }
  0x57   : > { %3827 = vmatprep.mubr.msk.f32.mxu0 %vm4664_vm0, %v5879_v2  ;;  %3814 = vmatmul.mubr.msk.f32.vlgmr.msra.gmra.mrb[0].mxu1 %vm969_vm1, %v1044_v6  ;;  %v4982_v31 = vld [vmem:[%s5928_s6 + $0x80] sm:$0xff]  ;;  %v1177_v13 = vld [vmem:[%s5930_s3 + $0x18] sm:$0xff]  ;;  %vm5129_vm5 = vmpackc.low %vm1179_vm4, %vm1179_vm4 }
  0x58   : > { %3816 = vmatprep.mubr.msk.f32.mxu1 %vm969_vm1, %v1045_v7  ;;  %3996 = vmatpush3.bf16.msra.mxu0 %v3995_v11  ;;  %v968_v32 = vld [vmem:[%s4703_s25] sm:$0x1] }
  0x59   : > { %3997 = vmatprep.subr.bf16.mxu0 %v5884_v3  ;;  %1302 = vrot.lane.b32.xlu0 %v4909_v16, %s4666_s11  ;;  %v1145_v36 = vld [vmem:[%s4693_s17] sm:$0x1] }
  0x5a   : > { %1308 = vrot.lane.b32.xlu1 %v4912_v17, %s4666_s11  ;;  %v1174_v58 = vld [vmem:[%s5930_s3] sm:$0xff] }
  0x5b   : > { %3817 = vmatmul.mubr.msk.f32.gmra.mrb[2].mxu1 %vm969_vm1, %v1046_v8  ;;  %v1176_v8 = vld [vmem:[%s5930_s3 + $0x10] sm:$0xff] }
  0x5c   : > { %1652 = vmatprep.mubr.f32.mxu1 %v5879_v2  ;;  %3999 = vmatpush3.bf16.msra.mxu0 %v3998_v14 }
  0x5d   : > { %4040 = vmatprep.subr.bf16.mxu0 %v5884_v3  ;;  %1304 = vrot.lane.b32.xlu0 %v4917_v18, %s4666_s11 }
  0x5e   : > { %1312 = vrot.lane.b32.xlu1 %v4922_v19, %s4666_s11 }
  0x61   : > { %1310 = vrot.lane.b32.xlu0 %v4927_v20, %s4666_s11 }
  0x62   : > { %1316 = vrot.lane.b32.xlu1 %v4932_v21, %s4666_s11 }
  0x65   : > { %1314 = vrot.lane.b32.xlu0 %v4937_v22, %s4666_s11 }
  0x66   : > { %1320 = vrot.lane.b32.xlu1 %v4942_v23, %s4666_s11 }
  0x69   : > { %1318 = vrot.lane.b32.xlu0 %v4947_v24, %s4666_s11 }
  0x6a   : > { %1324 = vrot.lane.b32.xlu1 %v4952_v25, %s4666_s11 }
  0x6d   : > { %1322 = vrot.lane.b32.xlu0 %v4957_v26, %s4666_s11 }
  0x6e   : > { %1328 = vrot.lane.b32.xlu1 %v4962_v27, %s4666_s11 }
  0x71   : > { %1326 = vrot.lane.b32.xlu0 %v4967_v28, %s4666_s11 }
  0x72   : > { %1332 = vrot.lane.b32.xlu1 %v4972_v29, %s4666_s11 }
  0x75   : > { %1330 = vrot.lane.b32.xlu0 %v4977_v30, %s4666_s11 }
  0x76   : > { %1334 = vrot.lane.b32.xlu1 %v4982_v31, %s4666_s11 }
  0xc6   : > { %v5023_v52 = vpop.permute.xlu1 %1306 }
  0xc7   : > { %5936 = vst [vmem:[#allocation25_spill] sm:$0xff] %v5023_v52 }
  0xcb   : > { %v5025_v53 = vpop.permute.xlu0 %1302 }
  0xcc   : > { %v5027_v54 = vpop.permute.xlu1 %1308 }
  0xcd   : > { %5937 = vst [vmem:[#allocation26_spill] sm:$0xff] %v5027_v54 }
  0xcf   : > { %v5029_v55 = vpop.permute.xlu0 %1304 }
  0xd0   : > { %v5031_v56 = vpop.permute.xlu1 %1312 }
  0xd3   : > { %v5033_v57 = vpop.permute.xlu0 %1310 }
  0xd4   : > { %5938 = vst [vmem:[#allocation27_spill] sm:$0xff] %v5033_v57  ;;  %v5039_v63 = vpop.permute.xlu1 %1316 }
  0xd5   : > { %5939 = vst [vmem:[#allocation28_spill] sm:$0xff] %v5039_v63 }
  0xd7   : > { %v5043_v5 = vpop.permute.xlu0 %1314 }
  0xd8   : > { %v5050_v12 = vpop.permute.xlu1 %1320 }
  0xd9   : > { %5940 = vst [vmem:[#allocation29_spill] sm:$0xff] %v5050_v12 }
 0x128   : > { %v1039_v33 = vpop.f32.mrb[0].mxu0 }
 0x129   : > { %v1040_v34 = vadd.f32 %v1039_v33, %v968_v32  ;;  %v3810_v35 = vpop.f32.mrb[1].mxu0  ;;  %v5056_v32 = vpop.permute.xlu0 %1318 }
 0x12a   : > { %v3815_v37 = vpop.f32.mrb[0].mxu1  ;;  %5941 = vst [vmem:[#allocation30_spill] sm:$0xff] %v5056_v32 }
 0x12b   : > { %v1147_v38 = vrot.slane %v1040_v34, 7  ;;  %v1155_v39 = vrot.slane %v3815_v37, 6  ;;  %v1126_v40 = vpop.f32.mrb[1].mxu1  ;;  %v5059_v34 = vld [vmem:[%s5928_s6 + $0x88] sm:$0xff]  ;;  %v1178_v37 = vld [vmem:[%s5930_s3 + $0x20] sm:$0xff]  ;;  %s5977_s3 = sld [smem:[#allocation18_spill]] }
 0x12c   : > { %v1154_v41 = vrot.slane %v1126_v40, 6  ;;  %v5070_v40 = vpop.permute.xlu1 %1324 }
 0x12d   : > { %v1167_v42 = vsel %vm1166_vm2, %v1145_v36, %v1147_v38 }
 0x12e   : > { %v4991_v43 = vsel %vm1153_vm3, %v1167_v42, %v1154_v41  ;;  %v3818_v44 = vpop.f32.mrb[2].mxu1  ;;  %v4994_v45 = vsel %vm1153_vm3, %v1154_v41, %v1155_v39  ;;  %v5073_v42 = vld [vmem:[%s5928_s6 + $0x90] sm:$0xff] }
 0x12f   : > { %v1159_v46 = vrot.slane %v3818_v44, 6  ;;  %v1136_v47 = vpop.f32.mrb[3].mxu1  ;;  %3828 = vmatmul.mubr.msk.f32.vlgmr.msra.gmra.mrb[2].mxu0 %vm1179_vm4, %v4991_v43 }
 0x130   : > { %v1157_v48 = vrot.slane %v1136_v47, 6  ;;  %3830 = vmatprep.mubr.msk.f32.mxu0 %vm4664_vm0, %v5879_v2 }
 0x131   : > { %v5019_v51 = vsel %vm1153_vm3, %v1159_v46, 0.0 }
 0x132   : > { %v5001_v49 = vsel %vm1153_vm3, %v1155_v39, %v1157_v48  ;;  %v5004_v50 = vsel %vm1153_vm3, %v1157_v48, %v1159_v46  ;;  %v5077_v48 = vpop.permute.xlu0 %1322 }
 0x133   : > { %3831 = vmatmul.mubr.msk.f32.gmra.mrb[4].mxu0 %vm1179_vm4, %v4994_v45 }
 0x134   : > { %3833 = vmatprep.mubr.msk.f32.mxu0 %vm4664_vm0, %v5879_v2 }
 0x137   : > { %3834 = vmatmul.mubr.msk.f32.gmra.mrb[6].mxu0 %vm1179_vm4, %v5001_v49 }
 0x138   : > { %3836 = vmatprep.mubr.msk.f32.mxu0 %vm4664_vm0, %v5879_v2 }
 0x13b   : > { %3837 = vmatmul.mubr.msk.f32.gmra.mrb[8].mxu0 %vm1179_vm4, %v5004_v50 }
 0x13c   : > { %3839 = vmatprep.mubr.msk.f32.mxu0 %vm4664_vm0, %v5879_v2 }
 0x13f   : > { %3840 = vmatmul.mubr.msk.f32.gmra.mrb[10].mxu0 %vm1179_vm4, %v5019_v51 }
 0x202   : > { %v1258_v59 = vpop.f32.mrb[2].mxu0 }
 0x203   : > { %v3829_v60 = vpop.f32.mrb[3].mxu0  ;;  %v5037_v62 = vadd.f32 %v1258_v59, %v1174_v58 }
 0x204   : > { %v5087_v60 = vld [vmem:[%s5928_s6 + $0x98] sm:$0xff] }
 0x205   : > { %v1362_v6 = vmul.f32 %v5025_v53, %v5037_v62  ;;  %v1367_v59 = vmul.f32 %v5031_v56, %v5037_v62 }
 0x206   : > { %v1263_v0 = vpop.f32.mrb[4].mxu0 }
 0x207   : > { %v5041_v1 = vadd.f32 %v1263_v0, %v1175_v61  ;;  %v3832_v4 = vpop.f32.mrb[5].mxu0 }
 0x209   : > { %v1363_v7 = vmul.f32 %v5029_v55, %v5041_v1 }
 0x20a   : > { %v1268_v9 = vpop.f32.mrb[6].mxu0 }
 0x20b   : > { %v3835_v10 = vpop.f32.mrb[7].mxu0  ;;  %v4335_v11 = vpack.i.bf16 %v1363_v7, %v1362_v6  ;;  %v5053_v14 = vadd.f32 %v1268_v9, %v1176_v8  ;;  %v5093_v6 = vpop.permute.xlu1 %1328  ;;  %v1368_v8 = vmul.f32 %v5043_v5, %v5041_v1 }
 0x20c   : > { %5942 = vst [vmem:[#allocation31_spill] sm:$0xff] %v5093_v6  ;;  %v5095_v7 = vpop.permute.xlu0 %1326 }
 0x20d   : > { %4336 = vrot.lane.b32.xlu0 %v4335_v11, %s4667_s23  ;;  %v1364_v38 = vmul.f32 %v5023_v52, %v5053_v14  ;;  %v1369_v0 = vmul.f32 %v5039_v63, %v5053_v14  ;;  %5943 = vst [vmem:[#allocation32_spill] sm:$0xff] %v5095_v7 }
 0x20e   : > { %v1273_v33 = vpop.f32.mrb[8].mxu0 }
 0x20f   : > { %v5061_v35 = vadd.f32 %v1273_v33, %v1177_v13  ;;  %v3838_v36 = vpop.f32.mrb[9].mxu0  ;;  %v4350_v10 = vpack.i.bf16 %v1369_v0, %v1368_v8  ;;  %v1373_v13 = vmul.f32 %v5070_v40, %v5041_v1 }
 0x210   : > { %v5108_v36 = vpop.permute.xlu0 %1330 }
 0x211   : > { %1336 = vrot.lane.b32.xlu0 %v5059_v34, %s4666_s11  ;;  %v1365_v39 = vmul.f32 %v5027_v54, %v5061_v35  ;;  %v1370_v9 = vmul.f32 %v5056_v32, %v5061_v35  ;;  %v1375_v33 = vmul.f32 %v5093_v6, %v5061_v35  ;;  %5944 = vst [vmem:[#allocation33_spill] sm:$0xff] %v5108_v36 }
 0x212   : > { %v1278_v41 = vpop.f32.mrb[10].mxu0 }
 0x213   : > { %v5075_v44 = vadd.f32 %v1278_v41, %v1178_v37  ;;  %v3841_v46 = vpop.f32.mrb[11].mxu0  ;;  %v4340_v47 = vpack.i.bf16 %v1365_v39, %v1364_v38  ;;  %v1372_v37 = vmul.f32 %v5077_v48, %v5037_v62  ;;  %v1374_v38 = vmul.f32 %v5095_v7, %v5053_v14  ;;  %v5116_v39 = vpop.permute.xlu1 %1332 }
 0x215   : > { %1338 = vrot.lane.b32.xlu0 %v5073_v42, %s4666_s11  ;;  %4341 = vrot.lane.b32.xlu1 %v4340_v47, %s4667_s23  ;;  %v1366_v58 = vmul.f32 %v5033_v57, %v5075_v44  ;;  %v1371_v4 = vmul.f32 %v5050_v12, %v5075_v44  ;;  %v1376_v41 = vmul.f32 %v5108_v36, %v5075_v44 }
 0x216   : > { %v4360_v46 = vpack.i.bf16 %v1373_v13, %v1372_v37  ;;  %v4365_v47 = vpack.i.bf16 %v1375_v33, %v1374_v38 }
 0x217   : > { %v4345_v61 = vpack.i.bf16 %v1367_v59, %v1366_v58  ;;  %v4355_v11 = vpack.i.bf16 %v1371_v4, %v1370_v9  ;;  %v1377_v58 = vmul.f32 %v5116_v39, %v5037_v62  ;;  %v5125_v8 = vpop.permute.xlu1 %1334 }
 0x218   : > { %5945 = vst [vmem:[#allocation34_spill] sm:$0xff] %v5125_v8  ;;  %v1378_v13 = vmul.f32 %v5125_v8, %v5041_v1 }
 0x219   : > { %1340 = vrot.lane.b32.xlu1 %v5087_v60, %s4666_s11  ;;  %4346 = vrot.lane.b32.xlu0 %v4345_v61, %s4667_s23  ;;  %v4370_v59 = vpack.i.bf16 %v1377_v58, %v1376_v41  ;;  %s5956_s11 = sld [smem:[#allocation11_spill]] }
 0x21d   : > { %4351 = vrot.lane.b32.xlu1 %v4350_v10, %s4667_s23  ;;  %4356 = vrot.lane.b32.xlu0 %v4355_v11, %s4667_s23 }
 0x221   : > { %4361 = vrot.lane.b32.xlu1 %v4360_v46, %s4667_s23  ;;  %4366 = vrot.lane.b32.xlu0 %v4365_v47, %s4667_s23 }
 0x225   : > { %4371 = vrot.lane.b32.xlu1 %v4370_v59, %s4667_s23 }
 0x27f   : > { %v4337_v61 = vpop.permute.xlu0 %4336 }
 0x280   : > { %v4339_v0 = vunpack.i.h.bf16 %v4337_v61  ;;  %v4338_v4 = vunpack.i.l.bf16 %v4337_v61 }
 0x282   : > { %v4001_v10 = vpack.c.bf16 %v4339_v0, %v4338_v4 }
 0x283   : > { %v5133_v11 = vpop.permute.xlu0 %1336 }
 0x284   : > { %5948 = vst [vmem:[#allocation35_spill] sm:$0xff] %v5133_v11  ;;  %v1379_v33 = vmul.f32 %v5133_v11, %v5053_v14  ;;  %4003 = vmatpush1.bf16.xpose.msk.msra.mxu1 %vm5129_vm5, %v4001_v10 }
 0x285   : > { %4004 = vmatprep.subr.bf16.mxu1 %v5884_v3 }
 0x286   : > { %v4375_v37 = vpack.i.bf16 %v1379_v33, %v1378_v13 }
 0x287   : > { %v5142_v38 = vpop.permute.xlu0 %1338  ;;  %v4342_v41 = vpop.permute.xlu1 %4341 }
 0x288   : > { %5949 = vst [vmem:[#allocation36_spill] sm:$0xff] %v5142_v38  ;;  %v4344_v46 = vunpack.i.h.bf16 %v4342_v41  ;;  %v4343_v47 = vunpack.i.l.bf16 %v4342_v41  ;;  %4376 = vrot.lane.b32.xlu0 %v4375_v37, %s4667_s23  ;;  %v1380_v61 = vmul.f32 %v5142_v38, %v5061_v35 }
 0x28a   : > { %v4005_v58 = vpack.c.bf16 %v4344_v46, %v4343_v47 }
 0x28b   : > { %v5145_v59 = vpop.permute.xlu1 %1340  ;;  %v4347_v4 = vpop.permute.xlu0 %4346 }
 0x28c   : > { %5950 = vst [vmem:[#allocation37_spill] sm:$0xff] %v5145_v59  ;;  %v1381_v0 = vmul.f32 %v5145_v59, %v5075_v44  ;;  %4007 = vmatpush1.bf16.xpose.msk.msra.mxu1 %vm5129_vm5, %v4005_v58  ;;  %1382 = vrot.lane.b32.xlu0 %v4909_v16, %s4668_s28  ;;  %v4349_v13 = vunpack.i.h.bf16 %v4347_v4  ;;  %v4348_v33 = vunpack.i.l.bf16 %v4347_v4 }
 0x28d   : > { %4008 = vmatprep.subr.bf16.mxu1 %v5884_v3 }
 0x28e   : > { %v4380_v10 = vpack.i.bf16 %v1381_v0, %v1380_v61  ;;  %v4009_v37 = vpack.c.bf16 %v4349_v13, %v4348_v33 }
 0x28f   : > { %v4352_v41 = vpop.permute.xlu1 %4351  ;;  %v4357_v61 = vpop.permute.xlu0 %4356 }
 0x290   : > { %4381 = vrot.lane.b32.xlu1 %v4380_v10, %s4667_s23  ;;  %1386 = vrot.lane.b32.xlu0 %v4904_v15, %s4668_s28  ;;  %v4354_v46 = vunpack.i.h.bf16 %v4352_v41  ;;  %v4353_v47 = vunpack.i.l.bf16 %v4352_v41  ;;  %v4359_v0 = vunpack.i.h.bf16 %v4357_v61  ;;  %v4358_v4 = vunpack.i.l.bf16 %v4357_v61 }
 0x292   : > { %v4013_v58 = vpack.c.bf16 %v4354_v46, %v4353_v47  ;;  %v4017_v10 = vpack.c.bf16 %v4359_v0, %v4358_v4 }
 0x293   : > { %v4362_v13 = vpop.permute.xlu1 %4361  ;;  %v4367_v46 = vpop.permute.xlu0 %4366 }
 0x294   : > { %1384 = vrot.lane.b32.xlu1 %v4917_v18, %s4668_s28  ;;  %1390 = vrot.lane.b32.xlu0 %v4927_v20, %s4668_s28  ;;  %v4364_v33 = vunpack.i.h.bf16 %v4362_v13  ;;  %v4369_v47 = vunpack.i.h.bf16 %v4367_v46 }
 0x295   : > { %4011 = vmatpush1.bf16.xpose.msk.msra.mxu1 %vm5129_vm5, %v4009_v37  ;;  %v4363_v37 = vunpack.i.l.bf16 %v4362_v13 }
 0x296   : > { %4012 = vmatprep.subr.bf16.mxu1 %v5884_v3 }
 0x297   : > { %v4021_v41 = vpack.c.bf16 %v4364_v33, %v4363_v37  ;;  %v4372_v0 = vpop.permute.xlu1 %4371 }
 0x298   : > { %1388 = vrot.lane.b32.xlu1 %v4912_v17, %s4668_s28  ;;  %1394 = vrot.lane.b32.xlu0 %v4937_v22, %s4668_s28  ;;  %v4374_v4 = vunpack.i.h.bf16 %v4372_v0 }
 0x29c   : > { %1392 = vrot.lane.b32.xlu1 %v4922_v19, %s4668_s28  ;;  %1398 = vrot.lane.b32.xlu0 %v4947_v24, %s4668_s28 }
 0x29d   : > { %4015 = vmatpush1.bf16.xpose.msk.msra.mxu1 %vm5129_vm5, %v4013_v58  ;;  %v4368_v58 = vunpack.i.l.bf16 %v4367_v46 }
 0x29e   : > { %4016 = vmatprep.subr.bf16.mxu1 %v5884_v3 }
 0x29f   : > { %v4025_v61 = vpack.c.bf16 %v4369_v47, %v4368_v58 }
 0x2a0   : > { %1396 = vrot.lane.b32.xlu1 %v4932_v21, %s4668_s28  ;;  %1402 = vrot.lane.b32.xlu0 %v4957_v26, %s4668_s28 }
 0x2a4   : > { %1400 = vrot.lane.b32.xlu1 %v4942_v23, %s4668_s28  ;;  %1406 = vrot.lane.b32.xlu0 %v4967_v28, %s4668_s28 }
 0x2a5   : > { %4019 = vmatpush1.bf16.xpose.msk.msra.mxu1 %vm5129_vm5, %v4017_v10  ;;  %v4373_v10 = vunpack.i.l.bf16 %v4372_v0 }
 0x2a6   : > { %4020 = vmatprep.subr.bf16.mxu1 %v5884_v3 }
 0x2a7   : > { %v4029_v13 = vpack.c.bf16 %v4374_v4, %v4373_v10 }
 0x2a8   : > { %1404 = vrot.lane.b32.xlu1 %v4952_v25, %s4668_s28  ;;  %1410 = vrot.lane.b32.xlu0 %v4977_v30, %s4668_s28 }
 0x2ac   : > { %1408 = vrot.lane.b32.xlu1 %v4962_v27, %s4668_s28  ;;  %1414 = vrot.lane.b32.xlu0 %v4982_v31, %s4668_s28 }
 0x2ad   : > { %4023 = vmatpush1.bf16.xpose.msk.msra.mxu1 %vm5129_vm5, %v4021_v41 }
 0x2ae   : > { %4024 = vmatprep.subr.bf16.mxu1 %v5884_v3 }
 0x2b0   : > { %1412 = vrot.lane.b32.xlu1 %v4972_v29, %s4668_s28  ;;  %1418 = vrot.lane.b32.xlu0 %v5073_v42, %s4668_s28 }
 0x2b4   : > { %1416 = vrot.lane.b32.xlu1 %v5059_v34, %s4668_s28 }
 0x2b5   : > { %4027 = vmatpush1.bf16.xpose.msk.msra.mxu1 %vm5129_vm5, %v4025_v61 }
 0x2b6   : > { %4028 = vmatprep.subr.bf16.mxu1 %v5884_v3 }
 0x2b8   : > { %1420 = vrot.lane.b32.xlu1 %v5087_v60, %s4668_s28 }
 0x2bd   : > { %4031 = vmatpush1.bf16.xpose.msk.msra.mxu1 %vm5129_vm5, %v4029_v13 }
 0x2be   : > { %4032 = vmatprep.subr.bf16.mxu1 %v5884_v3 }
 0x2fa   : > { %v4377_v33 = vpop.permute.xlu0 %4376 }
 0x2fb   : > { %v4379_v37 = vunpack.i.h.bf16 %v4377_v33  ;;  %v4378_v41 = vunpack.i.l.bf16 %v4377_v33 }
 0x2fd   : > { %v4033_v46 = vpack.c.bf16 %v4379_v37, %v4378_v41 }
 0x2fe   : > { %v1383_v47 = vpop.permute.xlu0 %1382 }
 0x2ff   : > { %4035 = vmatpush1.bf16.xpose.msk.msra.mxu1 %vm5129_vm5, %v4033_v46  ;;  %v1442_v13 = vmul.f32 %v1383_v47, %v5037_v62  ;;  %v5951_v47 = vmov 0.0  }
 0x300   : > { %4036 = vmatprep.subr.bf16.mxu1 %v5884_v3 }
 0x302   : > { %v4382_v58 = vpop.permute.xlu1 %4381  ;;  %v1387_v61 = vpop.permute.xlu0 %1386 }
 0x303   : > { %v4384_v0 = vunpack.i.h.bf16 %v4382_v58  ;;  %v4383_v2 = vunpack.i.l.bf16 %v4382_v58  ;;  %v1444_v46 = vmul.f32 %v1387_v61, %v5053_v14 }
 0x305   : > { %v4037_v4 = vpack.c.bf16 %v4384_v0, %v4383_v2 }
 0x306   : > { %v1385_v10 = vpop.permute.xlu1 %1384  ;;  %v1391_v59 = vpop.permute.xlu0 %1390 }
 0x307   : > { %v1443_v36 = vmul.f32 %v1385_v10, %v5041_v1  ;;  %4039 = vmatpush1.bf16.xpose.msk.msra.mxu1 %vm5129_vm5, %v4037_v4 }
 0x308   : > { %4100 = vmatprep.subr.bf16.mxu1 %v5884_v3 }
 0x309   : > { %v4385_v33 = vpack.i.bf16 %v1443_v36, %v1442_v13 }
 0x30a   : > { %v1389_v37 = vpop.permute.xlu1 %1388  ;;  %v1395_v41 = vpop.permute.xlu0 %1394 }
 0x30b   : > { %v1445_v12 = vmul.f32 %v1389_v37, %v5061_v35  ;;  %4386 = vrot.lane.b32.xlu0 %v4385_v33, %s4668_s28  ;;  %v1448_v61 = vmul.f32 %v1395_v41, %v5041_v1 }
 0x30d   : > { %v4390_v2 = vpack.i.bf16 %v1445_v12, %v1444_v46 }
 0x30e   : > { %v1393_v58 = vpop.permute.xlu1 %1392  ;;  %v1399_v0 = vpop.permute.xlu0 %1398  ;;  %3652 = vmatmul.mubr.msk.f32.vlgmr.msra.gmra.mrb[4].mxu1 %vm1179_vm4, %v5037_v62 }
 0x30f   : > { %4391 = vrot.lane.b32.xlu1 %v4390_v2, %s4668_s28  ;;  %1658 = vmatprep.mubr.f32.mxu1 %v5951_v47  ;;  %v1447_v38 = vmul.f32 %v1393_v58, %v5037_v62 }
 0x312   : > { %v1397_v4 = vpop.permute.xlu1 %1396  ;;  %v1403_v36 = vpop.permute.xlu0 %1402  ;;  %3653 = vmatmul.mubr.msk.f32.gmra.mrb[6].mxu1 %vm1179_vm4, %v5041_v1 }
 0x313   : > { %v1449_v10 = vmul.f32 %v1397_v4, %v5053_v14  ;;  %1664 = vmatprep.mubr.f32.mxu1 %v5951_v47  ;;  %v1452_v41 = vmul.f32 %v1403_v36, %v5037_v62 }
 0x315   : > { %v4395_v12 = vpack.i.bf16 %v1449_v10, %v1448_v61 }
 0x316   : > { %v1401_v13 = vpop.permute.xlu1 %1400  ;;  %3654 = vmatmul.mubr.msk.f32.gmra.mrb[8].mxu1 %vm1179_vm4, %v5053_v14  ;;  %v1407_v33 = vpop.permute.xlu0 %1406 }
 0x317   : > { %4396 = vrot.lane.b32.xlu0 %v4395_v12, %s4668_s28  ;;  %1670 = vmatprep.mubr.f32.mxu1 %v5951_v47  ;;  %v1454_v10 = vmul.f32 %v1407_v33, %v5053_v14  ;;  %v1451_v32 = vmul.f32 %v1401_v13, %v5075_v44 }
 0x31a   : > { %v1405_v37 = vpop.permute.xlu1 %1404  ;;  %3655 = vmatmul.mubr.msk.f32.gmra.mrb[10].mxu1 %vm1179_vm4, %v5061_v35  ;;  %v1411_v4 = vpop.permute.xlu0 %1410 }
 0x31b   : > { %v1453_v46 = vmul.f32 %v1405_v37, %v5041_v1  ;;  %1676 = vmatprep.mubr.f32.mxu1 %v5951_v47 }
 0x31d   : > { %v4400_v2 = vpack.i.bf16 %v1453_v46, %v1452_v41 }
 0x31e   : > { %v1409_v61 = vpop.permute.xlu1 %1408  ;;  %3656 = vmatmul.mubr.msk.f32.gmra.mrb[12].mxu1 %vm1179_vm4, %v5075_v44  ;;  %v1415_v37 = vpop.permute.xlu0 %1414 }
 0x31f   : > { %v1455_v12 = vmul.f32 %v1409_v61, %v5061_v35  ;;  %4401 = vrot.lane.b32.xlu0 %v4400_v2, %s4668_s28  ;;  %3850 = vmatprep.mubr.msk.f32.mxu1 %vm4664_vm0, %v5951_v47  ;;  %v1458_v46 = vmul.f32 %v1415_v37, %v5041_v1  ;;  %v1446_v61 = vmul.f32 %v1391_v59, %v5075_v44 }
 0x320   : > { %v1456_v1 = vmul.f32 %v1411_v4, %v5075_v44 }
 0x321   : > { %v4405_v36 = vpack.i.bf16 %v1455_v12, %v1454_v10  ;;  %v4415_v2 = vpack.i.bf16 %v1447_v38, %v1446_v61  ;;  %v1450_v10 = vmul.f32 %v1399_v0, %v5061_v35 }
 0x322   : > { %v1413_v3 = vpop.permute.xlu1 %1412 }
 0x323   : > { %4406 = vrot.lane.b32.xlu0 %v4405_v36, %s4668_s28  ;;  %v4420_v12 = vpack.i.bf16 %v1451_v32, %v1450_v10  ;;  %v1457_v36 = vmul.f32 %v1413_v3, %v5037_v62  ;;  %v5952_v3 = vmov 0.0|0.0  }
 0x326   : > { %v1417_v41 = vpop.permute.xlu1 %1416 }
 0x327   : > { %v1459_v57 = vmul.f32 %v1417_v41, %v5053_v14  ;;  %v4425_v14 = vpack.i.bf16 %v1457_v36, %v1456_v1 }
 0x329   : > { %v4410_v33 = vpack.i.bf16 %v1459_v57, %v1458_v46  ;;  %v5262_v57 = vpop.permute.xlu0 %1418 }
 0x32a   : > { %v5264_v59 = vpop.permute.xlu1 %1420 }
 0x32b   : > { %4411 = vrot.lane.b32.xlu0 %v4410_v33, %s4668_s28  ;;  %v1461_v54 = vmul.f32 %v5264_v59, %v5075_v44 }
 0x32f   : > { %4416 = vrot.lane.b32.xlu0 %v4415_v2, %s4668_s28 }
 0x333   : > { %4421 = vrot.lane.b32.xlu0 %v4420_v12, %s4668_s28 }
 0x337   : > { %4426 = vrot.lane.b32.xlu0 %v4425_v14, %s4668_s28 }
 0x37d   : > { %v4387_v38 = vpop.permute.xlu0 %4386 }
 0x37e   : > { %v4389_v58 = vunpack.i.h.bf16 %v4387_v38  ;;  %v4388_v13 = vunpack.i.l.bf16 %v4387_v38 }
 0x380   : > { %v4041_v0 = vpack.c.bf16 %v4389_v58, %v4388_v13 }
 0x381   : > { %v4392_v37 = vpop.permute.xlu1 %4391 }
 0x382   : > { %v4394_v41 = vunpack.i.h.bf16 %v4392_v37  ;;  %v4393_v32 = vunpack.i.l.bf16 %v4392_v37  ;;  %4042 = vmatpush1.bf16.msra.mxu0 %v4041_v0 }
 0x383   : > { %4043 = vmatprep.subr.bf16.mxu0 %v5952_v3 }
 0x384   : > { %v4044_v62 = vpack.c.bf16 %v4394_v41, %v4393_v32 }
 0x386   : > { %4045 = vmatpush1.bf16.msra.mxu0 %v4044_v62 }
 0x387   : > { %4046 = vmatprep.subr.bf16.mxu0 %v5952_v3 }
 0x389   : > { %v4397_v4 = vpop.permute.xlu0 %4396 }
 0x38a   : > { %v4399_v36 = vunpack.i.h.bf16 %v4397_v4  ;;  %v4398_v1 = vunpack.i.l.bf16 %v4397_v4 }
 0x38c   : > { %v4050_v58 = vpack.c.bf16 %v4399_v36, %v4398_v1 }
 0x391   : > { %v4402_v46 = vpop.permute.xlu0 %4401 }
 0x392   : > { %v4404_v37 = vunpack.i.h.bf16 %v4402_v46  ;;  %v4403_v41 = vunpack.i.l.bf16 %v4402_v46 }
 0x394   : > { %v4056_v62 = vpack.c.bf16 %v4404_v37, %v4403_v41  ;;  %v965_v37 = vld [vmem:[%s4823_s24] sm:$0x3] }
 0x395   : > { %v4407_v33 = vpop.permute.xlu0 %4406 }
 0x396   : > { %v4408_v4 = vunpack.i.l.bf16 %v4407_v33 }
 0x39d   : > { %v4412_v61 = vpop.permute.xlu0 %4411 }
 0x39e   : > { %v4413_v46 = vunpack.i.l.bf16 %v4412_v61 }
 0x3a1   : > { %v4417_v2 = vpop.permute.xlu0 %4416 }
 0x3a2   : > { %v4419_v10 = vunpack.i.h.bf16 %v4417_v2  ;;  %v4418_v12 = vunpack.i.l.bf16 %v4417_v2  ;;  %v4409_v2 = vunpack.i.h.bf16 %v4407_v33  ;;  %v1463_v33 = vlaneseq }
 0x3a4   : > { %v4047_v14 = vpack.c.bf16 %v4419_v10, %v4418_v12  ;;  %v4059_v12 = vpack.c.bf16 %v4409_v2, %v4408_v4 }
 0x3a5   : > { %v4422_v38 = vpop.permute.xlu0 %4421 }
 0x3a6   : > { %4048 = vmatpush1.bf16.msra.mxu0 %v4047_v14  ;;  %v4424_v13 = vunpack.i.h.bf16 %v4422_v38  ;;  %v4423_v0 = vunpack.i.l.bf16 %v4422_v38  ;;  %v4414_v14 = vunpack.i.h.bf16 %v4412_v61 }
 0x3a7   : > { %4049 = vmatprep.subr.bf16.mxu0 %v5952_v3 }
 0x3a8   : > { %v4053_v32 = vpack.c.bf16 %v4424_v13, %v4423_v0  ;;  %v5275_v13 = vshrl.u32 %v1463_v33, 7 }
 0x3a9   : > { %v4427_v10 = vpop.permute.xlu0 %4426 }
 0x3aa   : > { %4051 = vmatpush1.bf16.msra.mxu0 %v4050_v58  ;;  %v4429_v36 = vunpack.i.h.bf16 %v4427_v10  ;;  %v4428_v1 = vunpack.i.l.bf16 %v4427_v10  ;;  %v4065_v58 = vpack.c.bf16 %v4414_v14, %v4413_v46  ;;  %5953 = vst [vmem:[#allocation38_spill] sm:$0xff] %v5275_v13  ;;  %v5278_v0 = vsub.s32 1, %v5275_v13 }
 0x3ab   : > { %4052 = vmatprep.subr.bf16.mxu0 %v5952_v3  ;;  %v5282_v41 = vsub.s32 0, %v5275_v13 }
 0x3ac   : > { %v4062_v38 = vpack.c.bf16 %v4429_v36, %v4428_v1  ;;  %v5285_v61 = vrot.slane %v965_v37, %v5278_v0 }
 0x3ae   : > { %4054 = vmatpush1.bf16.msra.mxu0 %v4053_v32  ;;  %5954 = vst [vmem:[#allocation39_spill] sm:$0xff] %v5285_v61  ;;  %v5288_v32 = vrot.slane %v965_v37, %v5282_v41 }
 0x3af   : > { %4055 = vmatprep.subr.bf16.mxu0 %v5952_v3 }
 0x3b2   : > { %4057 = vmatpush1.bf16.msra.mxu0 %v4056_v62 }
 0x3b3   : > { %4058 = vmatprep.subr.bf16.mxu0 %v5952_v3 }
 0x3b6   : > { %4060 = vmatpush1.bf16.msra.mxu0 %v4059_v12 }
 0x3b7   : > { %4061 = vmatprep.subr.bf16.mxu0 %v5952_v3 }
 0x3ba   : > { %4063 = vmatpush1.bf16.msra.mxu0 %v4062_v38 }
 0x3bb   : > { %4064 = vmatprep.subr.bf16.mxu0 %v5952_v3 }
 0x3be   : > { %4066 = vmatpush1.bf16.msra.mxu0 %v4065_v58 }
 0x3bf   : > { %4067 = vmatprep.subr.bf16.mxu0 %v5952_v3 }
 0x3e1   : > { %v1654_v62 = vpop.f32.mrb[4].mxu1 }
 0x3e2   : > { %v1656_v2 = vpop.f32.mrb[5].mxu1  ;;  %v1655_v10 = vadd.f32 %v1654_v62, %v5288_v32 }
 0x3e3   : > { %v1657_v4 = vadd.f32 %v1656_v2, %v5285_v61 }
 0x3e5   : > { %v1660_v12 = vpop.f32.mrb[6].mxu1  ;;  %v1683_v36 = vsel %vm1179_vm4, %v1657_v4, -inf }
 0x3e6   : > { %v1662_v1 = vpop.f32.mrb[7].mxu1  ;;  %v1684_v14 = vmax.f32 %v1655_v10, %v1683_v36  ;;  %v1661_v38 = vadd.f32 %v1660_v12, %v5288_v32 }
 0x3e7   : > { %v1663_v46 = vadd.f32 %v1662_v1, %v5285_v61 }
 0x3e8   : > { %1685 = vmax.xlane.f32.xlu1 %v1684_v14 }
 0x3e9   : > { %v1666_v58 = vpop.f32.mrb[8].mxu1  ;;  %v1687_v33 = vsel %vm1179_vm4, %v1663_v46, -inf }
 0x3ea   : > { %v1668_v37 = vpop.f32.mrb[9].mxu1  ;;  %v1688_v13 = vmax.f32 %v1661_v38, %v1687_v33 }
 0x3eb   : > { %v5320_v44 = vadd.f32 %v1668_v37, %v5285_v61 }
 0x3ec   : > { %1689 = vmax.xlane.f32.xlu0 %v1688_v13 }
 0x3ed   : > { %v1672_v6 = vpop.f32.mrb[10].mxu1  ;;  %v1691_v59 = vsel %vm1179_vm4, %v5320_v44, -inf }
 0x3ee   : > { %v1674_v2 = vpop.f32.mrb[11].mxu1  ;;  %v5300_v7 = vadd.f32 %v1672_v6, %v5288_v32  ;;  %v1460_v6 = vmul.f32 %v5262_v57, %v5061_v35 }
 0x3ef   : > { %v5297_v62 = vadd.f32 %v1674_v2, %v5285_v61 }
 0x3f0   : > { %v4430_v11 = vpack.i.bf16 %v1461_v54, %v1460_v6 }
 0x3f1   : > { %v1678_v36 = vpop.f32.mrb[12].mxu1  ;;  %v1695_v1 = vsel %vm1179_vm4, %v5297_v62, -inf }
 0x3f2   : > { %v1680_v12 = vpop.f32.mrb[13].mxu1  ;;  %v1696_v14 = vmax.f32 %v5300_v7, %v1695_v1  ;;  %v5311_v33 = vadd.f32 %v1678_v36, %v5288_v32  ;;  %v5325_v36 = vadd.f32 %v1666_v58, %v5288_v32 }
 0x3f3   : > { %v5308_v13 = vadd.f32 %v1680_v12, %v5285_v61 }
 0x3f4   : > { %1697 = vmax.xlane.f32.xlu0 %v1696_v14  ;;  %v1692_v35 = vmax.f32 %v5325_v36, %v1691_v59 }
 0x3f5   : > { %v1699_v2 = vsel %vm1179_vm4, %v5308_v13, -inf }
 0x3f6   : > { %v1700_v52 = vmax.f32 %v5311_v33, %v1699_v2 }
 0x3f8   : > { %1701 = vmax.xlane.f32.xlu0 %v1700_v52 }
 0x3f9   : > { %4431 = vrot.lane.b32.xlu1 %v4430_v11, %s4668_s28  ;;  %s5957_s28 = sld [smem:[#allocation14_spill]] }
 0x41d   : > { %1693 = vmax.xlane.f32.xlu1 %v1692_v35 }
 0x475   : > { %v1686_v57 = vpop.xlane.xlu1 %1685 }
 0x476   : > { %v1703_v1 = vsub.f32 %v1655_v10, %v1686_v57  ;;  %v1704_v12 = vsub.f32 %v1657_v4, %v1686_v57  ;;  %v5333_v4 = vpack.c.bf16 %v4917_v18, %v4909_v16  ;;  %v5356_v16 = vpack.c.bf16 %v4922_v19, %v4927_v20  ;;  %v2018_v57 = vld [vmem:[%s5927_s8] sm:$0xff] }
 0x477   : > { %v5374_v18 = vpack.c.bf16 %v4952_v25, %v4957_v26  ;;  %v5380_v19 = vpack.c.bf16 %v4962_v27, %v4967_v28  ;;  %v5386_v20 = vpack.c.bf16 %v4972_v29, %v4977_v30 }
 0x478   : > { %v1713_v14 = vmul.f32 1.442695, %v1703_v1  ;;  %v1715_v54 = vmul.f32 1.442695, %v1704_v12  ;;  %v2019_v1 = vld [vmem:[%s5927_s8 + $0x8] sm:$0xff] }
 0x479   : > { %v1690_v52 = vpop.xlane.xlu0 %1689  ;;  %v4432_v6 = vpop.permute.xlu1 %4431  ;;  %v4101_v12 = vpack.c.bf16 %v2019_v1, %v2018_v57  ;;  %v3672_v1 = vld [vmem:[%s4723_s14] ss:$0 sm:$0xff] }
 0x47a   : > { %4485 = vpow2.f32 %v1713_v14  ;;  %v1705_v11 = vsub.f32 %v1661_v38, %v1690_v52  ;;  %v1706_v37 = vsub.f32 %v1663_v46, %v1690_v52  ;;  %v4434_v2 = vunpack.i.h.bf16 %v4432_v6  ;;  %v2020_v14 = vld [vmem:[%s5927_s8 + $0x10] sm:$0xff] }
 0x47b   : > { %4487 = vpow2.f32 %v1715_v54  ;;  %v4433_v61 = vunpack.i.l.bf16 %v4432_v6  ;;  %4102 = vmatpush3.bf16.msra.mxu1 %v4101_v12  ;;  %v2021_v54 = vld [vmem:[%s5927_s8 + $0x18] sm:$0xff] }
 0x47c   : > { %v1717_v8 = vmul.f32 1.442695, %v1705_v11  ;;  %v1719_v63 = vmul.f32 1.442695, %v1706_v37  ;;  %4103 = vmatprep.subr.bf16.mxu1 %v5952_v3  ;;  %v4104_v52 = vpack.c.bf16 %v2021_v54, %v2020_v14 }
 0x47d   : > { %v4068_v58 = vpack.c.bf16 %v4434_v2, %v4433_v61 }
 0x47e   : > { %4489 = vpow2.f32 %v1717_v8 }
 0x47f   : > { %4491 = vpow2.f32 %v1719_v63  ;;  %4069 = vmatpush1.bf16.msra.mxu0 %v4068_v58  ;;  %v5345_v63 = vpack.c.bf16 %v4912_v17, %v4904_v15  ;;  %v5362_v15 = vpack.c.bf16 %v4932_v21, %v4937_v22  ;;  %v5368_v17 = vpack.c.bf16 %v4942_v23, %v4947_v24  ;;  %4105 = vmatpush3.bf16.msra.mxu1 %v4104_v52 }
 0x480   : > { %4070 = vmatprep.subr.bf16.mxu0 %v5952_v3  ;;  %v5392_v21 = vpack.c.bf16 %v5059_v34, %v4982_v31  ;;  %v5398_v23 = vpack.c.bf16 %v5087_v60, %v5073_v42  ;;  %4112 = vmatprep.subr.bf16.mxu1 %v5952_v3 }
 0x481   : > { %v1698_v22 = vpop.xlane.xlu0 %1697 }
 0x482   : > { %v1710_v24 = vsub.f32 %v5297_v62, %v1698_v22  ;;  %v1709_v29 = vsub.f32 %v5300_v7, %v1698_v22 }
 0x484   : > { %v5329_v10 = vpop.eup %4485  ;;  %v1727_v34 = vmul.f32 1.442695, %v1710_v24  ;;  %v1725_v60 = vmul.f32 1.442695, %v1709_v29 }
 0x485   : > { %v5335_v59 = vpop.eup %4487  ;;  %v1702_v26 = vpop.xlane.xlu0 %1701 }
 0x486   : > { %3657 = vmatprep.mubr.msk.f32.mxu0 %vm1179_vm4, %v5335_v59  ;;  %v1712_v42 = vsub.f32 %v5308_v13, %v1702_v26  ;;  %v1711_v61 = vsub.f32 %v5311_v33, %v1702_v26 }
 0x487   : > { %1893 = vmatmul.mubr.f32.vlgmr.msra.gmra.mrb[12].mxu0 %v5329_v10 }
 0x488   : > { %v5340_v46 = vpop.eup %4489  ;;  %4072 = vmatpush1.bf16.msra.mxu0 %v5333_v4  ;;  %v1731_v38 = vmul.f32 1.442695, %v1712_v42  ;;  %v1729_v62 = vmul.f32 1.442695, %v1711_v61 }
 0x489   : > { %v5347_v8 = vpop.eup %4491  ;;  %4073 = vmatprep.subr.bf16.mxu0 %v5952_v3 }
 0x48a   : > { %3658 = vmatprep.mubr.msk.f32.mxu0 %vm1179_vm4, %v5347_v8 }
 0x48b   : > { %1898 = vmatmul.mubr.f32.gmra.mrb[14].mxu0 %v5340_v46 }
 0x48c   : > { %4075 = vmatpush1.bf16.msra.mxu0 %v5345_v63 }
 0x48d   : > { %4076 = vmatprep.subr.bf16.mxu0 %v5952_v3 }
 0x490   : > { %4078 = vmatpush1.bf16.msra.mxu0 %v5356_v16 }
 0x491   : > { %4079 = vmatprep.subr.bf16.mxu0 %v5952_v3 }
 0x494   : > { %4081 = vmatpush1.bf16.msra.mxu0 %v5362_v15 }
 0x495   : > { %4082 = vmatprep.subr.bf16.mxu0 %v5952_v3 }
 0x498   : > { %4084 = vmatpush1.bf16.msra.mxu0 %v5368_v17 }
 0x499   : > { %4085 = vmatprep.subr.bf16.mxu0 %v5952_v3 }
 0x49c   : > { %4087 = vmatpush1.bf16.msra.mxu0 %v5374_v18 }
 0x49d   : > { %4088 = vmatprep.subr.bf16.mxu0 %v5952_v3 }
 0x4a0   : > { %4090 = vmatpush1.bf16.msra.mxu0 %v5380_v19 }
 0x4a1   : > { %4091 = vmatprep.subr.bf16.mxu0 %v5952_v3 }
 0x4a4   : > { %4093 = vmatpush1.bf16.msra.mxu0 %v5386_v20 }
 0x4a5   : > { %4094 = vmatprep.subr.bf16.mxu0 %v5952_v3 }
 0x4a8   : > { %4096 = vmatpush1.bf16.msra.mxu0 %v5392_v21 }
 0x4a9   : > { %4097 = vmatprep.subr.bf16.mxu0 %v5952_v3 }
 0x4aa   : > { %v1694_v25 = vpop.xlane.xlu1 %1693 }
 0x4ab   : > { %v1707_v27 = vsub.f32 %v5325_v36, %v1694_v25  ;;  %v1708_v28 = vsub.f32 %v5320_v44, %v1694_v25 }
 0x4ac   : > { %4099 = vmatpush1.bf16.msra.mxu0 %v5398_v23 }
 0x4ad   : > { %v1721_v30 = vmul.f32 1.442695, %v1707_v27  ;;  %v1723_v31 = vmul.f32 1.442695, %v1708_v28  ;;  %4106 = vmatprep.subr.bf16.mxu0 %v5952_v3 }
 0x4af   : > { %4493 = vpow2.f32 %v1721_v30 }
 0x4b0   : > { %4495 = vpow2.f32 %v1723_v31 }
 0x4b1   : > { %4497 = vpow2.f32 %v1727_v34 }
 0x4b2   : > { %4499 = vpow2.f32 %v1725_v60 }
 0x4b3   : > { %4501 = vpow2.f32 %v1731_v38 }
 0x4b4   : > { %4503 = vpow2.f32 %v1729_v62 }
 0x4b9   : > { %v4494_v44 = vpop.eup %4493 }
 0x4ba   : > { %v4496_v7 = vpop.eup %4495 }
 0x4bb   : > { %3659 = vmatprep.mubr.msk.f32.mxu0 %vm1179_vm4, %v4496_v7  ;;  %v4498_v36 = vpop.eup %4497 }
 0x4bc   : > { %1903 = vmatmul.mubr.f32.gmra.mrb[16].mxu0 %v4494_v44  ;;  %v4500_v13 = vpop.eup %4499 }
 0x4bd   : > { %3660 = vmatprep.mubr.msk.f32.mxu0 %vm1179_vm4, %v4498_v36  ;;  %v4502_v35 = vpop.eup %4501 }
 0x4be   : > { %v4504_v33 = vpop.eup %4503 }
 0x4c0   : > { %1908 = vmatmul.mubr.f32.gmra.mrb[18].mxu0 %v4500_v13 }
 0x4c1   : > { %3661 = vmatprep.mubr.msk.f32.mxu0 %vm1179_vm4, %v4502_v35 }
 0x4c4   : > { %1913 = vmatmul.mubr.f32.gmra.mrb[20].mxu0 %v4504_v33 }
 0x4c5   : > { %3662 = vmatprep.mubr.msk.f32.mxu0 %vm1179_vm4, %v5335_v59 }
 0x4c8   : > { %1983 = vmatmul.mubr.f32.vlgmr.msra.gmra.mrb[22].mxu0 %v5329_v10 }
 0x4c9   : > { %3663 = vmatprep.mubr.msk.f32.mxu0 %vm1179_vm4, %v5347_v8 }
 0x4cc   : > { %1988 = vmatmul.mubr.f32.gmra.mrb[24].mxu0 %v5340_v46 }
 0x4cd   : > { %3664 = vmatprep.mubr.msk.f32.mxu0 %vm1179_vm4, %v4496_v7 }
 0x4d0   : > { %1993 = vmatmul.mubr.f32.gmra.mrb[26].mxu0 %v4494_v44 }
 0x4d1   : > { %3665 = vmatprep.mubr.msk.f32.mxu0 %vm1179_vm4, %v4498_v36 }
 0x4d4   : > { %1998 = vmatmul.mubr.f32.gmra.mrb[28].mxu0 %v4500_v13 }
 0x4d5   : > { %3666 = vmatprep.mubr.msk.f32.mxu0 %vm1179_vm4, %v4502_v35 }
 0x4d8   : > { %2003 = vmatmul.mubr.f32.gmra.mrb[30].mxu0 %v4504_v33 }
 0x4d9   : > { %3873 = vmatprep.mubr.msk.f32.mxu0 %vm4664_vm0, %v5951_v47 }
 0x55a   : > { %v1894_v6 = vpop.f32.mrb[12].mxu0 }
 0x55b   : > { %v1896_v11 = vpop.f32.mrb[13].mxu0 }
 0x55e   : > { %v1899_v37 = vpop.f32.mrb[14].mxu0 }
 0x55f   : > { %v1901_v2 = vpop.f32.mrb[15].mxu0 }
 0x58f   : > { %v1904_v58 = vpop.f32.mrb[16].mxu0 }
 0x590   : > { %v1906_v10 = vpop.f32.mrb[17].mxu0 }
 0x593   : > { %v1909_v59 = vpop.f32.mrb[18].mxu0 }
 0x594   : > { %v1911_v46 = vpop.f32.mrb[19].mxu0 }
 0x597   : > { %v1914_v8 = vpop.f32.mrb[20].mxu0 }
 0x598   : > { %v1916_v22 = vpop.f32.mrb[21].mxu0 }
 0x59b   : > { %v1984_v24 = vpop.f32.mrb[22].mxu0 }
 0x59c   : > { %4505 = vrcp.f32 %v1984_v24  ;;  %v1986_v25 = vpop.f32.mrb[23].mxu0 }
 0x59f   : > { %v1989_v26 = vpop.f32.mrb[24].mxu0 }
 0x5a0   : > { %4507 = vrcp.f32 %v1989_v26  ;;  %v1991_v27 = vpop.f32.mrb[25].mxu0 }
 0x5a3   : > { %v1994_v28 = vpop.f32.mrb[26].mxu0 }
 0x5a4   : > { %4509 = vrcp.f32 %v1994_v28  ;;  %v1996_v29 = vpop.f32.mrb[27].mxu0 }
 0x5a6   : > { %v4506_v30 = vpop.eup %4505 }
 0x5a7   : > { %v2009_v31 = vmul.f32 %v4506_v30, %v1894_v6  ;;  %v1999_v34 = vpop.f32.mrb[28].mxu0 }
 0x5a8   : > { %4511 = vrcp.f32 %v1999_v34  ;;  %v2001_v42 = vpop.f32.mrb[29].mxu0 }
 0x5a9   : > { %3851 = vmatmul.mubr.msk.f32.vlgmr.msra.gmra.mrb[14].mxu1 %vm1179_vm4, %v2009_v31 }
 0x5aa   : > { %v4508_v60 = vpop.eup %4507  ;;  %3853 = vmatprep.mubr.msk.f32.mxu1 %vm4664_vm0, %v5951_v47 }
 0x5ab   : > { %v2004_v61 = vpop.f32.mrb[30].mxu0  ;;  %v2011_v38 = vmul.f32 %v4508_v60, %v1899_v37 }
 0x5ac   : > { %4513 = vrcp.f32 %v2004_v61  ;;  %v2006_v62 = vpop.f32.mrb[31].mxu0 }
 0x5ad   : > { %3854 = vmatmul.mubr.msk.f32.gmra.mrb[16].mxu1 %vm1179_vm4, %v2011_v38 }
 0x5ae   : > { %v4510_v44 = vpop.eup %4509  ;;  %3856 = vmatprep.mubr.msk.f32.mxu1 %vm4664_vm0, %v5951_v47 }
 0x5af   : > { %v2013_v7 = vmul.f32 %v4510_v44, %v1904_v58 }
 0x5b1   : > { %3857 = vmatmul.mubr.msk.f32.gmra.mrb[18].mxu1 %vm1179_vm4, %v2013_v7 }
 0x5b2   : > { %v4512_v36 = vpop.eup %4511  ;;  %3859 = vmatprep.mubr.msk.f32.mxu1 %vm4664_vm0, %v5951_v47 }
 0x5b3   : > { %v2015_v13 = vmul.f32 %v4512_v36, %v1909_v59 }
 0x5b5   : > { %3860 = vmatmul.mubr.msk.f32.gmra.mrb[20].mxu1 %vm1179_vm4, %v2015_v13 }
 0x5b6   : > { %v4514_v35 = vpop.eup %4513  ;;  %3862 = vmatprep.mubr.msk.f32.mxu1 %vm4664_vm0, %v5951_v47 }
 0x5b7   : > { %v2017_v33 = vmul.f32 %v4514_v35, %v1914_v8 }
 0x5b9   : > { %3863 = vmatmul.mubr.msk.f32.gmra.mrb[22].mxu1 %vm1179_vm4, %v2017_v33 }
 0x5ba   : > { %3904 = vmatprep.mubr.msk.f32.mxu1 %vm4664_vm0, %v5951_v47 }
 0x67c   : > { %v2103_v57 = vpop.f32.mrb[14].mxu1 }
 0x67d   : > { %v2127_v12 = vadd.f32 %v2103_v57, %v4991_v43  ;;  %v3852_v14 = vpop.f32.mrb[15].mxu1 }
 0x67f   : > { %v2139_v54 = vadd.f32 %v3672_v1, %v2127_v12 }
 0x680   : > { %v2108_v52 = vpop.f32.mrb[16].mxu1 }
 0x681   : > { %v2128_v6 = vadd.f32 %v2108_v52, %v4994_v45  ;;  %v3855_v11 = vpop.f32.mrb[17].mxu1  ;;  %v2144_v37 = vsel %vm1179_vm4, %v2139_v54, 0.0 }
 0x682   : > { %2145 = vadd.xlane.f32.xlu0 %v2144_v37 }
 0x683   : > { %v2140_v2 = vadd.f32 %v3672_v1, %v2128_v6 }
 0x684   : > { %v2113_v58 = vpop.f32.mrb[18].mxu1 }
 0x685   : > { %v2129_v10 = vadd.f32 %v2113_v58, %v5001_v49  ;;  %v3858_v59 = vpop.f32.mrb[19].mxu1  ;;  %v2147_v46 = vsel %vm1179_vm4, %v2140_v2, 0.0  ;;  %v2228_v58 = vld [vmem:[%s4728_s19] sm:$0xff] }
 0x686   : > { %2148 = vadd.xlane.f32.xlu0 %v2147_v46  ;;  %v2230_v46 = vld [vmem:[%s4728_s19 + $0x10] sm:$0xff] }
 0x687   : > { %v2141_v8 = vadd.f32 %v3672_v1, %v2129_v10  ;;  %v2229_v10 = vld [vmem:[%s4728_s19 + $0x8] sm:$0xff] }
 0x688   : > { %v2118_v22 = vpop.f32.mrb[20].mxu1  ;;  %v4107_v59 = vpack.c.bf16 %v2229_v10, %v2228_v58 }
 0x689   : > { %v2130_v43 = vadd.f32 %v2118_v22, %v5004_v50  ;;  %v3861_v24 = vpop.f32.mrb[21].mxu1  ;;  %v2150_v25 = vsel %vm1179_vm4, %v2141_v8, 0.0 }
 0x68a   : > { %2151 = vadd.xlane.f32.xlu0 %v2150_v25  ;;  %4108 = vmatpush3.bf16.msra.mxu0 %v4107_v59  ;;  %v2350_v24 = vld [vmem:[%s4738_s30 + $0x8] sm:$0xff]  ;;  %v2351_v25 = vld [vmem:[%s4738_s30 + $0x10] sm:$0xff] }
 0x68b   : > { %v2142_v45 = vadd.f32 %v3672_v1, %v2130_v43  ;;  %4109 = vmatprep.subr.bf16.mxu0 %v5952_v3  ;;  %v2349_v43 = vld [vmem:[%s4738_s30] sm:$0xff] }
 0x68c   : > { %v2123_v26 = vpop.f32.mrb[22].mxu1 }
 0x68d   : > { %v2131_v27 = vadd.f32 %v2123_v26, %v5019_v51  ;;  %v3864_v28 = vpop.f32.mrb[23].mxu1  ;;  %v2153_v29 = vsel %vm1179_vm4, %v2142_v45, 0.0  ;;  %v2352_v26 = vld [vmem:[%s4738_s30 + $0x18] sm:$0xff] }
 0x68e   : > { %2154 = vadd.xlane.f32.xlu0 %v2153_v29  ;;  %v2353_v28 = vld [vmem:[%s4738_s30 + $0x20] sm:$0xff]  ;;  %v2354_v29 = vld [vmem:[%s4738_s30 + $0x28] sm:$0xff] }
 0x68f   : > { %v2143_v49 = vadd.f32 %v3672_v1, %v2131_v27  ;;  %v4116_v27 = vpack.c.bf16 %v2352_v26, %v2351_v25 }
 0x691   : > { %v2156_v30 = vsel %vm1179_vm4, %v2143_v49, 0.0 }
 0x692   : > { %2157 = vadd.xlane.f32.xlu0 %v2156_v30 }
 0x70f   : > { %v2146_v31 = vpop.xlane.xlu0 %2145 }
 0x710   : > { %v2160_v34 = vmul.f32 0.03125, %v2146_v31 }
 0x712   : > { %v5455_v42 = vsub.f32 %v2139_v54, %v2160_v34 }
 0x713   : > { %v2149_v50 = vpop.xlane.xlu0 %2148 }
 0x714   : > { %v2161_v60 = vmul.f32 0.03125, %v2149_v50  ;;  %v2170_v61 = vmul.f32 %v5455_v42, %v5455_v42 }
 0x716   : > { %v5459_v38 = vsub.f32 %v2140_v2, %v2161_v60  ;;  %v2175_v51 = vsel %vm1179_vm4, %v2170_v61, 0.0 }
 0x717   : > { %v2152_v62 = vpop.xlane.xlu0 %2151  ;;  %2176 = vadd.xlane.f32.xlu0 %v2175_v51 }
 0x718   : > { %v2162_v44 = vmul.f32 0.03125, %v2152_v62  ;;  %v2171_v7 = vmul.f32 %v5459_v38, %v5459_v38 }
 0x71a   : > { %v5464_v36 = vsub.f32 %v2141_v8, %v2162_v44  ;;  %v2178_v13 = vsel %vm1179_vm4, %v2171_v7, 0.0  ;;  %v2231_v8 = vld [vmem:[%s4728_s19 + $0x18] sm:$0xff]  ;;  %v5496_v44 = vld [vmem:[%s4798_s27] sm:$0xff] }
 0x71b   : > { %2179 = vadd.xlane.f32.xlu1 %v2178_v13  ;;  %v2155_v35 = vpop.xlane.xlu0 %2154  ;;  %v4110_v22 = vpack.c.bf16 %v2231_v8, %v2230_v46 }
 0x71c   : > { %v2163_v33 = vmul.f32 0.03125, %v2155_v35  ;;  %v2172_v57 = vmul.f32 %v5464_v36, %v5464_v36  ;;  %v5499_v35 = vld [vmem:[%s5929_s4] sm:$0xff] }
 0x71d   : > { %4111 = vmatpush3.bf16.msra.mxu0 %v4110_v22 }
 0x71e   : > { %v5469_v1 = vsub.f32 %v2142_v45, %v2163_v33  ;;  %v2181_v12 = vsel %vm1179_vm4, %v2172_v57, 0.0  ;;  %4124 = vmatprep.subr.bf16.mxu0 %v5952_v3  ;;  %v4113_v45 = vpack.c.bf16 %v2350_v24, %v2349_v43  ;;  %v2213_v57 = vrot.slane %v5496_v44, %v5282_v41 }
 0x71f   : > { %2182 = vadd.xlane.f32.xlu0 %v2181_v12  ;;  %v2158_v14 = vpop.xlane.xlu0 %2157 }
 0x720   : > { %v2164_v54 = vmul.f32 0.03125, %v2158_v14  ;;  %v2173_v52 = vmul.f32 %v5469_v1, %v5469_v1  ;;  %4114 = vmatpush3.bf16.msra.mxu1 %v4113_v45 }
 0x721   : > { %4115 = vmatprep.subr.bf16.mxu1 %v5952_v3 }
 0x722   : > { %v5474_v6 = vsub.f32 %v2143_v49, %v2164_v54  ;;  %v2184_v11 = vsel %vm1179_vm4, %v2173_v52, 0.0  ;;  %v4119_v49 = vpack.c.bf16 %v2354_v29, %v2353_v28  ;;  %v2222_v54 = vrot.slane %v5499_v35, %v5282_v41  ;;  %v2355_v29 = vld [vmem:[%s4738_s30 + $0x30] sm:$0xff] }
 0x723   : > { %2185 = vadd.xlane.f32.xlu1 %v2184_v11 }
 0x724   : > { %v2174_v37 = vmul.f32 %v5474_v6, %v5474_v6  ;;  %4117 = vmatpush3.bf16.msra.mxu1 %v4116_v27 }
 0x725   : > { %4118 = vmatprep.subr.bf16.mxu1 %v5952_v3 }
 0x726   : > { %v2187_v2 = vsel %vm1179_vm4, %v2174_v37, 0.0 }
 0x727   : > { %2188 = vadd.xlane.f32.xlu0 %v2187_v2 }
 0x728   : > { %4120 = vmatpush3.bf16.msra.mxu1 %v4119_v49  ;;  %v2356_v49 = vld [vmem:[%s4738_s30 + $0x38] sm:$0xff] }
 0x729   : > { %4121 = vmatprep.subr.bf16.mxu1 %v5952_v3 }
 0x7a4   : > { %v2177_v30 = vpop.xlane.xlu0 %2176 }
 0x7a5   : > { %v2190_v31 = vmul.f32 0.03125, %v2177_v30  ;;  %v4122_v30 = vpack.c.bf16 %v2356_v49, %v2355_v29 }
 0x7a7   : > { %v2195_v34 = vadd.f32 1e-05, %v2190_v31  ;;  %4123 = vmatpush3.bf16.msra.mxu1 %v4122_v30 }
 0x7a8   : > { %v2180_v50 = vpop.xlane.xlu1 %2179  ;;  %4130 = vmatprep.subr.bf16.mxu1 %v5952_v3 }
 0x7a9   : > { %4515 = vrsqrt.f32 %v2195_v34  ;;  %v2191_v60 = vmul.f32 0.03125, %v2180_v50 }
 0x7ab   : > { %v2196_v61 = vadd.f32 1e-05, %v2191_v60 }
 0x7ac   : > { %v2183_v51 = vpop.xlane.xlu0 %2182 }
 0x7ad   : > { %4517 = vrsqrt.f32 %v2196_v61  ;;  %v2192_v62 = vmul.f32 0.03125, %v2183_v51 }
 0x7af   : > { %v2197_v7 = vadd.f32 1e-05, %v2192_v62 }
 0x7b0   : > { %v2186_v13 = vpop.xlane.xlu1 %2185 }
 0x7b1   : > { %4519 = vrsqrt.f32 %v2197_v7  ;;  %v2193_v33 = vmul.f32 0.03125, %v2186_v13 }
 0x7b3   : > { %v4516_v12 = vpop.eup %4515  ;;  %v2198_v14 = vadd.f32 1e-05, %v2193_v33 }
 0x7b4   : > { %v2205_v52 = vmul.f32 %v4516_v12, %v5455_v42  ;;  %v2189_v11 = vpop.xlane.xlu0 %2188 }
 0x7b5   : > { %4521 = vrsqrt.f32 %v2198_v14  ;;  %v2194_v37 = vmul.f32 0.03125, %v2189_v11 }
 0x7b6   : > { %v2214_v2 = vmul.f32 %v2213_v57, %v2205_v52 }
 0x7b7   : > { %v4518_v58 = vpop.eup %4517  ;;  %v2199_v10 = vadd.f32 1e-05, %v2194_v37 }
 0x7b8   : > { %v5506_v59 = vadd.f32 %v2222_v54, %v2214_v2  ;;  %v2206_v46 = vmul.f32 %v4518_v58, %v5459_v38 }
 0x7b9   : > { %4523 = vrsqrt.f32 %v2199_v10 }
 0x7ba   : > { %3874 = vmatmul.mubr.msk.f32.vlgmr.msra.gmra.mrb[32].mxu0 %vm1179_vm4, %v5506_v59  ;;  %v2215_v8 = vmul.f32 %v2213_v57, %v2206_v46 }
 0x7bb   : > { %v4520_v22 = vpop.eup %4519  ;;  %3876 = vmatprep.mubr.msk.f32.mxu0 %vm4664_vm0, %v5951_v47 }
 0x7bc   : > { %v5513_v41 = vadd.f32 %v2222_v54, %v2215_v8  ;;  %v2207_v42 = vmul.f32 %v4520_v22, %v5464_v36  ;;  %v3684_v8 = vld [vmem:[%s5956_s11] ss:$0 sm:$0xff]  ;;  %s5972_s11 = sld [smem:[#allocation13_spill]] }
 0x7be   : > { %3877 = vmatmul.mubr.msk.f32.gmra.mrb[34].mxu0 %vm1179_vm4, %v5513_v41  ;;  %v2216_v43 = vmul.f32 %v2213_v57, %v2207_v42 }
 0x7bf   : > { %v4522_v24 = vpop.eup %4521  ;;  %3879 = vmatprep.mubr.msk.f32.mxu0 %vm4664_vm0, %v5951_v47 }
 0x7c0   : > { %v5520_v38 = vadd.f32 %v2222_v54, %v2216_v43  ;;  %v2208_v25 = vmul.f32 %v4522_v24, %v5469_v1 }
 0x7c2   : > { %3880 = vmatmul.mubr.msk.f32.gmra.mrb[36].mxu0 %vm1179_vm4, %v5520_v38  ;;  %v2217_v45 = vmul.f32 %v2213_v57, %v2208_v25 }
 0x7c3   : > { %v4524_v36 = vpop.eup %4523  ;;  %3882 = vmatprep.mubr.msk.f32.mxu0 %vm4664_vm0, %v5951_v47 }
 0x7c4   : > { %v5527_v26 = vadd.f32 %v2222_v54, %v2217_v45  ;;  %v2209_v27 = vmul.f32 %v4524_v36, %v5474_v6  ;;  %v3673_v6 = vld [vmem:[%s5955_s1] ss:$0 sm:$0xff]  ;;  %s5958_s1 = sld [smem:[#allocation15_spill]] }
 0x7c6   : > { %3883 = vmatmul.mubr.msk.f32.gmra.mrb[38].mxu0 %vm1179_vm4, %v5527_v26  ;;  %v2218_v28 = vmul.f32 %v2213_v57, %v2209_v27 }
 0x7c7   : > { %3885 = vmatprep.mubr.msk.f32.mxu0 %vm4664_vm0, %v5951_v47 }
 0x7c8   : > { %v5534_v1 = vadd.f32 %v2222_v54, %v2218_v28 }
 0x7ca   : > { %3886 = vmatmul.mubr.msk.f32.gmra.mrb[40].mxu0 %vm1179_vm4, %v5534_v1 }
 0x7cb   : > { %3927 = vmatprep.mubr.msk.f32.mxu0 %vm4664_vm0, %v5951_v47 }
 0x88d   : > { %v2320_v31 = vpop.f32.mrb[32].mxu0 }
 0x88e   : > { %v2321_v34 = vadd.f32 %v3673_v6, %v2320_v31  ;;  %v3875_v50 = vpop.f32.mrb[33].mxu0 }
 0x890   : > { %v2344_v60 = vmax.f32 %v2321_v34, 0.0 }
 0x891   : > { %v2325_v61 = vpop.f32.mrb[34].mxu0 }
 0x892   : > { %v2326_v51 = vadd.f32 %v3673_v6, %v2325_v61  ;;  %v3878_v62 = vpop.f32.mrb[35].mxu0  ;;  %3905 = vmatmul.mubr.msk.f32.vlgmr.msra.gmra.mrb[24].mxu1 %vm2357_vm6, %v2344_v60 }
 0x893   : > { %3907 = vmatprep.mubr.msk.f32.mxu1 %vm4664_vm0, %v5951_v47 }
 0x894   : > { %v2345_v7 = vmax.f32 %v2326_v51, 0.0 }
 0x895   : > { %v2330_v13 = vpop.f32.mrb[36].mxu0 }
 0x896   : > { %v2331_v33 = vadd.f32 %v3673_v6, %v2330_v13  ;;  %v3881_v57 = vpop.f32.mrb[37].mxu0  ;;  %3908 = vmatmul.mubr.msk.f32.gmra.mrb[26].mxu1 %vm2357_vm6, %v2345_v7 }
 0x897   : > { %3910 = vmatprep.mubr.msk.f32.mxu1 %vm4664_vm0, %v5951_v47 }
 0x898   : > { %v2346_v12 = vmax.f32 %v2331_v33, 0.0 }
 0x899   : > { %v2335_v14 = vpop.f32.mrb[38].mxu0 }
 0x89a   : > { %v2336_v54 = vadd.f32 %v3673_v6, %v2335_v14  ;;  %v3884_v52 = vpop.f32.mrb[39].mxu0  ;;  %3911 = vmatmul.mubr.msk.f32.gmra.mrb[28].mxu1 %vm2357_vm6, %v2346_v12 }
 0x89b   : > { %3913 = vmatprep.mubr.msk.f32.mxu1 %vm4664_vm0, %v5951_v47 }
 0x89c   : > { %v2347_v11 = vmax.f32 %v2336_v54, 0.0 }
 0x89d   : > { %v2340_v37 = vpop.f32.mrb[40].mxu0 }
 0x89e   : > { %v2341_v2 = vadd.f32 %v3673_v6, %v2340_v37  ;;  %v3887_v58 = vpop.f32.mrb[41].mxu0  ;;  %3914 = vmatmul.mubr.msk.f32.gmra.mrb[30].mxu1 %vm2357_vm6, %v2347_v11 }
 0x89f   : > { %3916 = vmatprep.mubr.msk.f32.mxu1 %vm4664_vm0, %v5951_v47 }
 0x8a0   : > { %v2348_v10 = vmax.f32 %v2341_v2, 0.0 }
 0x8a2   : > { %3917 = vmatmul.mubr.msk.f32.gmra.mrb[32].mxu1 %vm2357_vm6, %v2348_v10 }
 0x8a3   : > { %2845 = vmatprep.mubr.f32.mxu1 %v5951_v47 }
 0x965   : > { %v2439_v46 = vpop.f32.mrb[24].mxu1 }
 0x966   : > { %v2463_v22 = vadd.f32 %v2439_v46, %v5506_v59  ;;  %v3906_v42 = vpop.f32.mrb[25].mxu1 }
 0x968   : > { %v2475_v43 = vadd.f32 %v3684_v8, %v2463_v22 }
 0x969   : > { %v2444_v24 = vpop.f32.mrb[26].mxu1 }
 0x96a   : > { %v2464_v25 = vadd.f32 %v2444_v24, %v5513_v41  ;;  %v3909_v45 = vpop.f32.mrb[27].mxu1  ;;  %v2480_v36 = vsel %vm1179_vm4, %v2475_v43, 0.0 }
 0x96b   : > { %2481 = vadd.xlane.f32.xlu1 %v2480_v36 }
 0x96c   : > { %v2476_v27 = vadd.f32 %v3684_v8, %v2464_v25 }
 0x96d   : > { %v2449_v28 = vpop.f32.mrb[28].mxu1 }
 0x96e   : > { %v2465_v29 = vadd.f32 %v2449_v28, %v5520_v38  ;;  %v3912_v49 = vpop.f32.mrb[29].mxu1  ;;  %v2483_v30 = vsel %vm1179_vm4, %v2476_v27, 0.0 }
 0x96f   : > { %2484 = vadd.xlane.f32.xlu0 %v2483_v30  ;;  %v2564_v49 = vld [vmem:[%s5957_s28 + $0x8] sm:$0xff] }
 0x970   : > { %v2477_v6 = vadd.f32 %v3684_v8, %v2465_v29  ;;  %v2563_v29 = vld [vmem:[%s5957_s28] sm:$0xff] }
 0x971   : > { %v2454_v31 = vpop.f32.mrb[30].mxu1  ;;  %v4125_v30 = vpack.c.bf16 %v2564_v49, %v2563_v29 }
 0x972   : > { %v2466_v59 = vadd.f32 %v2454_v31, %v5527_v26  ;;  %v3915_v34 = vpop.f32.mrb[31].mxu1  ;;  %v2486_v50 = vsel %vm1179_vm4, %v2477_v6, 0.0  ;;  %v2566_v31 = vld [vmem:[%s5957_s28 + $0x18] sm:$0xff] }
 0x973   : > { %2487 = vadd.xlane.f32.xlu1 %v2486_v50  ;;  %4126 = vmatpush3.bf16.msra.mxu0 %v4125_v30 }
 0x974   : > { %v2478_v41 = vadd.f32 %v3684_v8, %v2466_v59  ;;  %4127 = vmatprep.subr.bf16.mxu0 %v5952_v3 }
 0x975   : > { %v2459_v60 = vpop.f32.mrb[32].mxu1 }
 0x976   : > { %v2467_v61 = vadd.f32 %v2459_v60, %v5534_v1  ;;  %v3918_v51 = vpop.f32.mrb[33].mxu1  ;;  %v2489_v62 = vsel %vm1179_vm4, %v2478_v41, 0.0 }
 0x977   : > { %2490 = vadd.xlane.f32.xlu0 %v2489_v62 }
 0x978   : > { %v2479_v38 = vadd.f32 %v3684_v8, %v2467_v61 }
 0x97a   : > { %v2492_v7 = vsel %vm1179_vm4, %v2479_v38, 0.0 }
 0x97b   : > { %2493 = vadd.xlane.f32.xlu1 %v2492_v7 }
 0x9f8   : > { %v2482_v13 = vpop.xlane.xlu1 %2481 }
 0x9f9   : > { %v2495_v33 = vmul.f32 0.03125, %v2482_v13 }
 0x9fb   : > { %v2500_v57 = vsub.f32 %v2475_v43, %v2495_v33 }
 0x9fc   : > { %v2485_v26 = vpop.xlane.xlu0 %2484 }
 0x9fd   : > { %v2496_v12 = vmul.f32 0.03125, %v2485_v26  ;;  %v2505_v14 = vmul.f32 %v2500_v57, %v2500_v57  ;;  %v2548_v26 = vrot.slane %v5496_v44, %v5278_v0 }
 0x9ff   : > { %v2501_v54 = vsub.f32 %v2476_v27, %v2496_v12  ;;  %v2510_v52 = vsel %vm1179_vm4, %v2505_v14, 0.0 }
 0xa00   : > { %v2488_v11 = vpop.xlane.xlu1 %2487  ;;  %2511 = vadd.xlane.f32.xlu0 %v2510_v52  ;;  %v2557_v52 = vrot.slane %v5499_v35, %v5278_v0 }
 0xa01   : > { %v2497_v1 = vmul.f32 0.03125, %v2488_v11  ;;  %v2506_v37 = vmul.f32 %v2501_v54, %v2501_v54 }
 0xa03   : > { %v2502_v2 = vsub.f32 %v2477_v6, %v2497_v1  ;;  %v2513_v58 = vsel %vm1179_vm4, %v2506_v37, 0.0  ;;  %v2565_v6 = vld [vmem:[%s5957_s28 + $0x10] sm:$0xff] }
 0xa04   : > { %v2491_v10 = vpop.xlane.xlu0 %2490  ;;  %2514 = vadd.xlane.f32.xlu1 %v2513_v58  ;;  %v4128_v59 = vpack.c.bf16 %v2566_v31, %v2565_v6  ;;  %v2567_v6 = vld [vmem:[%s5958_s1] sm:$0xff] }
 0xa05   : > { %v2498_v46 = vmul.f32 0.03125, %v2491_v10  ;;  %v2507_v8 = vmul.f32 %v2502_v2, %v2502_v2 }
 0xa06   : > { %4129 = vmatpush3.bf16.msra.mxu0 %v4128_v59 }
 0xa07   : > { %v2503_v22 = vsub.f32 %v2478_v41, %v2498_v46  ;;  %v2516_v42 = vsel %vm1179_vm4, %v2507_v8, 0.0  ;;  %4170 = vmatprep.subr.bf16.mxu0 %v5952_v3 }
 0xa08   : > { %2517 = vadd.xlane.f32.xlu0 %v2516_v42  ;;  %v2494_v43 = vpop.xlane.xlu1 %2493 }
 0xa09   : > { %v2499_v24 = vmul.f32 0.03125, %v2494_v43  ;;  %v2508_v25 = vmul.f32 %v2503_v22, %v2503_v22 }
 0xa0b   : > { %v2504_v45 = vsub.f32 %v2479_v38, %v2499_v24  ;;  %v2519_v36 = vsel %vm1179_vm4, %v2508_v25, 0.0 }
 0xa0c   : > { %2520 = vadd.xlane.f32.xlu1 %v2519_v36 }
 0xa0d   : > { %v2509_v27 = vmul.f32 %v2504_v45, %v2504_v45 }
 0xa0f   : > { %v2522_v28 = vsel %vm1179_vm4, %v2509_v27, 0.0 }
 0xa10   : > { %2523 = vadd.xlane.f32.xlu0 %v2522_v28 }
 0xa8d   : > { %v2512_v34 = vpop.xlane.xlu0 %2511 }
 0xa8e   : > { %v2525_v50 = vmul.f32 0.03125, %v2512_v34 }
 0xa90   : > { %v2530_v41 = vadd.f32 1e-05, %v2525_v50  ;;  %v2568_v50 = vld [vmem:[%s5958_s1 + $0x8] sm:$0xff] }
 0xa91   : > { %v2515_v60 = vpop.xlane.xlu1 %2514 }
 0xa92   : > { %4525 = vrsqrt.f32 %v2530_v41  ;;  %v2526_v61 = vmul.f32 0.03125, %v2515_v60 }
 0xa94   : > { %v2531_v51 = vadd.f32 1e-05, %v2526_v61  ;;  %v2569_v61 = vld [vmem:[%s5958_s1 + $0x10] sm:$0xff] }
 0xa95   : > { %v2518_v62 = vpop.xlane.xlu0 %2517 }
 0xa96   : > { %4527 = vrsqrt.f32 %v2531_v51  ;;  %v2527_v38 = vmul.f32 0.03125, %v2518_v62  ;;  %v4547_v62 = vld [vmem:[%s5928_s6] sm:$0xff] }
 0xa98   : > { %v2532_v7 = vadd.f32 1e-05, %v2527_v38 }
 0xa99   : > { %v2521_v13 = vpop.xlane.xlu1 %2520 }
 0xa9a   : > { %4529 = vrsqrt.f32 %v2532_v7  ;;  %v2528_v33 = vmul.f32 0.03125, %v2521_v13  ;;  %v4548_v13 = vld [vmem:[%s5928_s6 + $0x8] sm:$0xff] }
 0xa9c   : > { %v4526_v12 = vpop.eup %4525  ;;  %v2533_v14 = vadd.f32 1e-05, %v2528_v33 }
 0xa9d   : > { %v2540_v11 = vmul.f32 %v4526_v12, %v2500_v57  ;;  %v2524_v1 = vpop.xlane.xlu0 %2523 }
 0xa9e   : > { %4531 = vrsqrt.f32 %v2533_v14  ;;  %v2529_v37 = vmul.f32 0.03125, %v2524_v1  ;;  %v4550_v1 = vld [vmem:[%s5928_s6 + $0x58] sm:$0xff] }
 0xa9f   : > { %v2549_v58 = vmul.f32 %v2548_v26, %v2540_v11 }
 0xaa0   : > { %v4528_v10 = vpop.eup %4527  ;;  %v2534_v46 = vadd.f32 1e-05, %v2529_v37 }
 0xaa1   : > { %v2558_v8 = vadd.f32 %v2557_v52, %v2549_v58  ;;  %v2541_v42 = vmul.f32 %v4528_v10, %v2501_v54 }
 0xaa2   : > { %4533 = vrsqrt.f32 %v2534_v46  ;;  %v2570_v46 = vld [vmem:[%s5958_s1 + $0x18] sm:$0xff] }
 0xaa3   : > { %3928 = vmatmul.mubr.msk.f32.vlgmr.msra.gmra.mrb[42].mxu0 %vm1179_vm4, %v2558_v8  ;;  %v2550_v43 = vmul.f32 %v2548_v26, %v2541_v42  ;;  %v4551_v8 = vld [vmem:[%s5928_s6 + $0x28] sm:$0xff] }
 0xaa4   : > { %v4530_v24 = vpop.eup %4529  ;;  %3930 = vmatprep.mubr.msk.f32.mxu0 %vm4664_vm0, %v5951_v47 }
 0xaa5   : > { %v2559_v25 = vadd.f32 %v2557_v52, %v2550_v43  ;;  %v2542_v36 = vmul.f32 %v4530_v24, %v2502_v2 }
 0xaa7   : > { %3931 = vmatmul.mubr.msk.f32.gmra.mrb[44].mxu0 %vm1179_vm4, %v2559_v25  ;;  %v2551_v0 = vmul.f32 %v2548_v26, %v2542_v36 }
 0xaa8   : > { %v4532_v57 = vpop.eup %4531  ;;  %3933 = vmatprep.mubr.msk.f32.mxu0 %vm4664_vm0, %v5951_v47 }
 0xaa9   : > { %v2560_v27 = vadd.f32 %v2557_v52, %v2551_v0  ;;  %v2543_v54 = vmul.f32 %v4532_v57, %v2503_v22  ;;  %v4552_v0 = vld [vmem:[%s5928_s6 + $0x78] sm:$0xff] }
 0xaab   : > { %3934 = vmatmul.mubr.msk.f32.gmra.mrb[46].mxu0 %vm1179_vm4, %v2560_v27  ;;  %v2552_v28 = vmul.f32 %v2548_v26, %v2543_v54  ;;  %v4553_v27 = vld [vmem:[%s5928_s6 + $0x30] sm:$0xff] }
 0xaac   : > { %v4534_v29 = vpop.eup %4533  ;;  %3936 = vmatprep.mubr.msk.f32.mxu0 %vm4664_vm0, %v5951_v47 }
 0xaad   : > { %v2561_v2 = vadd.f32 %v2557_v52, %v2552_v28  ;;  %v2544_v49 = vmul.f32 %v4534_v29, %v2504_v45  ;;  %v4554_v28 = vld [vmem:[%s5928_s6 + $0x38] sm:$0xff] }
 0xaaf   : > { %3937 = vmatmul.mubr.msk.f32.gmra.mrb[48].mxu0 %vm1179_vm4, %v2561_v2  ;;  %v2553_v30 = vmul.f32 %v2548_v26, %v2544_v49  ;;  %v5961_v49 = vld [vmem:[#allocation35_spill] sm:$0xff] }
 0xab0   : > { %3939 = vmatprep.mubr.msk.f32.mxu0 %vm4664_vm0, %v5951_v47 }
 0xab1   : > { %v2562_v22 = vadd.f32 %v2557_v52, %v2553_v30  ;;  %v4549_v52 = vld [vmem:[%s5928_s6 + $0x50] sm:$0xff] }
 0xab3   : > { %3940 = vmatmul.mubr.msk.f32.gmra.mrb[50].mxu0 %vm1179_vm4, %v2562_v22 }
 0xb76   : > { %v2653_v31 = vpop.f32.mrb[42].mxu0 }
 0xb77   : > { %v3929_v59 = vpop.f32.mrb[43].mxu0  ;;  %v2654_v34 = vadd.f32 %v2653_v31, %v2567_v6 }
 0xb78   : > { %v4555_v59 = vld [vmem:[%s5928_s6 + $0x80] sm:$0xff] }
 0xb79   : > { %v2698_v51 = vmul.f32 %v2654_v34, %v5025_v53  ;;  %v2678_v38 = vmul.f32 %v4547_v62, %v2654_v34  ;;  %v5605_v26 = vmul.f32 %v2654_v34, %v5077_v48  ;;  %v5611_v11 = vmul.f32 %v4549_v52, %v2654_v34  ;;  %v4557_v62 = vld [vmem:[%s5928_s6 + $0x10] sm:$0xff] }
 0xb7a   : > { %v2658_v41 = vpop.f32.mrb[44].mxu0  ;;  %v5623_v42 = vmul.f32 %v4551_v8, %v2654_v34  ;;  %v5626_v43 = vmul.f32 %v2654_v34, %v5116_v39  ;;  %v5640_v57 = vmul.f32 %v4552_v0, %v2654_v34  ;;  %v5966_v8 = vld [vmem:[#allocation30_spill] sm:$0xff]  ;;  %v4560_v0 = vld [vmem:[%s5928_s6 + $0x68] sm:$0xff] }
 0xb7b   : > { %v2659_v45 = vadd.f32 %v2658_v41, %v2568_v50  ;;  %v3932_v60 = vpop.f32.mrb[45].mxu0  ;;  %v4556_v50 = vld [vmem:[%s5928_s6 + $0x88] sm:$0xff] }
 0xb7c   : > { %v2571_v60 = vld [vmem:[%s5958_s1 + $0x20] sm:$0xff]  ;;  %s5976_s1 = sld [smem:[#allocation17_spill]] }
 0xb7d   : > { %v2699_v7 = vmul.f32 %v2659_v45, %v5029_v55  ;;  %v2679_v33 = vmul.f32 %v4548_v13, %v2659_v45  ;;  %v5608_v12 = vmul.f32 %v2659_v45, %v5070_v40  ;;  %v5614_v53 = vmul.f32 %v4550_v1, %v2659_v45  ;;  %v5964_v1 = vld [vmem:[#allocation32_spill] sm:$0xff] }
 0xb7e   : > { %v2663_v14 = vpop.f32.mrb[46].mxu0  ;;  %v5620_v40 = vmul.f32 %v2654_v34, %v5031_v56  ;;  %v5634_v25 = vmul.f32 %v2659_v45, %v5043_v5  ;;  %v5959_v56 = vld [vmem:[#allocation28_spill] sm:$0xff]  ;;  %v5644_v54 = vmul.f32 %v4553_v27, %v2659_v45  ;;  %v5960_v5 = vld [vmem:[#allocation34_spill] sm:$0xff]  ;;  %v5658_v34 = vmul.f32 %v4555_v59, %v2659_v45 }
 0xb7f   : > { %v2664_v37 = vadd.f32 %v2663_v14, %v2569_v61  ;;  %v3935_v58 = vpop.f32.mrb[47].mxu0  ;;  %v4435_v55 = vpack.i.bf16 %v2699_v7, %v2698_v51  ;;  %v4131_v10 = vpack.c.bf16 %v2679_v33, %v2678_v38  ;;  %v4460_v48 = vpack.i.bf16 %v5608_v12, %v5605_v26  ;;  %v5962_v61 = vld [vmem:[#allocation25_spill] sm:$0xff]  ;;  %v5963_v33 = vld [vmem:[#allocation26_spill] sm:$0xff]  ;;  %v2677_v26 = vld [vmem:[%s5972_s11] sm:$0xff]  ;;  %s5975_s11 = sld [smem:[#allocation12_spill]] }
 0xb80   : > { %v4151_v24 = vpack.c.bf16 %v5614_v53, %v5611_v11  ;;  %v5650_v2 = vmul.f32 %v2659_v45, %v5960_v5  ;;  %v4558_v45 = vld [vmem:[%s5928_s6 + $0x18] sm:$0xff] }
 0xb81   : > { %4436 = vrot.lane.b32.xlu1 %v4435_v55, %s4667_s23  ;;  %4133 = vmatpush1.bf16.xpose.msk.msra.mxu1 %vm5129_vm5, %v4131_v10  ;;  %v5637_v36 = vmul.f32 %v2664_v37, %v5959_v56  ;;  %v5647_v29 = vmul.f32 %v4554_v28, %v2664_v37  ;;  %v5653_v30 = vmul.f32 %v2664_v37, %v5961_v49  ;;  %v5965_v55 = vld [vmem:[#allocation31_spill] sm:$0xff] }
 0xb82   : > { %v2668_v39 = vpop.f32.mrb[48].mxu0  ;;  %4134 = vmatprep.subr.bf16.mxu1 %v5952_v3  ;;  %v5661_v41 = vmul.f32 %v4556_v50, %v2664_v37  ;;  %v2700_v51 = vmul.f32 %v2664_v37, %v5962_v61  ;;  %v2680_v38 = vmul.f32 %v4557_v62, %v2664_v37  ;;  %v2710_v58 = vmul.f32 %v2664_v37, %v5964_v1  ;;  %v4559_v56 = vld [vmem:[%s5928_s6 + $0x60] sm:$0xff]  ;;  %v4562_v61 = vld [vmem:[%s5928_s6 + $0x90] sm:$0xff] }
 0xb83   : > { %v2669_v22 = vadd.f32 %v2668_v39, %v2570_v46  ;;  %v3938_v6 = vpop.f32.mrb[49].mxu0  ;;  %v4450_v31 = vpack.i.bf16 %v5637_v36, %v5634_v25  ;;  %v4143_v7 = vpack.c.bf16 %v5647_v29, %v5644_v54  ;;  %v4475_v13 = vpack.i.bf16 %v5653_v30, %v5650_v2  ;;  %v4561_v49 = vld [vmem:[%s5928_s6 + $0x40] sm:$0xff]  ;;  %v5971_v1 = vld [vmem:[#allocation37_spill] sm:$0xff] }
 0xb84   : > { %v2690_v36 = vmul.f32 %v4559_v56, %v2664_v37  ;;  %v4163_v27 = vpack.c.bf16 %v5661_v41, %v5658_v34  ;;  %v5967_v6 = vld [vmem:[#allocation36_spill] sm:$0xff]  ;;  %v5968_v34 = vld [vmem:[#allocation27_spill] sm:$0xff]  ;;  %v4566_v56 = vld [vmem:[%s5928_s6 + $0x98] sm:$0xff] }
 0xb85   : > { %v2701_v14 = vmul.f32 %v2669_v22, %v5963_v33  ;;  %v2681_v52 = vmul.f32 %v4558_v45, %v2669_v22  ;;  %v2711_v10 = vmul.f32 %v2669_v22, %v5965_v55  ;;  %v2706_v25 = vmul.f32 %v2669_v22, %v5966_v8  ;;  %v4563_v62 = vld [vmem:[%s5928_s6 + $0x20] sm:$0xff]  ;;  %v5970_v33 = vld [vmem:[#allocation33_spill] sm:$0xff]  ;;  %v4564_v45 = vld [vmem:[%s5928_s6 + $0x48] sm:$0xff] }
 0xb86   : > { %v2673_v46 = vpop.f32.mrb[50].mxu0  ;;  %v2691_v39 = vmul.f32 %v4560_v0, %v2669_v22  ;;  %v2686_v30 = vmul.f32 %v4561_v49, %v2669_v22  ;;  %v2716_v59 = vmul.f32 %v2669_v22, %v5967_v6  ;;  %v2696_v37 = vmul.f32 %v4562_v61, %v2669_v22 }
 0xb87   : > { %v2674_v54 = vadd.f32 %v2673_v46, %v2571_v60  ;;  %v3941_v28 = vpop.f32.mrb[51].mxu0  ;;  %v4440_v29 = vpack.i.bf16 %v2701_v14, %v2700_v51  ;;  %v4135_v5 = vpack.c.bf16 %v2681_v52, %v2680_v38  ;;  %v4465_v2 = vpack.i.bf16 %v2711_v10, %v2710_v58  ;;  %v5969_v60 = vld [vmem:[#allocation29_spill] sm:$0xff] }
 0xb88   : > { %v4155_v50 = vpack.c.bf16 %v2691_v39, %v2690_v36  ;;  %v4565_v58 = vld [vmem:[%s5928_s6 + $0x70] sm:$0xff] }
 0xb89   : > { %4441 = vrot.lane.b32.xlu0 %v4440_v29, %s4667_s23  ;;  %4137 = vmatpush1.bf16.xpose.msk.msra.mxu1 %vm5129_vm5, %v4135_v5  ;;  %v2702_v41 = vmul.f32 %v2674_v54, %v5968_v34  ;;  %v2707_v51 = vmul.f32 %v2674_v54, %v5969_v60  ;;  %v2682_v38 = vmul.f32 %v4563_v62, %v2674_v54 }
 0xb8a   : > { %4138 = vmatprep.subr.bf16.mxu1 %v5952_v3  ;;  %v2712_v14 = vmul.f32 %v2674_v54, %v5970_v33  ;;  %v2687_v52 = vmul.f32 %v4564_v45, %v2674_v54  ;;  %v2717_v22 = vmul.f32 %v2674_v54, %v5971_v1  ;;  %v2692_v55 = vmul.f32 %v4565_v58, %v2674_v54 }
 0xb8b   : > { %v4445_v10 = vpack.i.bf16 %v5620_v40, %v2702_v41  ;;  %v4455_v46 = vpack.i.bf16 %v2707_v51, %v2706_v25  ;;  %v4139_v8 = vpack.c.bf16 %v5623_v42, %v2682_v38  ;;  %v2697_v36 = vmul.f32 %v4566_v56, %v2674_v54 }
 0xb8c   : > { %v4470_v0 = vpack.i.bf16 %v5626_v43, %v2712_v14  ;;  %v4147_v39 = vpack.c.bf16 %v2687_v52, %v2686_v30  ;;  %v4480_v28 = vpack.i.bf16 %v2717_v22, %v2716_v59  ;;  %v4159_v29 = vpack.c.bf16 %v5640_v57, %v2692_v55 }
 0xb8d   : > { %4451 = vrot.lane.b32.xlu0 %v4450_v31, %s4667_s23  ;;  %4446 = vrot.lane.b32.xlu1 %v4445_v10, %s4667_s23  ;;  %v4167_v5 = vpack.c.bf16 %v2697_v36, %v2696_v37  ;;  %v5973_v36 = vld [vmem:[#allocation39_spill] sm:$0xff] }
 0xb91   : > { %4456 = vrot.lane.b32.xlu0 %v4455_v46, %s4667_s23  ;;  %4141 = vmatpush1.bf16.xpose.msk.msra.mxu1 %vm5129_vm5, %v4139_v8 }
 0xb92   : > { %4142 = vmatprep.subr.bf16.mxu1 %v5952_v3 }
 0xb95   : > { %4461 = vrot.lane.b32.xlu0 %v4460_v48, %s4667_s23 }
 0xb99   : > { %4466 = vrot.lane.b32.xlu0 %v4465_v2, %s4667_s23  ;;  %4145 = vmatpush1.bf16.xpose.msk.msra.mxu1 %vm5129_vm5, %v4143_v7 }
 0xb9a   : > { %4146 = vmatprep.subr.bf16.mxu1 %v5952_v3 }
 0xb9d   : > { %4471 = vrot.lane.b32.xlu0 %v4470_v0, %s4667_s23 }
 0xba1   : > { %4476 = vrot.lane.b32.xlu0 %v4475_v13, %s4667_s23  ;;  %4149 = vmatpush1.bf16.xpose.msk.msra.mxu1 %vm5129_vm5, %v4147_v39 }
 0xba2   : > { %4150 = vmatprep.subr.bf16.mxu1 %v5952_v3 }
 0xba5   : > { %4481 = vrot.lane.b32.xlu0 %v4480_v28, %s4667_s23  ;;  %s5974_s23 = sld [smem:[#allocation16_spill]] }
 0xba9   : > { %4153 = vmatpush1.bf16.xpose.msk.msra.mxu1 %vm5129_vm5, %v4151_v24 }
 0xbaa   : > { %4154 = vmatprep.subr.bf16.mxu1 %v5952_v3 }
 0xbb1   : > { %4157 = vmatpush1.bf16.xpose.msk.msra.mxu1 %vm5129_vm5, %v4155_v50 }
 0xbb2   : > { %4158 = vmatprep.subr.bf16.mxu1 %v5952_v3 }
 0xbb9   : > { %4161 = vmatpush1.bf16.xpose.msk.msra.mxu1 %vm5129_vm5, %v4159_v29 }
 0xbba   : > { %4162 = vmatprep.subr.bf16.mxu1 %v5952_v3 }
 0xbc1   : > { %4165 = vmatpush1.bf16.xpose.msk.msra.mxu1 %vm5129_vm5, %v4163_v27 }
 0xbc2   : > { %4166 = vmatprep.subr.bf16.mxu1 %v5952_v3 }
 0xbc9   : > { %4169 = vmatpush1.bf16.xpose.msk.msra.mxu1 %vm5129_vm5, %v4167_v5 }
 0xbca   : > { %4230 = vmatprep.subr.bf16.mxu1 %v5952_v3 }
 0xbd0   : > { %3710 = vmatmul.mubr.msk.f32.vlgmr.msra.gmra.mrb[34].mxu1 %vm1179_vm4, %v2677_v26 }
 0xbd1   : > { %3950 = vmatprep.mubr.msk.f32.mxu1 %vm4664_vm0, %v5951_v47 }
 0xbf3   : > { %v4437_v12 = vpop.permute.xlu1 %4436 }
 0xbf4   : > { %v4439_v11 = vunpack.i.h.bf16 %v4437_v12  ;;  %v4438_v53 = vunpack.i.l.bf16 %v4437_v12 }
 0xbf6   : > { %v4171_v48 = vpack.c.bf16 %v4439_v11, %v4438_v53 }
 0xbf8   : > { %4172 = vmatpush1.bf16.msra.mxu0 %v4171_v48 }
 0xbf9   : > { %4173 = vmatprep.subr.bf16.mxu0 %v5952_v3 }
 0xbfb   : > { %v4442_v40 = vpop.permute.xlu0 %4441 }
 0xbfc   : > { %v4444_v42 = vunpack.i.h.bf16 %v4442_v40  ;;  %v4443_v43 = vunpack.i.l.bf16 %v4442_v40 }
 0xbfe   : > { %v4174_v9 = vpack.c.bf16 %v4444_v42, %v4443_v43  ;;  %v3087_v43 = vld [vmem:[%s5975_s11] sm:$0xff]  ;;  %s5981_s11 = sld [smem:[#allocation21_spill]] }
 0xbff   : > { %v4452_v24 = vpop.permute.xlu0 %4451  ;;  %v4447_v57 = vpop.permute.xlu1 %4446 }
 0xc00   : > { %v4449_v31 = vunpack.i.h.bf16 %v4447_v57  ;;  %v4448_v7 = vunpack.i.l.bf16 %v4447_v57  ;;  %4175 = vmatpush1.bf16.msra.mxu0 %v4174_v9  ;;  %v4454_v13 = vunpack.i.h.bf16 %v4452_v24  ;;  %v4453_v25 = vunpack.i.l.bf16 %v4452_v24  ;;  %v3714_v24 = vld [vmem:[%s5976_s1] ss:$0 sm:$0xff]  ;;  %s5979_s1 = sld [smem:[#allocation19_spill]] }
 0xc01   : > { %4176 = vmatprep.subr.bf16.mxu0 %v5952_v3 }
 0xc02   : > { %v4177_v27 = vpack.c.bf16 %v4449_v31, %v4448_v7  ;;  %v4180_v2 = vpack.c.bf16 %v4454_v13, %v4453_v25 }
 0xc03   : > { %v4457_v54 = vpop.permute.xlu0 %4456 }
 0xc04   : > { %4178 = vmatpush1.bf16.msra.mxu0 %v4177_v27  ;;  %v4459_v49 = vunpack.i.h.bf16 %v4457_v54  ;;  %v4458_v30 = vunpack.i.l.bf16 %v4457_v54 }
 0xc05   : > { %4179 = vmatprep.subr.bf16.mxu0 %v5952_v3 }
 0xc06   : > { %v4183_v59 = vpack.c.bf16 %v4459_v49, %v4458_v30  ;;  %v3197_v30 = vld [vmem:[%s5977_s3] sm:$0xff] }
 0xc07   : > { %v4462_v6 = vpop.permute.xlu0 %4461 }
 0xc08   : > { %4181 = vmatpush1.bf16.msra.mxu0 %v4180_v2  ;;  %v4464_v50 = vunpack.i.h.bf16 %v4462_v6  ;;  %v4463_v61 = vunpack.i.l.bf16 %v4462_v6  ;;  %v3198_v6 = vld [vmem:[%s5977_s3 + $0x8] sm:$0xff] }
 0xc09   : > { %4182 = vmatprep.subr.bf16.mxu0 %v5952_v3 }
 0xc0a   : > { %v4186_v34 = vpack.c.bf16 %v4464_v50, %v4463_v61  ;;  %v3199_v50 = vld [vmem:[%s5977_s3 + $0x10] sm:$0xff]  ;;  %v3200_v61 = vld [vmem:[%s5977_s3 + $0x18] sm:$0xff]  ;;  %s3722_s3 = sshll.u32 %s4851_s0, 7  ;;  %s4669_s0 = smov [#allocation2]  }
 0xc0b   : > { %v4467_v37 = vpop.permute.xlu0 %4466  ;;  %s5834_s6 = scalar_lea.hbm %s4828_s12, %s3722_s3 }
 0xc0c   : > { %4184 = vmatpush1.bf16.msra.mxu0 %v4183_v59  ;;  %v4469_v41 = vunpack.i.h.bf16 %v4467_v37  ;;  %v4468_v60 = vunpack.i.l.bf16 %v4467_v37  ;;  %v4237_v59 = vpack.c.bf16 %v3198_v6, %v3197_v30  ;;  %v4240_v37 = vpack.c.bf16 %v3200_v61, %v3199_v50 }
 0xc0d   : > { %4185 = vmatprep.subr.bf16.mxu0 %v5952_v3 }
 0xc0e   : > { %v4189_v62 = vpack.c.bf16 %v4469_v41, %v4468_v60  ;;  %v3283_v41 = vld [vmem:[%s5978_s5 + $0x8] sm:$0xff]  ;;  %v3284_v60 = vld [vmem:[%s5978_s5 + $0x10] sm:$0xff] }
 0xc0f   : > { %v4472_v51 = vpop.permute.xlu0 %4471 }
 0xc10   : > { %4187 = vmatpush1.bf16.msra.mxu0 %v4186_v34  ;;  %v4474_v38 = vunpack.i.h.bf16 %v4472_v51  ;;  %v4473_v33 = vunpack.i.l.bf16 %v4472_v51  ;;  %v3282_v34 = vld [vmem:[%s5978_s5] sm:$0xff] }
 0xc11   : > { %4188 = vmatprep.subr.bf16.mxu0 %v5952_v3  ;;  %v4243_v51 = vpack.c.bf16 %v3283_v41, %v3282_v34 }
 0xc12   : > { %v4192_v45 = vpack.c.bf16 %v4474_v38, %v4473_v33  ;;  %v3286_v33 = vld [vmem:[%s5978_s5 + $0x20] sm:$0xff] }
 0xc13   : > { %v4477_v14 = vpop.permute.xlu0 %4476 }
 0xc14   : > { %4190 = vmatpush1.bf16.msra.mxu0 %v4189_v62  ;;  %v4479_v52 = vunpack.i.h.bf16 %v4477_v14  ;;  %v4478_v1 = vunpack.i.l.bf16 %v4477_v14  ;;  %v3285_v62 = vld [vmem:[%s5978_s5 + $0x18] sm:$0xff]  ;;  %v3287_v14 = vld [vmem:[%s5978_s5 + $0x28] sm:$0xff] }
 0xc15   : > { %4191 = vmatprep.subr.bf16.mxu0 %v5952_v3  ;;  %v4246_v38 = vpack.c.bf16 %v3285_v62, %v3284_v60 }
 0xc16   : > { %v4195_v58 = vpack.c.bf16 %v4479_v52, %v4478_v1 }
 0xc17   : > { %v4482_v22 = vpop.permute.xlu0 %4481 }
 0xc18   : > { %4193 = vmatpush1.bf16.msra.mxu0 %v4192_v45  ;;  %v4484_v55 = vunpack.i.h.bf16 %v4482_v22  ;;  %v4483_v10 = vunpack.i.l.bf16 %v4482_v22  ;;  %v4249_v45 = vpack.c.bf16 %v3287_v14, %v3286_v33 }
 0xc19   : > { %4194 = vmatprep.subr.bf16.mxu0 %v5952_v3 }
 0xc1a   : > { %v4198_v46 = vpack.c.bf16 %v4484_v55, %v4483_v10 }
 0xc1c   : > { %4196 = vmatpush1.bf16.msra.mxu0 %v4195_v58  ;;  %v5980_v58 = vld [vmem:[#allocation38_spill] sm:$0xff] }
 0xc1d   : > { %4197 = vmatprep.subr.bf16.mxu0 %v5952_v3  ;;  %v3189_v55 = vsub.s32 2, %v5980_v58 }
 0xc1f   : > { %v3190_v10 = vrot.slane %v5496_v44, %v3189_v55 }
 0xc20   : > { %4199 = vmatpush1.bf16.msra.mxu0 %v4198_v46 }
 0xc21   : > { %4200 = vmatprep.subr.bf16.mxu0 %v5952_v3 }
 0xca3   : > { %v2847_v8 = vpop.f32.mrb[34].mxu1 }
 0xca4   : > { %v2849_v56 = vpop.f32.mrb[35].mxu1  ;;  %v2848_v39 = vadd.f32 %v2847_v8, %v5288_v32  ;;  %v3088_v32 = vld [vmem:[%s5974_s23] sm:$0xff] }
 0xca5   : > { %v2850_v0 = vadd.f32 %v2849_v56, %v5973_v36  ;;  %v3195_v56 = vrot.slane %v5499_v35, %v3189_v55 }
 0xca7   : > { %v2852_v28 = vsel %vm1179_vm4, %v2850_v0, -inf }
 0xca8   : > { %v2853_v29 = vmax.f32 %v2848_v39, %v2852_v28  ;;  %v3289_v28 = vld [vmem:[%s5978_s5 + $0x38] sm:$0xff] }
 0xcaa   : > { %2854 = vmax.xlane.f32.xlu1 %v2853_v29 }
 0xd37   : > { %v2855_v5 = vpop.xlane.xlu1 %2854 }
 0xd38   : > { %v2856_v26 = vsub.f32 %v2848_v39, %v2855_v5  ;;  %v2857_v12 = vsub.f32 %v2850_v0, %v2855_v5  ;;  %v3288_v39 = vld [vmem:[%s5978_s5 + $0x30] sm:$0xff]  ;;  %v3715_v5 = vld [vmem:[%s5979_s1] ss:$0 sm:$0xff]  ;;  %s5982_s1 = sld [smem:[#allocation23_spill]] }
 0xd39   : > { %v4252_v29 = vpack.c.bf16 %v3289_v28, %v3288_v39 }
 0xd3a   : > { %v2858_v11 = vmul.f32 1.442695, %v2856_v26  ;;  %v2860_v53 = vmul.f32 1.442695, %v2857_v12 }
 0xd3c   : > { %4535 = vpow2.f32 %v2858_v11 }
 0xd3d   : > { %4537 = vpow2.f32 %v2860_v53  ;;  %v3718_v53 = vld [vmem:[%s5981_s11] ss:$0 sm:$0xff]  ;;  %s932_s11 = sand.u32 1, %s4623_s16  }
 0xd3e   : > { %v3418_v30 = vld [vmem:[%s5982_s1] sm:$0xff]  ;;  %v3419_v6 = vld [vmem:[%s5982_s1 + $0x8] sm:$0xff]  ;;  %v3420_v50 = vld [vmem:[%s5982_s1 + $0x10] sm:$0xff]  ;;  %s3504_s8 = scalar_lea.sflag [#allocation3], %s932_s11 }
 0xd3f   : > { %v3421_v61 = vld [vmem:[%s5982_s1 + $0x18] sm:$0xff]  ;;  %s3619_s1 = sshll.u32 %s932_s11, 3 }
 0xd46   : > { %v4536_v48 = vpop.eup %4535 }
 0xd47   : > { %v4538_v40 = vpop.eup %4537 }
 0xd48   : > { %3711 = vmatprep.mubr.msk.f32.mxu0 %vm1179_vm4, %v4538_v40 }
 0xd49   : > { %3010 = vmatmul.mubr.f32.vlgmr.msra.gmra.mrb[52].mxu0 %v4536_v48 }
 0xd4a   : > { %4202 = vmatpush1.bf16.msra.mxu0 %v5333_v4  ;;  %3712 = vmatprep.mubr.msk.f32.mxu0 %vm1179_vm4, %v4538_v40  ;;  %v3089_v4 = vld [vmem:[%s5974_s23 + $0x8] sm:$0xff] }
 0xd4b   : > { %4203 = vmatprep.subr.bf16.mxu0 %v5952_v3 }
 0xd4e   : > { %4205 = vmatpush1.bf16.msra.mxu0 %v5345_v63  ;;  %v4231_v63 = vpack.c.bf16 %v3089_v4, %v3088_v32 }
 0xd4f   : > { %4206 = vmatprep.subr.bf16.mxu0 %v5952_v3 }
 0xd50   : > { %4232 = vmatpush3.bf16.msra.mxu1 %v4231_v63 }
 0xd51   : > { %4233 = vmatprep.subr.bf16.mxu1 %v5952_v3 }
 0xd52   : > { %4208 = vmatpush1.bf16.msra.mxu0 %v5356_v16  ;;  %v3090_v16 = vld [vmem:[%s5974_s23 + $0x10] sm:$0xff] }
 0xd53   : > { %4209 = vmatprep.subr.bf16.mxu0 %v5952_v3 }
 0xd56   : > { %4211 = vmatpush1.bf16.msra.mxu0 %v5362_v15  ;;  %v3091_v15 = vld [vmem:[%s5974_s23 + $0x18] sm:$0xff] }
 0xd57   : > { %4212 = vmatprep.subr.bf16.mxu0 %v5952_v3 }
 0xd5a   : > { %4214 = vmatpush1.bf16.msra.mxu0 %v5368_v17  ;;  %v4234_v17 = vpack.c.bf16 %v3091_v15, %v3090_v16 }
 0xd5b   : > { %4215 = vmatprep.subr.bf16.mxu0 %v5952_v3 }
 0xd5c   : > { %4235 = vmatpush3.bf16.msra.mxu1 %v4234_v17 }
 0xd5d   : > { %4242 = vmatprep.subr.bf16.mxu1 %v5952_v3 }
 0xd5e   : > { %4217 = vmatpush1.bf16.msra.mxu0 %v5374_v18 }
 0xd5f   : > { %4218 = vmatprep.subr.bf16.mxu0 %v5952_v3 }
 0xd62   : > { %4220 = vmatpush1.bf16.msra.mxu0 %v5380_v19 }
 0xd63   : > { %4221 = vmatprep.subr.bf16.mxu0 %v5952_v3 }
 0xd66   : > { %4223 = vmatpush1.bf16.msra.mxu0 %v5386_v20 }
 0xd67   : > { %4224 = vmatprep.subr.bf16.mxu0 %v5952_v3 }
 0xd6a   : > { %4226 = vmatpush1.bf16.msra.mxu0 %v5392_v21 }
 0xd6b   : > { %4227 = vmatprep.subr.bf16.mxu0 %v5952_v3 }
 0xd6e   : > { %4229 = vmatpush1.bf16.msra.mxu0 %v5398_v23 }
 0xd6f   : > { %4236 = vmatprep.subr.bf16.mxu0 %v5952_v3 }
 0xd71   : > { %3080 = vmatmul.mubr.f32.vlgmr.msra.gmra.mrb[54].mxu0 %v4536_v48 }
 0xd72   : > { %3961 = vmatprep.mubr.msk.f32.mxu0 %vm4664_vm0, %v5951_v47  ;;  %4238 = vmatpush3.bf16.msra.mxu0 %v4237_v59  ;;  %v4255_v59 = vpack.c.bf16 %v3419_v6, %v3418_v30 }
 0xd73   : > { %4239 = vmatprep.subr.bf16.mxu0 %v5952_v3 }
 0xd76   : > { %4241 = vmatpush3.bf16.msra.mxu0 %v4240_v37  ;;  %v4258_v37 = vpack.c.bf16 %v3421_v61, %v3420_v50 }
 0xd77   : > { %4254 = vmatprep.subr.bf16.mxu0 %v5952_v3 }
 0xe1c   : > { %v3011_v18 = vpop.f32.mrb[52].mxu0 }
 0xe1d   : > { %v3013_v19 = vpop.f32.mrb[53].mxu0 }
 0xe44   : > { %v3081_v20 = vpop.f32.mrb[54].mxu0 }
 0xe45   : > { %4539 = vrcp.f32 %v3081_v20  ;;  %v3083_v21 = vpop.f32.mrb[55].mxu0 }
 0xe46   : > { %v3387_v21 = vsub.s32 3, %v5980_v58 }
 0xe4f   : > { %v4540_v23 = vpop.eup %4539 }
 0xe50   : > { %v3086_v42 = vmul.f32 %v4540_v23, %v3011_v18  ;;  %v4567_v23 = vld [vmem:[%s4798_s27] sm:$0xff] }
 0xe52   : > { %3951 = vmatmul.mubr.msk.f32.vlgmr.msra.gmra.mrb[36].mxu1 %vm1179_vm4, %v3086_v42  ;;  %v3388_v42 = vrot.slane %v4567_v23, %v3387_v21 }
 0xe53   : > { %3980 = vmatprep.mubr.msk.f32.mxu1 %vm4664_vm0, %v5951_v47  ;;  %4244 = vmatpush3.bf16.msra.mxu1 %v4243_v51  ;;  %v3410_v51 = vsub.s32 4, %v5980_v58 }
 0xe54   : > { %4245 = vmatprep.subr.bf16.mxu1 %v5952_v3 }
 0xe55   : > { %v3411_v62 = vrot.slane %v4567_v23, %v3410_v51 }
 0xe57   : > { %4247 = vmatpush3.bf16.msra.mxu1 %v4246_v38 }
 0xe58   : > { %4248 = vmatprep.subr.bf16.mxu1 %v5952_v3 }
 0xe5b   : > { %4250 = vmatpush3.bf16.msra.mxu1 %v4249_v45 }
 0xe5c   : > { %4251 = vmatprep.subr.bf16.mxu1 %v5952_v3 }
 0xe5f   : > { %4253 = vmatpush3.bf16.msra.mxu1 %v4252_v29 }
 0xf25   : > { %v3161_v9 = vpop.f32.mrb[36].mxu1 }
 0xf26   : > { %v3165_v57 = vadd.f32 %v3161_v9, %v3087_v43  ;;  %v3952_v31 = vpop.f32.mrb[37].mxu1 }
 0xf28   : > { %v3173_v7 = vadd.f32 %v3714_v24, %v3165_v57  ;;  %v4568_v24 = vld [vmem:[%s5929_s4] sm:$0xff]  ;;  %s934_s4 = scalar_lea.vmem [#allocation2], %s3619_s1  ;;  %s4573_s1 = sshll.u32 %s4669_s0, 4  ;;  %s4574_s1 = int_to_ptr.vmem [resolvable:$false] %s4573_s1 }
 0xf29   : > { %v3393_v57 = vrot.slane %v4568_v24, %v3387_v21  ;;  %v3416_v14 = vrot.slane %v4568_v24, %v3410_v51  ;;  %s3517_s5 = sshll.u32 %s934_s4, 4  ;;  %s4575_s13 = scalar_lea.vmem %s4574_s1, 256  ;;  %s5836_s5 = int_to_ptr.vmem [resolvable:$true] %s3517_s5 }
 0xf2a   : > { %v3174_v13 = vsel %vm1179_vm4, %v3173_v7, 0.0  ;;  %s4569_s9 = scalar_lea.vmem %s5836_s5, 128  ;;  %p4576_p0 = scmp.lt.s32.totalorder %s5836_s5, %s4574_s1 }
 0xf2b   : > { %3175 = vadd.xlane.f32.xlu0 %v3174_v13  ;;  %p4570_p11 = scmp.ne.s32.totalorder %s5836_s5, %s4569_s9  ;;  %p4577_p1 = scmp.lt.s32.totalorder %s4575_s13, %s4569_s9 }
 0xf2d   : > { %p4571_p12 = pnand %p4570_p11, %p4868_p5  ;;  %p4578_p2 = por %p4577_p1, %p4576_p0 }
 0xf2f   : > { %p4572_p13 = pneg %p4571_p12 }
 0xf31   : > { %p4579_p3 = pnand %p4578_p2, %p4572_p13 }
 0xfb8   : > { %v3176_v25 = vpop.xlane.xlu0 %3175 }
 0xfb9   : > { %v3177_v27 = vmul.f32 0.03125, %v3176_v25 }
 0xfbb   : > { %v3178_v54 = vsub.f32 %v3173_v7, %v3177_v27 }
 0xfbd   : > { %v3179_v2 = vmul.f32 %v3178_v54, %v3178_v54 }
 0xfbf   : > { %v3180_v49 = vsel %vm1179_vm4, %v3179_v2, 0.0 }
 0xfc0   : > { %3181 = vadd.xlane.f32.xlu1 %v3180_v49 }
0x104d   : > { %v3182_v52 = vpop.xlane.xlu1 %3181 }
0x104e   : > { %v3183_v1 = vmul.f32 0.03125, %v3182_v52  ;;  %v3719_v52 = vld [vmem:[%s4813_s20] ss:$0 sm:$0xff] }
0x1050   : > { %v3184_v22 = vadd.f32 1e-05, %v3183_v1 }
0x1052   : > { %4541 = vrsqrt.f32 %v3184_v22 }
0x105c   : > { %v4542_v46 = vpop.eup %4541 }
0x105d   : > { %v3186_v8 = vmul.f32 %v4542_v46, %v3178_v54 }
0x105f   : > { %v3191_v36 = vmul.f32 %v3190_v10, %v3186_v8 }
0x1061   : > { %v3196_v0 = vadd.f32 %v3195_v56, %v3191_v36 }
0x1063   : > { %3962 = vmatmul.mubr.msk.f32.vlgmr.msra.gmra.mrb[56].mxu0 %vm1179_vm4, %v3196_v0 }
0x1064   : > { %3991 = vmatprep.mubr.msk.f32.mxu0 %vm4664_vm0, %v5951_v47  ;;  %4256 = vmatpush3.bf16.msra.mxu0 %v4255_v59 }
0x1065   : > { %4257 = vmatprep.subr.bf16.mxu0 %v5952_v3 }
0x1068   : > { %4259 = vmatpush3.bf16.msra.mxu0 %v4258_v37 }
0x1136   : > { %v3277_v26 = vpop.f32.mrb[56].mxu0 }
0x1137   : > { %v3278_v12 = vadd.f32 %v3715_v5, %v3277_v26  ;;  %v3963_v44 = vpop.f32.mrb[57].mxu0 }
0x1139   : > { %v3281_v11 = vmax.f32 %v3278_v12, 0.0 }
0x113b   : > { %3981 = vmatmul.mubr.msk.f32.vlgmr.msra.gmra.mrb[38].mxu1 %vm2357_vm6, %v3281_v11 }
0x120e   : > { %v3359_v35 = vpop.f32.mrb[38].mxu1 }
0x120f   : > { %v3363_v48 = vadd.f32 %v3359_v35, %v3196_v0  ;;  %v3982_v40 = vpop.f32.mrb[39].mxu1 }
0x1211   : > { %v3371_v32 = vadd.f32 %v3718_v53, %v3363_v48 }
0x1213   : > { %v3372_v4 = vsel %vm1179_vm4, %v3371_v32, 0.0 }
0x1214   : > { %3373 = vadd.xlane.f32.xlu1 %v3372_v4 }
0x12a1   : > { %v3374_v47 = vpop.xlane.xlu1 %3373 }
0x12a2   : > { %v3375_v63 = vmul.f32 0.03125, %v3374_v47 }
0x12a4   : > { %v3376_v16 = vsub.f32 %v3371_v32, %v3375_v63 }
0x12a6   : > { %v3377_v15 = vmul.f32 %v3376_v16, %v3376_v16 }
0x12a8   : > { %v3378_v17 = vsel %vm1179_vm4, %v3377_v15, 0.0 }
0x12a9   : > { %3379 = vadd.xlane.f32.xlu1 %v3378_v17 }
0x1336   : > { %v3380_v18 = vpop.xlane.xlu1 %3379 }
0x1337   : > { %v3381_v19 = vmul.f32 0.03125, %v3380_v18 }
0x1339   : > { %v3382_v20 = vadd.f32 1e-05, %v3381_v19 }
0x133b   : > { %4543 = vrsqrt.f32 %v3382_v20 }
0x1345   : > { %v4544_v43 = vpop.eup %4543 }
0x1346   : > { %v3384_v9 = vmul.f32 %v4544_v43, %v3376_v16 }
0x1348   : > { %v3389_v31 = vmul.f32 %v3388_v42, %v3384_v9 }
0x134a   : > { %v3394_v7 = vadd.f32 %v3393_v57, %v3389_v31 }
0x134c   : > { %v3395_v13 = vsel %vm1179_vm4, %v3394_v7, 0.0 }
0x134d   : > { %3396 = vadd.xlane.f32.xlu1 %v3395_v13 }
0x13da   : > { %v3397_v25 = vpop.xlane.xlu1 %3396 }
0x13db   : > { %v3398_v27 = vmul.f32 0.03125, %v3397_v25 }
0x13dd   : > { %v3399_v54 = vsub.f32 %v3394_v7, %v3398_v27 }
0x13df   : > { %v3400_v2 = vmul.f32 %v3399_v54, %v3399_v54 }
0x13e1   : > { %v3401_v49 = vsel %vm1179_vm4, %v3400_v2, 0.0 }
0x13e2   : > { %3402 = vadd.xlane.f32.xlu1 %v3401_v49 }
0x146f   : > { %v3403_v34 = vpop.xlane.xlu1 %3402 }
0x1470   : > { %v3404_v41 = vmul.f32 0.03125, %v3403_v34 }
0x1472   : > { %v3405_v60 = vadd.f32 1e-05, %v3404_v41 }
0x1474   : > { %4545 = vrsqrt.f32 %v3405_v60 }
0x147e   : > { %v4546_v38 = vpop.eup %4545 }
0x147f   : > { %v3407_v33 = vmul.f32 %v4546_v38, %v3399_v54 }
0x1481   : > { %v3412_v45 = vmul.f32 %v3411_v62, %v3407_v33 }
0x1483   : > { %v3417_v3 = vadd.f32 %v3416_v14, %v3412_v45 }
0x1485   : > { %3992 = vmatmul.mubr.msk.f32.vlgmr.msra.gmra.mrb[58].mxu0 %vm1179_vm4, %v3417_v3 }
0x1558   : > { %v3498_v1 = vpop.f32.mrb[58].mxu0 }
0x1559   : > { %v3499_v22 = vadd.f32 %v3719_v52, %v3498_v1  ;;  %v3993_v55 = vpop.f32.mrb[59].mxu0 }
0x155b   : > { %3502 = vst [vmem:[%s934_s4] sm:$0xff] %v3499_v22 }
0x155c   : > { %4582 = shalt.err (!%p4579_p3)
}
0x155d   : > { %s4583_s3 = scalar_lea.hbm %s5834_s6, 128  ;;  %s4587_s4 = scalar_lea.hbm %s4828_s12, 256 }
0x155e   : > { %p4584_p4 = scmp.ne.s32.totalorder %s5834_s6, %s4583_s3  ;;  %p4588_p9 = scmp.lt.u32.totalorder %s5834_s6, %s4828_s12 }
0x155f   : > { %p4589_p10 = scmp.lt.u32.totalorder %s4587_s4, %s4583_s3  ;;  %p4591_p12 = scmp.lt.u32.totalorder %s4583_s3, %s5834_s6 }
0x1560   : > { %p4585_p7 = pnand %p4584_p4, %p4868_p5 }
0x1561   : > { %p4590_p11 = por %p4589_p10, %p4588_p9 }
0x1562   : > { %p4586_p8 = pneg %p4585_p7 }
0x1563   : > { %p4592_p0 = por %p4591_p12, %p4590_p11 }
0x1565   : > { %p4593_p13 = pnand %p4592_p0, %p4586_p8 }
0x1567   : > { %4596 = shalt.err (!%p4593_p13)
}
0x1568   : > { %4260 = dma.vmem_to_hbm [thread:$0]  (%p4868_p5), %s5836_s5, 128, %s5834_s6, %s3504_s8  }
0x1569 PF: > { %p4266_p1 = scmp.ge.s32.totalorder %s4631_s22, 2  ;;  %s3529_s9 = sand.u32 1, %s4619_s15  }
0x156a   : > { %s3530_s13 = scalar_lea.sflag [#allocation3], %s3529_s9 }
0x156b   : > { %p4263_p2 = pnand %p4266_p1, %p4872_p6 }
0x156d   : > { %4614 = dma.done.wait (!%p4263_p2), %s3530_s13, 128  }
0x156e   : > { %4616 = vsyncadd (!%p4263_p2), %s3530_s13, 4294967168  ;;  %p71_p3 = scmp.ge.s32.totalorder %s4855_s26, 4   ;;  %s5983_s15 = smov %s4623_s16 }
0x156f   : > { %s5984_s16 = smov %s4627_s18  ;;  %s5985_s18 = smov %s4866_s2 }
0x1570   : > { %s5986_s22 = smov %s4855_s26  ;;  %73 = sbr.rel (!%p71_p3) target bundleno = 57 (0x39), region = 208 }
0x1577   :  { %3535 = vsyncpa [#allocation3], 1 }
0x1578   :  { %3537 = vsyncpa [#allocation3 + $0x1], 1 }

</bundles_post_ra>
